<compile_context>
chip_gen: v7x
topology: tpu7x:2x2x1
jax: 0.10.0
libtpu: 0.0.40
codegen_flags: <defaults>
</compile_context>

<pallas_src>
import functools

import jax
import jax.numpy as jnp
from jax.experimental import pallas as pl
from jax.experimental.pallas import tpu as pltpu

_MAX_LENGTH = 1024  # matches MultiheadedAttention.max_length
_LN_EPS = 1e-5      # nn.LayerNorm default


# --------------------------------------------------------------------------
# Pallas kernel: one batch element per grid step.
# --------------------------------------------------------------------------
def _mhsa_kernel(x_ref, gamma_ref, beta_ref, wqkv_ref, wo_ref, bo_ref, er_ref,
                 o_ref, qkv_ref, ctx_ref, *, heads, eps):
    x = x_ref[0]                                   # (T, E) float32
    t, e = x.shape
    s = e // heads

    # ---- LayerNorm over the embedding (lane) axis, f32 stats ---------------
    mean = jnp.mean(x, axis=-1, keepdims=True)
    xc = x - mean
    var = jnp.mean(xc * xc, axis=-1, keepdims=True)
    x_ln = xc * jax.lax.rsqrt(var + eps) * gamma_ref[...] + beta_ref[...]

    # ---- fused block-diagonal QKV projection: one lane-dense matmul --------
    # columns [0,E): q (unscaled)  [E,2E): k (carries full E^-1/2)  [2E,3E): v
    qkv_ref[...] = jnp.dot(x_ln, wqkv_ref[...],
                           preferred_element_type=jnp.float32)

    # ---- additive causal mask, computed once per grid step -----------------
    row = jax.lax.broadcasted_iota(jnp.int32, (t, t), 0)
    col = jax.lax.broadcasted_iota(jnp.int32, (t, t), 1)
    neg = jnp.where(col > row, -1e9, 0.0).astype(jnp.float32)

    for h in range(heads):           # heads is small & static; ctx goes to a ref
        lo = h * s
        q_h = qkv_ref[:, lo:lo + s]                       # (T, s) unscaled
        k_h = qkv_ref[:, e + lo:e + lo + s]               # (T, s) pre-scaled
        v_h = qkv_ref[:, 2 * e + lo:2 * e + lo + s]       # (T, s)

        # content scores: q @ k^T (scale already folded into k)
        scores = jax.lax.dot_general(
            q_h, k_h, (((1,), (1,)), ((), ())),
            preferred_element_type=jnp.float32)

        # relative-position bias: QEr then the music-transformer "skew" as a
        # row-dependent lane rotation (row i rotates by 1 + i  ==  left shift
        # of t-1-i mod t).  Wrapped entries fall in the masked j > i region.
        qer = jax.lax.dot_general(
            q_h, er_ref[h], (((1,), (1,)), ((), ())),
            preferred_element_type=jnp.float32)
        srel = pltpu.roll(qer, shift=1, axis=1, stride=1, stride_axis=0)

        scores = scores + srel + neg

        # softmax over keys with deferred normalization
        m = jnp.max(scores, axis=-1, keepdims=True)
        p = jnp.exp(scores - m)
        inv = pl.reciprocal(jnp.sum(p, axis=-1, keepdims=True), approx=True)

        ctx = jax.lax.dot_general(
            p.astype(jnp.bfloat16), v_h.astype(jnp.bfloat16),
            (((1,), (0,)), ((), ())),
            preferred_element_type=jnp.float32)           # (T, s)
        ctx_ref[:, lo:lo + s] = (ctx * inv).astype(ctx_ref.dtype)

    # ---- single lane-dense output projection + bias + residual -------------
    out = jnp.dot(ctx_ref[...], wo_ref[...], preferred_element_type=jnp.float32)
    o_ref[0] = (out + bo_ref[...] + x).astype(o_ref.dtype)


# --------------------------------------------------------------------------
# Wrapper: builds the fused block-diagonal weights and launches the kernel.
# --------------------------------------------------------------------------
def conformer_mhsa_pallas(x, params, *, heads, mask=None,
                          max_length=_MAX_LENGTH, eps=_LN_EPS):
    if mask is not None:
        raise NotImplementedError("only mask=None (module default) is supported")
    b, t, e = x.shape
    assert e % heads == 0, "heads must divide embed_dim"
    assert t <= max_length
    s = e // heads

    # block-diagonal fused QKV weight (E, 3E); E^-1/2 folded into the K block
    eye = jnp.eye(heads, dtype=jnp.float32)
    w_q = jnp.kron(eye, params["wq"].T)
    w_k = jnp.kron(eye, params["wk"].T) * (float(e) ** -0.5)
    w_v = jnp.kron(eye, params["wv"].T)
    w_qkv = jnp.concatenate([w_q, w_k, w_v], axis=1).astype(jnp.float32)

    er = params["er"][:, max_length - t:, :].astype(jnp.float32)   # (H, T, s)
    wo_t = params["wo"].T.astype(jnp.bfloat16)                     # (E, E)

    kernel = functools.partial(_mhsa_kernel, heads=heads, eps=eps)

    return pl.pallas_call(
        kernel,
        out_shape=jax.ShapeDtypeStruct((b, t, e), x.dtype),
        grid_spec=pltpu.PrefetchScalarGridSpec(
            num_scalar_prefetch=0,
            grid=(b,),
            in_specs=[
                pl.BlockSpec((1, t, e), lambda i: (i, 0, 0)),        # x
                pl.BlockSpec((1, e), lambda i: (0, 0)),              # gamma
                pl.BlockSpec((1, e), lambda i: (0, 0)),              # beta
                pl.BlockSpec((e, 3 * e), lambda i: (0, 0)),          # W_qkv
                pl.BlockSpec((e, e), lambda i: (0, 0)),              # Wo^T (bf16)
                pl.BlockSpec((1, e), lambda i: (0, 0)),              # bo
                pl.BlockSpec((heads, t, s), lambda i: (0, 0, 0)),    # Er slice
            ],
            out_specs=pl.BlockSpec((1, t, e), lambda i: (i, 0, 0)),
            scratch_shapes=[
                pltpu.VMEM((t, 3 * e), jnp.float32),     # fused QKV
                pltpu.VMEM((t, e), jnp.bfloat16),        # head-concat context
            ],
        ),
        compiler_params=pltpu.CompilerParams(
            dimension_semantics=("parallel",),
        ),
    )(
        x,
        params["ln_gamma"].reshape(1, e).astype(jnp.float32),
        params["ln_beta"].reshape(1, e).astype(jnp.float32),
        w_qkv,
        wo_t,
        params["bo"].reshape(1, e).astype(jnp.float32),
        er,
    )


# --------------------------------------------------------------------------
# Pure-JAX reference (direct transcription of the PyTorch module, eval mode).
# --------------------------------------------------------------------------
def conformer_mhsa_reference(x, params, *, heads,
                             max_length=_MAX_LENGTH, eps=_LN_EPS):
    b, t, e = x.shape
    s = e // heads
    hp = jax.lax.Precision.HIGHEST

    mean = jnp.mean(x, axis=-1, keepdims=True)
    var = jnp.mean((x - mean) ** 2, axis=-1, keepdims=True)
    xn = (x - mean) / jnp.sqrt(var + eps) * params["ln_gamma"] + params["ln_beta"]

    xh = xn.reshape(b, t, heads, s)
    q = jnp.einsum("bthi,oi->bhto", xh, params["wq"], precision=hp)
    k = jnp.einsum("bthi,oi->bhto", xh, params["wk"], precision=hp)
    v = jnp.einsum("bthi,oi->bhto", xh, params["wv"], precision=hp)

    er = params["er"][:, max_length - t:, :]
    qer = jnp.einsum("bhts,hls->bhtl", q, er, precision=hp)
    posmask = jnp.flip(jnp.triu(jnp.ones((t, t)), 1), axis=1)
    qer = jnp.where(posmask == 1, 0.0, qer)
    padded = jnp.pad(qer, ((0, 0), (0, 0), (0, 0), (1, 0)))
    srel = padded.reshape(b, heads, t + 1, t)[:, :, 1:, :]

    scale = float(e) ** -0.25
    scores = jnp.einsum("bhts,bhls->bhtl", q * scale, k * scale,
                        precision=hp) + srel
    causal = jnp.triu(jnp.ones((t, t)), 1)
    scores = jnp.where(causal == 1, -1e9, scores)
    probs = jax.nn.softmax(scores, axis=-1)
    ctx = jnp.einsum("bhtl,bhls->bhts", probs, v, precision=hp)
    ctx = ctx.transpose(0, 2, 1, 3).reshape(b, t, e)
    out = jnp.einsum("bte,oe->bto", ctx, params["wo"], precision=hp) + params["bo"]
    return out + x


if __name__ == "__main__":
    key = jax.random.PRNGKey(0)
    B, T, E, H = 2, 128, 128, 4     # T, E multiples of 128 -> lane-dense tiles
    S = E // H

    ks = jax.random.split(key, 9)
    x = jax.random.normal(ks[0], (B, T, E), jnp.float32)
    params = {
        "ln_gamma": 1.0 + 0.1 * jax.random.normal(ks[1], (E,), jnp.float32),
        "ln_beta": 0.1 * jax.random.normal(ks[2], (E,), jnp.float32),
        "wq": jax.random.normal(ks[3], (S, S), jnp.float32) * (S ** -0.5),
        "wk": jax.random.normal(ks[4], (S, S), jnp.float32) * (S ** -0.5),
        "wv": jax.random.normal(ks[5], (S, S), jnp.float32) * (S ** -0.5),
        "wo": jax.random.normal(ks[6], (E, E), jnp.float32) * (E ** -0.5),
        "bo": 0.1 * jax.random.normal(ks[7], (E,), jnp.float32),
        "er": 0.5 * jax.random.normal(ks[8], (H, _MAX_LENGTH, S), jnp.float32),
    }

    fn = jax.jit(functools.partial(conformer_mhsa_pallas, heads=H))
    out = jax.block_until_ready(fn(x, params))
    assert out.shape == (B, T, E) and out.dtype == jnp.float32

    ref = conformer_mhsa_reference(x, params, heads=H)
    max_err = float(jnp.max(jnp.abs(out - ref)))
    # Tolerance budget: default-precision MXU on the f32 score path plus
    # explicit bf16 operands on the probability/value/output-projection path,
    # versus a Precision.HIGHEST reference.
    assert jnp.allclose(out, ref, atol=4e-2, rtol=4e-2), f"max abs err {max_err}"
    print("KERNEL_OK")
</pallas_src>

<mosaic_0001>
module attributes {stable_mosaic.version = 11 : i64} {
  func.func @_mhsa_kernel(%arg0: i32, %arg1: memref<1x128x128xf32, #tpu.memory_space<vmem>>, %arg2: memref<1x128xf32, #tpu.memory_space<vmem>>, %arg3: memref<1x128xf32, #tpu.memory_space<vmem>>, %arg4: memref<128x384xf32, #tpu.memory_space<vmem>>, %arg5: memref<128x128xbf16, #tpu.memory_space<vmem>>, %arg6: memref<1x128xf32, #tpu.memory_space<vmem>>, %arg7: memref<4x128x32xf32, #tpu.memory_space<vmem>>, %arg8: memref<1x128x128xf32, #tpu.memory_space<vmem>>, %arg9: memref<128x384xf32, #tpu.memory_space<vmem>>, %arg10: memref<128x128xbf16, #tpu.memory_space<vmem>>) attributes {dimension_semantics = [#tpu.dimension_semantics<parallel>], iteration_bounds = array<i64: 2>, scalar_prefetch = 0 : i64, scratch_operands = 2 : i64, tpu.core_type = #tpu.core_type<tc>, window_params = [{transform_indices = @transform_0, window_bounds = array<i64: 1, 128, 128>}, {pipeline_mode = #tpu.pipeline_mode<synchronous>, transform_indices = @transform_1, window_bounds = array<i64: 1, 128>}, {pipeline_mode = #tpu.pipeline_mode<synchronous>, transform_indices = @transform_2, window_bounds = array<i64: 1, 128>}, {pipeline_mode = #tpu.pipeline_mode<synchronous>, transform_indices = @transform_3, window_bounds = array<i64: 128, 384>}, {pipeline_mode = #tpu.pipeline_mode<synchronous>, transform_indices = @transform_4, window_bounds = array<i64: 128, 128>}, {pipeline_mode = #tpu.pipeline_mode<synchronous>, transform_indices = @transform_5, window_bounds = array<i64: 1, 128>}, {pipeline_mode = #tpu.pipeline_mode<synchronous>, transform_indices = @transform_6, window_bounds = array<i64: 4, 128, 32>}, {transform_indices = @transform_7, window_bounds = array<i64: 1, 128, 128>}]} {
    %c0 = arith.constant 0 : index
    %c0_0 = arith.constant 0 : index
    %c0_1 = arith.constant 0 : index
    %0 = vector.load %arg1[%c0, %c0_0, %c0_1] : memref<1x128x128xf32, #tpu.memory_space<vmem>>, vector<1x128x128xf32>
    %1 = vector.shape_cast %0 : vector<1x128x128xf32> to vector<128x128xf32>
    %cst = arith.constant dense<0.000000e+00> : vector<128xf32>
    %2 = vector.multi_reduction <add>, %1, %cst [1] : vector<128x128xf32> to vector<128xf32>
    %3 = vector.shape_cast %2 : vector<128xf32> to vector<128x1xf32>
    %cst_2 = arith.constant 1.280000e+02 : f32
    %4 = vector.broadcast %cst_2 : f32 to vector<128x1xf32>
    %5 = arith.divf %3, %4 : vector<128x1xf32>
    %6 = vector.broadcast %5 : vector<128x1xf32> to vector<128x128xf32>
    %7 = arith.subf %1, %6 : vector<128x128xf32>
    %8 = arith.mulf %7, %7 : vector<128x128xf32>
    %cst_3 = arith.constant dense<0.000000e+00> : vector<128xf32>
    %9 = vector.multi_reduction <add>, %8, %cst_3 [1] : vector<128x128xf32> to vector<128xf32>
    %10 = vector.shape_cast %9 : vector<128xf32> to vector<128x1xf32>
    %cst_4 = arith.constant 1.280000e+02 : f32
    %11 = vector.broadcast %cst_4 : f32 to vector<128x1xf32>
    %12 = arith.divf %10, %11 : vector<128x1xf32>
    %cst_5 = arith.constant 9.99999974E-6 : f32
    %13 = vector.broadcast %cst_5 : f32 to vector<128x1xf32>
    %14 = arith.addf %12, %13 : vector<128x1xf32>
    %15 = math.rsqrt %14 : vector<128x1xf32>
    %16 = vector.broadcast %15 : vector<128x1xf32> to vector<128x128xf32>
    %17 = arith.mulf %7, %16 : vector<128x128xf32>
    %c0_6 = arith.constant 0 : index
    %c0_7 = arith.constant 0 : index
    %18 = vector.load %arg2[%c0_6, %c0_7] : memref<1x128xf32, #tpu.memory_space<vmem>>, vector<1x128xf32>
    %19 = vector.broadcast %18 : vector<1x128xf32> to vector<128x128xf32>
    %20 = arith.mulf %17, %19 : vector<128x128xf32>
    %c0_8 = arith.constant 0 : index
    %c0_9 = arith.constant 0 : index
    %21 = vector.load %arg3[%c0_8, %c0_9] : memref<1x128xf32, #tpu.memory_space<vmem>>, vector<1x128xf32>
    %22 = vector.broadcast %21 : vector<1x128xf32> to vector<128x128xf32>
    %23 = arith.addf %20, %22 : vector<128x128xf32>
    %c0_10 = arith.constant 0 : index
    %c0_11 = arith.constant 0 : index
    %24 = vector.load %arg4[%c0_10, %c0_11] : memref<128x384xf32, #tpu.memory_space<vmem>>, vector<128x384xf32>
    %cst_12 = arith.constant dense<0.000000e+00> : vector<128x384xf32>
    %25 = tpu.matmul %23, %24, %cst_12 {dimension_numbers = #tpu.dot_dimension_numbers<[1], [0], [0], [1], [0, 0, 1, 1], [], []>} : vector<128x128xf32>, vector<128x384xf32>, vector<128x384xf32> -> vector<128x384xf32>
    %c0_13 = arith.constant 0 : index
    %c0_14 = arith.constant 0 : index
    %26 = vector.load %arg9[%c0_13, %c0_14] : memref<128x384xf32, #tpu.memory_space<vmem>>, vector<128x384xf32>
    tpu.vector_store %arg9[%c0_13, %c0_14], %25 {strides = array<i32>} : memref<128x384xf32, #tpu.memory_space<vmem>>, vector<128x384xf32>,
    %27 = tpu.iota {dimensions = array<i32: 0>} : vector<128x128xi32>
    %28 = tpu.iota {dimensions = array<i32: 1>} : vector<128x128xi32>
    %29 = arith.cmpi sgt, %28, %27 : vector<128x128xi32>
    %cst_15 = arith.constant -1.000000e+09 : f32
    %cst_16 = arith.constant 0.000000e+00 : f32
    %30 = vector.broadcast %cst_15 : f32 to vector<128x128xf32>
    %31 = vector.broadcast %cst_16 : f32 to vector<128x128xf32>
    %32 = arith.select %29, %30, %31 : vector<128x128xi1>, vector<128x128xf32>
    %c0_17 = arith.constant 0 : index
    %c0_18 = arith.constant 0 : index
    %33 = vector.load %arg9[%c0_17, %c0_18] : memref<128x384xf32, #tpu.memory_space<vmem>>, vector<128x32xf32>
    %c0_19 = arith.constant 0 : index
    %c128 = arith.constant 128 : index
    %34 = vector.load %arg9[%c0_19, %c128] : memref<128x384xf32, #tpu.memory_space<vmem>>, vector<128x32xf32>
    %c0_20 = arith.constant 0 : index
    %c256 = arith.constant 256 : index
    %35 = vector.load %arg9[%c0_20, %c256] : memref<128x384xf32, #tpu.memory_space<vmem>>, vector<128x32xf32>
    %cst_21 = arith.constant dense<0.000000e+00> : vector<128x128xf32>
    %36 = tpu.matmul %33, %34, %cst_21 {dimension_numbers = #tpu.dot_dimension_numbers<[1], [1], [0], [0], [0, 0, 1, 0], [], []>} : vector<128x32xf32>, vector<128x32xf32>, vector<128x128xf32> -> vector<128x128xf32>
    %c0_22 = arith.constant 0 : index
    %c0_23 = arith.constant 0 : index
    %c0_24 = arith.constant 0 : index
    %37 = vector.load %arg7[%c0_22, %c0_23, %c0_24] : memref<4x128x32xf32, #tpu.memory_space<vmem>>, vector<1x128x32xf32>
    %38 = vector.shape_cast %37 : vector<1x128x32xf32> to vector<128x32xf32>
    %cst_25 = arith.constant dense<0.000000e+00> : vector<128x128xf32>
    %39 = tpu.matmul %33, %38, %cst_25 {dimension_numbers = #tpu.dot_dimension_numbers<[1], [1], [0], [0], [0, 0, 1, 0], [], []>} : vector<128x32xf32>, vector<128x32xf32>, vector<128x128xf32> -> vector<128x128xf32>
    %c1_i32 = arith.constant 1 : i32
    %40 = tpu.dynamic_rotate %39 by %c1_i32 dim 1 {stride = 1 : si32, stride_dimension = 0 : si32} : vector<128x128xf32>, i32 -> vector<128x128xf32>
    %41 = arith.addf %36, %40 : vector<128x128xf32>
    %42 = arith.addf %41, %32 : vector<128x128xf32>
    %cst_26 = arith.constant dense<0xFF800000> : vector<128xf32>
    %43 = vector.multi_reduction <maximumf>, %42, %cst_26 [1] : vector<128x128xf32> to vector<128xf32>
    %44 = vector.shape_cast %43 : vector<128xf32> to vector<128x1xf32>
    %45 = vector.broadcast %44 : vector<128x1xf32> to vector<128x128xf32>
    %46 = arith.subf %42, %45 : vector<128x128xf32>
    %47 = math.exp %46 : vector<128x128xf32>
    %cst_27 = arith.constant dense<0.000000e+00> : vector<128xf32>
    %48 = vector.multi_reduction <add>, %47, %cst_27 [1] : vector<128x128xf32> to vector<128xf32>
    %49 = vector.shape_cast %48 : vector<128xf32> to vector<128x1xf32>
    %50 = tpu.reciprocal %49 {approx = true} : vector<128x1xf32> -> vector<128x1xf32>
    %51 = arith.truncf %47 : vector<128x128xf32> to vector<128x128xbf16>
    %52 = arith.truncf %35 : vector<128x32xf32> to vector<128x32xbf16>
    %cst_28 = arith.constant dense<0.000000e+00> : vector<128x32xf32>
    %53 = tpu.matmul %51, %52, %cst_28 {dimension_numbers = #tpu.dot_dimension_numbers<[1], [0], [0], [1], [0, 0, 1, 1], [], []>} : vector<128x128xbf16>, vector<128x32xbf16>, vector<128x32xf32> -> vector<128x32xf32>
    %54 = vector.broadcast %50 : vector<128x1xf32> to vector<128x32xf32>
    %55 = arith.mulf %53, %54 : vector<128x32xf32>
    %56 = arith.truncf %55 : vector<128x32xf32> to vector<128x32xbf16>
    %c0_29 = arith.constant 0 : index
    %c0_30 = arith.constant 0 : index
    %57 = vector.load %arg10[%c0_29, %c0_30] : memref<128x128xbf16, #tpu.memory_space<vmem>>, vector<128x32xbf16>
    tpu.vector_store %arg10[%c0_29, %c0_30], %56 {strides = array<i32>} : memref<128x128xbf16, #tpu.memory_space<vmem>>, vector<128x32xbf16>,
    %c0_31 = arith.constant 0 : index
    %c32 = arith.constant 32 : index
    %58 = vector.load %arg9[%c0_31, %c32] : memref<128x384xf32, #tpu.memory_space<vmem>>, vector<128x32xf32>
    %c0_32 = arith.constant 0 : index
    %c160 = arith.constant 160 : index
    %59 = vector.load %arg9[%c0_32, %c160] : memref<128x384xf32, #tpu.memory_space<vmem>>, vector<128x32xf32>
    %c0_33 = arith.constant 0 : index
    %c288 = arith.constant 288 : index
    %60 = vector.load %arg9[%c0_33, %c288] : memref<128x384xf32, #tpu.memory_space<vmem>>, vector<128x32xf32>
    %cst_34 = arith.constant dense<0.000000e+00> : vector<128x128xf32>
    %61 = tpu.matmul %58, %59, %cst_34 {dimension_numbers = #tpu.dot_dimension_numbers<[1], [1], [0], [0], [0, 0, 1, 0], [], []>} : vector<128x32xf32>, vector<128x32xf32>, vector<128x128xf32> -> vector<128x128xf32>
    %c1 = arith.constant 1 : index
    %c0_35 = arith.constant 0 : index
    %c0_36 = arith.constant 0 : index
    %62 = vector.load %arg7[%c1, %c0_35, %c0_36] : memref<4x128x32xf32, #tpu.memory_space<vmem>>, vector<1x128x32xf32>
    %63 = vector.shape_cast %62 : vector<1x128x32xf32> to vector<128x32xf32>
    %cst_37 = arith.constant dense<0.000000e+00> : vector<128x128xf32>
    %64 = tpu.matmul %58, %63, %cst_37 {dimension_numbers = #tpu.dot_dimension_numbers<[1], [1], [0], [0], [0, 0, 1, 0], [], []>} : vector<128x32xf32>, vector<128x32xf32>, vector<128x128xf32> -> vector<128x128xf32>
    %c1_i32_38 = arith.constant 1 : i32
    %65 = tpu.dynamic_rotate %64 by %c1_i32_38 dim 1 {stride = 1 : si32, stride_dimension = 0 : si32} : vector<128x128xf32>, i32 -> vector<128x128xf32>
    %66 = arith.addf %61, %65 : vector<128x128xf32>
    %67 = arith.addf %66, %32 : vector<128x128xf32>
    %cst_39 = arith.constant dense<0xFF800000> : vector<128xf32>
    %68 = vector.multi_reduction <maximumf>, %67, %cst_39 [1] : vector<128x128xf32> to vector<128xf32>
    %69 = vector.shape_cast %68 : vector<128xf32> to vector<128x1xf32>
    %70 = vector.broadcast %69 : vector<128x1xf32> to vector<128x128xf32>
    %71 = arith.subf %67, %70 : vector<128x128xf32>
    %72 = math.exp %71 : vector<128x128xf32>
    %cst_40 = arith.constant dense<0.000000e+00> : vector<128xf32>
    %73 = vector.multi_reduction <add>, %72, %cst_40 [1] : vector<128x128xf32> to vector<128xf32>
    %74 = vector.shape_cast %73 : vector<128xf32> to vector<128x1xf32>
    %75 = tpu.reciprocal %74 {approx = true} : vector<128x1xf32> -> vector<128x1xf32>
    %76 = arith.truncf %72 : vector<128x128xf32> to vector<128x128xbf16>
    %77 = arith.truncf %60 : vector<128x32xf32> to vector<128x32xbf16>
    %cst_41 = arith.constant dense<0.000000e+00> : vector<128x32xf32>
    %78 = tpu.matmul %76, %77, %cst_41 {dimension_numbers = #tpu.dot_dimension_numbers<[1], [0], [0], [1], [0, 0, 1, 1], [], []>} : vector<128x128xbf16>, vector<128x32xbf16>, vector<128x32xf32> -> vector<128x32xf32>
    %79 = vector.broadcast %75 : vector<128x1xf32> to vector<128x32xf32>
    %80 = arith.mulf %78, %79 : vector<128x32xf32>
    %81 = arith.truncf %80 : vector<128x32xf32> to vector<128x32xbf16>
    %c0_42 = arith.constant 0 : index
    %c32_43 = arith.constant 32 : index
    %82 = vector.load %arg10[%c0_42, %c32_43] : memref<128x128xbf16, #tpu.memory_space<vmem>>, vector<128x32xbf16>
    tpu.vector_store %arg10[%c0_42, %c32_43], %81 {strides = array<i32>} : memref<128x128xbf16, #tpu.memory_space<vmem>>, vector<128x32xbf16>,
    %c0_44 = arith.constant 0 : index
    %c64 = arith.constant 64 : index
    %83 = vector.load %arg9[%c0_44, %c64] : memref<128x384xf32, #tpu.memory_space<vmem>>, vector<128x32xf32>
    %c0_45 = arith.constant 0 : index
    %c192 = arith.constant 192 : index
    %84 = vector.load %arg9[%c0_45, %c192] : memref<128x384xf32, #tpu.memory_space<vmem>>, vector<128x32xf32>
    %c0_46 = arith.constant 0 : index
    %c320 = arith.constant 320 : index
    %85 = vector.load %arg9[%c0_46, %c320] : memref<128x384xf32, #tpu.memory_space<vmem>>, vector<128x32xf32>
    %cst_47 = arith.constant dense<0.000000e+00> : vector<128x128xf32>
    %86 = tpu.matmul %83, %84, %cst_47 {dimension_numbers = #tpu.dot_dimension_numbers<[1], [1], [0], [0], [0, 0, 1, 0], [], []>} : vector<128x32xf32>, vector<128x32xf32>, vector<128x128xf32> -> vector<128x128xf32>
    %c2 = arith.constant 2 : index
    %c0_48 = arith.constant 0 : index
    %c0_49 = arith.constant 0 : index
    %87 = vector.load %arg7[%c2, %c0_48, %c0_49] : memref<4x128x32xf32, #tpu.memory_space<vmem>>, vector<1x128x32xf32>
    %88 = vector.shape_cast %87 : vector<1x128x32xf32> to vector<128x32xf32>
    %cst_50 = arith.constant dense<0.000000e+00> : vector<128x128xf32>
    %89 = tpu.matmul %83, %88, %cst_50 {dimension_numbers = #tpu.dot_dimension_numbers<[1], [1], [0], [0], [0, 0, 1, 0], [], []>} : vector<128x32xf32>, vector<128x32xf32>, vector<128x128xf32> -> vector<128x128xf32>
    %c1_i32_51 = arith.constant 1 : i32
    %90 = tpu.dynamic_rotate %89 by %c1_i32_51 dim 1 {stride = 1 : si32, stride_dimension = 0 : si32} : vector<128x128xf32>, i32 -> vector<128x128xf32>
    %91 = arith.addf %86, %90 : vector<128x128xf32>
    %92 = arith.addf %91, %32 : vector<128x128xf32>
    %cst_52 = arith.constant dense<0xFF800000> : vector<128xf32>
    %93 = vector.multi_reduction <maximumf>, %92, %cst_52 [1] : vector<128x128xf32> to vector<128xf32>
    %94 = vector.shape_cast %93 : vector<128xf32> to vector<128x1xf32>
    %95 = vector.broadcast %94 : vector<128x1xf32> to vector<128x128xf32>
    %96 = arith.subf %92, %95 : vector<128x128xf32>
    %97 = math.exp %96 : vector<128x128xf32>
    %cst_53 = arith.constant dense<0.000000e+00> : vector<128xf32>
    %98 = vector.multi_reduction <add>, %97, %cst_53 [1] : vector<128x128xf32> to vector<128xf32>
    %99 = vector.shape_cast %98 : vector<128xf32> to vector<128x1xf32>
    %100 = tpu.reciprocal %99 {approx = true} : vector<128x1xf32> -> vector<128x1xf32>
    %101 = arith.truncf %97 : vector<128x128xf32> to vector<128x128xbf16>
    %102 = arith.truncf %85 : vector<128x32xf32> to vector<128x32xbf16>
    %cst_54 = arith.constant dense<0.000000e+00> : vector<128x32xf32>
    %103 = tpu.matmul %101, %102, %cst_54 {dimension_numbers = #tpu.dot_dimension_numbers<[1], [0], [0], [1], [0, 0, 1, 1], [], []>} : vector<128x128xbf16>, vector<128x32xbf16>, vector<128x32xf32> -> vector<128x32xf32>
    %104 = vector.broadcast %100 : vector<128x1xf32> to vector<128x32xf32>
    %105 = arith.mulf %103, %104 : vector<128x32xf32>
    %106 = arith.truncf %105 : vector<128x32xf32> to vector<128x32xbf16>
    %c0_55 = arith.constant 0 : index
    %c64_56 = arith.constant 64 : index
    %107 = vector.load %arg10[%c0_55, %c64_56] : memref<128x128xbf16, #tpu.memory_space<vmem>>, vector<128x32xbf16>
    tpu.vector_store %arg10[%c0_55, %c64_56], %106 {strides = array<i32>} : memref<128x128xbf16, #tpu.memory_space<vmem>>, vector<128x32xbf16>,
    %c0_57 = arith.constant 0 : index
    %c96 = arith.constant 96 : index
    %108 = vector.load %arg9[%c0_57, %c96] : memref<128x384xf32, #tpu.memory_space<vmem>>, vector<128x32xf32>
    %c0_58 = arith.constant 0 : index
    %c224 = arith.constant 224 : index
    %109 = vector.load %arg9[%c0_58, %c224] : memref<128x384xf32, #tpu.memory_space<vmem>>, vector<128x32xf32>
    %c0_59 = arith.constant 0 : index
    %c352 = arith.constant 352 : index
    %110 = vector.load %arg9[%c0_59, %c352] : memref<128x384xf32, #tpu.memory_space<vmem>>, vector<128x32xf32>
    %cst_60 = arith.constant dense<0.000000e+00> : vector<128x128xf32>
    %111 = tpu.matmul %108, %109, %cst_60 {dimension_numbers = #tpu.dot_dimension_numbers<[1], [1], [0], [0], [0, 0, 1, 0], [], []>} : vector<128x32xf32>, vector<128x32xf32>, vector<128x128xf32> -> vector<128x128xf32>
    %c3 = arith.constant 3 : index
    %c0_61 = arith.constant 0 : index
    %c0_62 = arith.constant 0 : index
    %112 = vector.load %arg7[%c3, %c0_61, %c0_62] : memref<4x128x32xf32, #tpu.memory_space<vmem>>, vector<1x128x32xf32>
    %113 = vector.shape_cast %112 : vector<1x128x32xf32> to vector<128x32xf32>
    %cst_63 = arith.constant dense<0.000000e+00> : vector<128x128xf32>
    %114 = tpu.matmul %108, %113, %cst_63 {dimension_numbers = #tpu.dot_dimension_numbers<[1], [1], [0], [0], [0, 0, 1, 0], [], []>} : vector<128x32xf32>, vector<128x32xf32>, vector<128x128xf32> -> vector<128x128xf32>
    %c1_i32_64 = arith.constant 1 : i32
    %115 = tpu.dynamic_rotate %114 by %c1_i32_64 dim 1 {stride = 1 : si32, stride_dimension = 0 : si32} : vector<128x128xf32>, i32 -> vector<128x128xf32>
    %116 = arith.addf %111, %115 : vector<128x128xf32>
    %117 = arith.addf %116, %32 : vector<128x128xf32>
    %cst_65 = arith.constant dense<0xFF800000> : vector<128xf32>
    %118 = vector.multi_reduction <maximumf>, %117, %cst_65 [1] : vector<128x128xf32> to vector<128xf32>
    %119 = vector.shape_cast %118 : vector<128xf32> to vector<128x1xf32>
    %120 = vector.broadcast %119 : vector<128x1xf32> to vector<128x128xf32>
    %121 = arith.subf %117, %120 : vector<128x128xf32>
    %122 = math.exp %121 : vector<128x128xf32>
    %cst_66 = arith.constant dense<0.000000e+00> : vector<128xf32>
    %123 = vector.multi_reduction <add>, %122, %cst_66 [1] : vector<128x128xf32> to vector<128xf32>
    %124 = vector.shape_cast %123 : vector<128xf32> to vector<128x1xf32>
    %125 = tpu.reciprocal %124 {approx = true} : vector<128x1xf32> -> vector<128x1xf32>
    %126 = arith.truncf %122 : vector<128x128xf32> to vector<128x128xbf16>
    %127 = arith.truncf %110 : vector<128x32xf32> to vector<128x32xbf16>
    %cst_67 = arith.constant dense<0.000000e+00> : vector<128x32xf32>
    %128 = tpu.matmul %126, %127, %cst_67 {dimension_numbers = #tpu.dot_dimension_numbers<[1], [0], [0], [1], [0, 0, 1, 1], [], []>} : vector<128x128xbf16>, vector<128x32xbf16>, vector<128x32xf32> -> vector<128x32xf32>
    %129 = vector.broadcast %125 : vector<128x1xf32> to vector<128x32xf32>
    %130 = arith.mulf %128, %129 : vector<128x32xf32>
    %131 = arith.truncf %130 : vector<128x32xf32> to vector<128x32xbf16>
    %c0_68 = arith.constant 0 : index
    %c96_69 = arith.constant 96 : index
    %132 = vector.load %arg10[%c0_68, %c96_69] : memref<128x128xbf16, #tpu.memory_space<vmem>>, vector<128x32xbf16>
    tpu.vector_store %arg10[%c0_68, %c96_69], %131 {strides = array<i32>} : memref<128x128xbf16, #tpu.memory_space<vmem>>, vector<128x32xbf16>,
    %c0_70 = arith.constant 0 : index
    %c0_71 = arith.constant 0 : index
    %133 = vector.load %arg10[%c0_70, %c0_71] : memref<128x128xbf16, #tpu.memory_space<vmem>>, vector<128x128xbf16>
    %c0_72 = arith.constant 0 : index
    %c0_73 = arith.constant 0 : index
    %134 = vector.load %arg5[%c0_72, %c0_73] : memref<128x128xbf16, #tpu.memory_space<vmem>>, vector<128x128xbf16>
    %cst_74 = arith.constant dense<0.000000e+00> : vector<128x128xf32>
    %135 = tpu.matmul %133, %134, %cst_74 {dimension_numbers = #tpu.dot_dimension_numbers<[1], [0], [0], [1], [0, 0, 1, 1], [], []>} : vector<128x128xbf16>, vector<128x128xbf16>, vector<128x128xf32> -> vector<128x128xf32>
    %c0_75 = arith.constant 0 : index
    %c0_76 = arith.constant 0 : index
    %136 = vector.load %arg6[%c0_75, %c0_76] : memref<1x128xf32, #tpu.memory_space<vmem>>, vector<1x128xf32>
    %137 = vector.broadcast %136 : vector<1x128xf32> to vector<128x128xf32>
    %138 = arith.addf %135, %137 : vector<128x128xf32>
    %139 = arith.addf %138, %1 : vector<128x128xf32>
    %c0_77 = arith.constant 0 : index
    %c0_78 = arith.constant 0 : index
    %c0_79 = arith.constant 0 : index
    %140 = vector.load %arg8[%c0_77, %c0_78, %c0_79] : memref<1x128x128xf32, #tpu.memory_space<vmem>>, vector<1x128x128xf32>
    %141 = vector.shape_cast %140 : vector<1x128x128xf32> to vector<128x128xf32>
    %142 = vector.shape_cast %139 : vector<128x128xf32> to vector<1x128x128xf32>
    tpu.vector_store %arg8[%c0_77, %c0_78, %c0_79], %142 {strides = array<i32>} : memref<1x128x128xf32, #tpu.memory_space<vmem>>, vector<1x128x128xf32>,
    return
  }
  func.func @transform_0(%arg0: i32) -> (i32, i32, i32) {
    %c0_i32 = arith.constant 0 : i32
    %c0_i32_0 = arith.constant 0 : i32
    %c0_i32_1 = arith.constant 0 : i32
    return %arg0, %c0_i32, %c0_i32_0 : i32, i32, i32
  }
  func.func @transform_1(%arg0: i32) -> (i32, i32) {
    %c0_i32 = arith.constant 0 : i32
    %c0_i32_0 = arith.constant 0 : i32
    %c0_i32_1 = arith.constant 0 : i32
    return %c0_i32, %c0_i32_0 : i32, i32
  }
  func.func @transform_2(%arg0: i32) -> (i32, i32) {
    %c0_i32 = arith.constant 0 : i32
    %c0_i32_0 = arith.constant 0 : i32
    %c0_i32_1 = arith.constant 0 : i32
    return %c0_i32, %c0_i32_0 : i32, i32
  }
  func.func @transform_3(%arg0: i32) -> (i32, i32) {
    %c0_i32 = arith.constant 0 : i32
    %c0_i32_0 = arith.constant 0 : i32
    %c0_i32_1 = arith.constant 0 : i32
    return %c0_i32, %c0_i32_0 : i32, i32
  }
  func.func @transform_4(%arg0: i32) -> (i32, i32) {
    %c0_i32 = arith.constant 0 : i32
    %c0_i32_0 = arith.constant 0 : i32
    %c0_i32_1 = arith.constant 0 : i32
    return %c0_i32, %c0_i32_0 : i32, i32
  }
  func.func @transform_5(%arg0: i32) -> (i32, i32) {
    %c0_i32 = arith.constant 0 : i32
    %c0_i32_0 = arith.constant 0 : i32
    %c0_i32_1 = arith.constant 0 : i32
    return %c0_i32, %c0_i32_0 : i32, i32
  }
  func.func @transform_6(%arg0: i32) -> (i32, i32, i32) {
    %c0_i32 = arith.constant 0 : i32
    %c0_i32_0 = arith.constant 0 : i32
    %c0_i32_1 = arith.constant 0 : i32
    %c0_i32_2 = arith.constant 0 : i32
    return %c0_i32, %c0_i32_0, %c0_i32_1 : i32, i32, i32
  }
  func.func @transform_7(%arg0: i32) -> (i32, i32, i32) {
    %c0_i32 = arith.constant 0 : i32
    %c0_i32_0 = arith.constant 0 : i32
    %c0_i32_1 = arith.constant 0 : i32
    return %arg0, %c0_i32, %c0_i32_0 : i32, i32, i32
  }
}

</mosaic_0001>

<bundles_post_ra>
// kernel: conformer_mhsa_pallas.1
= control target key start
LH: loop header
LB: loop body
LE: loop exit
PB: predicated region body
PF: predicated region fallthrough
CT: control target
= control target key end

     0   :  { %s10234_s0 = inlined_call_operand.vmem [shape: f32[2,128,128], index: 0, kind: input, shape index: {}]   ;;  %s10235_s1 = inlined_call_operand.vmem [shape: f32[1,128], index: 1, kind: input, shape index: {}]   ;;  %s10236_s2 = inlined_call_operand.vmem [shape: f32[1,128], index: 2, kind: input, shape index: {}]   ;;  %s10237_s3 = inlined_call_operand.vmem [shape: f32[128,384], index: 3, kind: input, shape index: {}]   ;;  %s10238_s4 = inlined_call_operand.vmem [shape: bf16[128,128], index: 4, kind: input, shape index: {}]   ;;  %s10239_s5 = inlined_call_operand.vmem [shape: f32[1,128], index: 5, kind: input, shape index: {}]   ;;  %s10240_s6 = inlined_call_operand.vmem [shape: f32[4,128,32], index: 6, kind: input, shape index: {}]   ;;  %s10241_s7 = inlined_call_operand.hbm [shape: f32[2,128,128], index: 7, kind: output, shape index: {}]  }
   0x1   :  { %10395 = sst [smem:[#allocation96_spill]] %s10234_s0 }
   0x2   :  { %10396 = sst [smem:[#allocation97_spill]] %s10235_s1 }
   0x3   :  { %10397 = sst [smem:[#allocation98_spill]] %s10236_s2 }
   0x4   :  { %10398 = sst [smem:[#allocation99_spill]] %s10237_s3 }
   0x5   :  { %10399 = sst [smem:[#allocation100_spill]] %s10240_s6 }
   0x6   :  { %12 = vsyncpa [#allocation5], 0 }
   0x7   :  { %14 = vsyncpa [#allocation5 + $0x1], 0  ;;  %s7494_s24 = smov 0   ;;  %s7496_s25 = smov 0  }
   0x8   :  { %s7498_s26 = smov 0   ;;  %s7500_s27 = smov 0  }
   0x9 LB: > { %s7515_s28 = sadd.s32 4294967295, %s7429_s27   ;;  %s5049_s29 = sadd.s32 4294967294, %s7429_s27   ;;  %s7429_s27 = sphi %s7500_s27, %s10691_s27   ;;  %s7425_s26 = sphi %s7498_s26, %s10690_s26   ;;  %s7421_s25 = sphi %s7496_s25, %s10689_s25   ;;  %s7417_s24 = sphi %s7494_s24, %s10688_s24  }
   0xa   : > { %s7519_s30 = sadd.s32 1, %s7429_s27   ;;  %s179_s8 = sadd.s32 1, %s7425_s26 }
   0xb   : > { %s176_s9 = ssub.s32 %s7429_s27, %s7519_s30  ;;  %p189_p0 = scmp.ne.s32.totalorder %s7425_s26, %s7421_s25 }
   0xc   : > { %p177_p1 = scmp.eq.s32.totalorder %s176_s9, 0  ;;  %p190_p2 = scmp.eq.s32.totalorder %s7515_s28, 1 }
   0xd   : > { %p195_p3 = scmp.ne.s32.totalorder %s7421_s25, %s7417_s24  ;;  %p196_p4 = scmp.eq.s32.totalorder %s5049_s29, 1 }
   0xe   : > { %s7530_s10 = scalar_select %p177_p1, %s7425_s26, %s179_s8  }
   0xf   : > { %p7532_p5 = por %p190_p2, %p189_p0  ;;  %p7536_p6 = por %p196_p4, %p195_p3 }
  0x10   : > { %p5052_p7 = scmp.ge.s32.totalorder %s7429_s27, 1  ;;  %p240_p8 = scmp.lt.s32.totalorder %s7429_s27, 3 }
  0x12   : > { %p241_p9 = pnand %p5052_p7, %p240_p8 }
  0x14   : > { %244 = sbr.rel (%p241_p9) target bundleno = 3193 (0xc79), region = 48 }
  0x1b   : > { %p272_p10 = scmp.lt.s32.totalorder %s7515_s28, 1  ;;  %s10402_s0 = sld [smem:[#allocation96_spill]]  ;;  %vm1034_vm0 = vcmask 261120  }
  0x1c   : > { %s10403_s3 = sld [smem:[#allocation99_spill]]  ;;  %s10404_s6 = sld [smem:[#allocation100_spill]]  ;;  %vm7848_vm1 = vmpackc.low %vm1034_vm0, %vm1034_vm0 }
  0x1d   : > { %s273_s13 = scalar_select %p272_p10, %s7515_s28, 1 }
  0x1e   : > { %s10407_s1 = sld [smem:[#allocation97_spill]]  ;;  %s10408_s2 = sld [smem:[#allocation98_spill]] }
  0x1f   : > { %s5376_s14 = sshll.u32 %s273_s13, 7  ;;  %s10327_s20 = smov 96  }
  0x20   : > { %s10325_s15 = smov 265   ;;  %s10323_s16 = smov 257  }
  0x21   : > { %s7547_s17 = scalar_lea.vmem %s10402_s0, %s5376_s14  ;;  %s10321_s18 = smov 281  }
  0x22   : > { %v7550_v0 = vld [vmem:[%s7547_s17] sm:$0xff]  ;;  %v7553_v1 = vld [vmem:[%s7547_s17 + $0x10] sm:$0xff]  ;;  %v7558_v2 = vld [vmem:[%s7547_s17 + $0x8] sm:$0xff]  ;;  %s10319_s19 = smov 273   ;;  %s10311_s21 = smov 289  }
  0x23   : > { %294 = vadd.xlane.f32.xlu0 %v7550_v0  ;;  %298 = vadd.xlane.f32.xlu1 %v7553_v1  ;;  %v7561_v3 = vld [vmem:[%s7547_s17 + $0x18] sm:$0xff]  ;;  %v7566_v4 = vld [vmem:[%s7547_s17 + $0x20] sm:$0xff]  ;;  %v7569_v5 = vld [vmem:[%s7547_s17 + $0x28] sm:$0xff]  ;;  %s10315_s22 = smov 297   ;;  %s10317_s23 = smov 305  }
  0x24   : > { %v7574_v6 = vld [vmem:[%s7547_s17 + $0x30] sm:$0xff]  ;;  %v7577_v7 = vld [vmem:[%s7547_s17 + $0x38] sm:$0xff]  ;;  %v7582_v8 = vld [vmem:[%s7547_s17 + $0x40] sm:$0xff]  ;;  %s10313_s29 = smov 313   ;;  %s10248_s8 = smov 329  }
  0x25   : > { %v7585_v9 = vld [vmem:[%s7547_s17 + $0x48] sm:$0xff]  ;;  %v7590_v10 = vld [vmem:[%s7547_s17 + $0x50] sm:$0xff]  ;;  %v7593_v11 = vld [vmem:[%s7547_s17 + $0x58] sm:$0xff]  ;;  %s10242_s9 = smov 321   ;;  %s10244_s13 = smov 345  }
  0x26   : > { %v7598_v12 = vld [vmem:[%s7547_s17 + $0x60] sm:$0xff]  ;;  %v7601_v13 = vld [vmem:[%s7547_s17 + $0x68] sm:$0xff]  ;;  %v7606_v14 = vld [vmem:[%s7547_s17 + $0x70] sm:$0xff]  ;;  %s10246_s14 = smov 337   ;;  %s10543_s0 = smov 281  }
  0x27   : > { %296 = vadd.xlane.f32.xlu0 %v7558_v2  ;;  %300 = vadd.xlane.f32.xlu1 %v7561_v3  ;;  %v7609_v15 = vld [vmem:[%s7547_s17 + $0x78] sm:$0xff]  ;;  %v518_v16 = vld [vmem:[%s10403_s3 + $0x8] sm:$0xff]  ;;  %v521_v17 = vld [vmem:[%s10403_s3 + $0x20] sm:$0xff] }
  0x28   : > { %v517_v18 = vld [vmem:[%s10403_s3] sm:$0xff]  ;;  %v6410_v19 = vpack.c.bf16 %v521_v17, %v518_v16  ;;  %v520_v20 = vld [vmem:[%s10403_s3 + $0x18] sm:$0xff]  ;;  %v527_v22 = vld [vmem:[%s10403_s3 + $0x50] sm:$0xff] }
  0x29   : > { %v524_v21 = vld [vmem:[%s10403_s3 + $0x38] sm:$0xff]  ;;  %v6412_v23 = vpack.c.bf16 %v520_v20, %v517_v18  ;;  %v519_v25 = vld [vmem:[%s10403_s3 + $0x10] sm:$0xff]  ;;  %v522_v26 = vld [vmem:[%s10403_s3 + $0x28] sm:$0xff] }
  0x2a   : > { %v6414_v24 = vpack.c.bf16 %v527_v22, %v524_v21  ;;  %v523_v27 = vld [vmem:[%s10403_s3 + $0x30] sm:$0xff]  ;;  %6411 = vmatprep.subr.bf16.mxu0 %v6410_v19  ;;  %v6442_v28 = vpack.c.bf16 %v522_v26, %v519_v25  ;;  %v526_v29 = vld [vmem:[%s10403_s3 + $0x48] sm:$0xff]  ;;  %v533_v31 = vld [vmem:[%s10403_s3 + $0x80] sm:$0xff] }
  0x2b   : > { %302 = vadd.xlane.f32.xlu0 %v7566_v4  ;;  %304 = vadd.xlane.f32.xlu1 %v7569_v5  ;;  %v530_v30 = vld [vmem:[%s10403_s3 + $0x68] sm:$0xff]  ;;  %v6416_v32 = vpack.c.bf16 %v526_v29, %v523_v27  ;;  %v525_v33 = vld [vmem:[%s10403_s3 + $0x40] sm:$0xff]  ;;  %v528_v34 = vld [vmem:[%s10403_s3 + $0x58] sm:$0xff] }
  0x2c   : > { %6413 = vmatpush1.bf16.msra.mxu0 %v6412_v23  ;;  %6443 = vmatprep.subr.bf16.mxu1 %v6442_v28  ;;  %v6418_v35 = vpack.c.bf16 %v533_v31, %v530_v30  ;;  %v6446_v36 = vpack.c.bf16 %v528_v34, %v525_v33  ;;  %v529_v37 = vld [vmem:[%s10403_s3 + $0x60] sm:$0xff]  ;;  %v532_v38 = vld [vmem:[%s10403_s3 + $0x78] sm:$0xff]  ;;  %v539_v23 = vld [vmem:[%s10403_s3 + $0xb0] sm:$0xff] }
  0x2d   : > { %6415 = vmatprep.subr.bf16.mxu0 %v6414_v24  ;;  %6445 = vmatpush3.bf16.msra.mxu1 %v6442_v28  ;;  %v6420_v39 = vpack.c.bf16 %v532_v38, %v529_v37  ;;  %v531_v24 = vld [vmem:[%s10403_s3 + $0x70] sm:$0xff]  ;;  %v538_v28 = vld [vmem:[%s10403_s3 + $0xa8] sm:$0xff] }
  0x2e   : > { %6447 = vmatprep.subr.bf16.mxu1 %v6446_v36 }
  0x2f   : > { %306 = vadd.xlane.f32.xlu0 %v7574_v6  ;;  %308 = vadd.xlane.f32.xlu1 %v7577_v7 }
  0x30   : > { %6417 = vmatpush1.bf16.msra.mxu0 %v6416_v32 }
  0x31   : > { %6419 = vmatprep.subr.bf16.mxu0 %v6418_v35  ;;  %6449 = vmatpush3.bf16.msra.mxu1 %v6446_v36 }
  0x33   : > { %310 = vadd.xlane.f32.xlu0 %v7582_v8  ;;  %312 = vadd.xlane.f32.xlu1 %v7585_v9 }
  0x34   : > { %6421 = vmatpush1.bf16.msra.mxu0 %v6420_v39  ;;  %v542_v39 = vld [vmem:[%s10403_s3 + $0xc8] sm:$0xff] }
  0x37   : > { %314 = vadd.xlane.f32.xlu0 %v7590_v10  ;;  %316 = vadd.xlane.f32.xlu1 %v7593_v11 }
  0x3b   : > { %318 = vadd.xlane.f32.xlu0 %v7598_v12  ;;  %320 = vadd.xlane.f32.xlu1 %v7601_v13 }
  0x3f   : > { %322 = vadd.xlane.f32.xlu0 %v7606_v14  ;;  %324 = vadd.xlane.f32.xlu1 %v7609_v15 }
  0xb0   : > { %v295_v40 = vpop.xlane.xlu0 %294  ;;  %v299_v41 = vpop.xlane.xlu1 %298 }
  0xb1   : > { %v327_v42 = vmul.f32 0.0078125, %v295_v40  ;;  %v329_v43 = vmul.f32 0.0078125, %v299_v41  ;;  %v545_v40 = vld [vmem:[%s10403_s3 + $0xe0] sm:$0xff] }
  0xb3   : > { %v7662_v44 = vsub.f32 %v7550_v0, %v327_v42  ;;  %v7665_v45 = vsub.f32 %v7553_v1, %v329_v43  ;;  %v540_v43 = vld [vmem:[%s10403_s3 + $0xb8] sm:$0xff] }
  0xb4   : > { %v297_v46 = vpop.xlane.xlu0 %296  ;;  %v301_v47 = vpop.xlane.xlu1 %300 }
  0xb5   : > { %v328_v48 = vmul.f32 0.0078125, %v297_v46  ;;  %v359_v49 = vmul.f32 %v7662_v44, %v7662_v44  ;;  %v330_v50 = vmul.f32 0.0078125, %v301_v47  ;;  %v361_v51 = vmul.f32 %v7665_v45, %v7665_v45  ;;  %v541_v46 = vld [vmem:[%s10403_s3 + $0xc0] sm:$0xff]  ;;  %v544_v47 = vld [vmem:[%s10403_s3 + $0xd8] sm:$0xff] }
  0xb7   : > { %375 = vadd.xlane.f32.xlu0 %v359_v49  ;;  %v7672_v52 = vsub.f32 %v7558_v2, %v328_v48  ;;  %v7675_v53 = vsub.f32 %v7561_v3, %v330_v50  ;;  %v6426_v48 = vpack.c.bf16 %v545_v40, %v542_v39  ;;  %v6428_v50 = vpack.c.bf16 %v544_v47, %v541_v46  ;;  %v561_v39 = vld [vmem:[%s10403_s3 + $0x160] sm:$0xff]  ;;  %v564_v40 = vld [vmem:[%s10403_s3 + $0x178] sm:$0xff] }
  0xb8   : > { %v303_v54 = vpop.xlane.xlu0 %302  ;;  %v305_v55 = vpop.xlane.xlu1 %304 }
  0xb9   : > { %v331_v56 = vmul.f32 0.0078125, %v303_v54  ;;  %v360_v57 = vmul.f32 %v7672_v52, %v7672_v52  ;;  %v332_v58 = vmul.f32 0.0078125, %v305_v55  ;;  %v362_v59 = vmul.f32 %v7675_v53, %v7675_v53 }
  0xbb   : > { %379 = vadd.xlane.f32.xlu0 %v361_v51  ;;  %377 = vadd.xlane.f32.xlu1 %v360_v57  ;;  %v7682_v60 = vsub.f32 %v7566_v4, %v331_v56  ;;  %v7685_v61 = vsub.f32 %v7569_v5, %v332_v58  ;;  %v548_v58 = vld [vmem:[%s10403_s3 + $0xf8] sm:$0xff] }
  0xbc   : > { %v307_v62 = vpop.xlane.xlu0 %306  ;;  %v309_v63 = vpop.xlane.xlu1 %308 }
  0xbd   : > { %v333_v0 = vmul.f32 0.0078125, %v307_v62  ;;  %v363_v1 = vmul.f32 %v7682_v60, %v7682_v60  ;;  %v334_v2 = vmul.f32 0.0078125, %v309_v63  ;;  %v364_v3 = vmul.f32 %v7685_v61, %v7685_v61 }
  0xbf   : > { %381 = vadd.xlane.f32.xlu1 %v362_v59  ;;  %383 = vadd.xlane.f32.xlu0 %v363_v1  ;;  %v7692_v16 = vsub.f32 %v7574_v6, %v333_v0  ;;  %v7695_v4 = vsub.f32 %v7577_v7, %v334_v2  ;;  %v536_v7 = vld [vmem:[%s10403_s3 + $0x98] sm:$0xff]  ;;  %v551_v59 = vld [vmem:[%s10403_s3 + $0x110] sm:$0xff]  ;;  %v546_v0 = vld [vmem:[%s10403_s3 + $0xe8] sm:$0xff] }
  0xc0   : > { %v311_v5 = vpop.xlane.xlu0 %310  ;;  %v313_v17 = vpop.xlane.xlu1 %312  ;;  %v6422_v27 = vpack.c.bf16 %v539_v23, %v536_v7  ;;  %v547_v1 = vld [vmem:[%s10403_s3 + $0xf0] sm:$0xff]  ;;  %v550_v2 = vld [vmem:[%s10403_s3 + $0x108] sm:$0xff]  ;;  %v557_v7 = vld [vmem:[%s10403_s3 + $0x140] sm:$0xff] }
  0xc1   : > { %v335_v18 = vmul.f32 0.0078125, %v311_v5  ;;  %v365_v19 = vmul.f32 %v7692_v16, %v7692_v16  ;;  %v336_v20 = vmul.f32 0.0078125, %v313_v17  ;;  %v366_v21 = vmul.f32 %v7695_v4, %v7695_v4  ;;  %v549_v23 = vld [vmem:[%s10403_s3 + $0x100] sm:$0xff] }
  0xc2   : > { %6423 = vmatprep.subr.bf16.mxu0 %v6422_v27  ;;  %v6432_v17 = vpack.c.bf16 %v550_v2, %v547_v1 }
  0xc3   : > { %385 = vadd.xlane.f32.xlu1 %v364_v3  ;;  %387 = vadd.xlane.f32.xlu0 %v365_v19  ;;  %v7702_v22 = vsub.f32 %v7582_v8, %v335_v18  ;;  %v7705_v6 = vsub.f32 %v7585_v9, %v336_v20  ;;  %v534_v8 = vld [vmem:[%s10403_s3 + $0x88] sm:$0xff]  ;;  %v535_v9 = vld [vmem:[%s10403_s3 + $0x90] sm:$0xff]  ;;  %v6430_v3 = vpack.c.bf16 %v551_v59, %v548_v58 }
  0xc4   : > { %v315_v25 = vpop.xlane.xlu0 %314  ;;  %v317_v26 = vpop.xlane.xlu1 %316  ;;  %v6450_v32 = vpack.c.bf16 %v534_v8, %v531_v24  ;;  %v6424_v33 = vpack.c.bf16 %v538_v28, %v535_v9  ;;  %v552_v24 = vld [vmem:[%s10403_s3 + $0x118] sm:$0xff] }
  0xc5   : > { %v337_v29 = vmul.f32 0.0078125, %v315_v25  ;;  %v367_v30 = vmul.f32 %v7702_v22, %v7702_v22  ;;  %v338_v31 = vmul.f32 0.0078125, %v317_v26  ;;  %v368_v34 = vmul.f32 %v7705_v6, %v7705_v6  ;;  %v553_v25 = vld [vmem:[%s10403_s3 + $0x120] sm:$0xff]  ;;  %v556_v26 = vld [vmem:[%s10403_s3 + $0x138] sm:$0xff] }
  0xc6   : > { %6451 = vmatprep.subr.bf16.mxu1 %v6450_v32  ;;  %6425 = vmatpush1.bf16.msra.mxu0 %v6424_v33  ;;  %v6462_v27 = vpack.c.bf16 %v552_v24, %v549_v23  ;;  %v6436_v8 = vpack.c.bf16 %v556_v26, %v553_v25  ;;  %v560_v28 = vld [vmem:[%s10403_s3 + $0x158] sm:$0xff]  ;;  %v559_v33 = vld [vmem:[%s10403_s3 + $0x150] sm:$0xff]  ;;  %v7858_v23 = vld [vmem:[%s10407_s1] ss:$0 sm:$0xff]  ;;  %s10567_s1 = smov 361  }
  0xc7   : > { %389 = vadd.xlane.f32.xlu1 %v366_v21  ;;  %391 = vadd.xlane.f32.xlu0 %v367_v30  ;;  %v7730_v35 = vsub.f32 %v7590_v10, %v337_v29  ;;  %v7733_v36 = vsub.f32 %v7593_v11, %v338_v31  ;;  %v537_v10 = vld [vmem:[%s10403_s3 + $0xa0] sm:$0xff]  ;;  %v554_v21 = vld [vmem:[%s10403_s3 + $0x128] sm:$0xff]  ;;  %v563_v29 = vld [vmem:[%s10403_s3 + $0x170] sm:$0xff] }
  0xc8   : > { %v319_v37 = vpop.xlane.xlu0 %318  ;;  %v321_v38 = vpop.xlane.xlu1 %320  ;;  %6453 = vmatpush3.bf16.msra.mxu1 %v6450_v32  ;;  %v6454_v49 = vpack.c.bf16 %v540_v43, %v537_v10  ;;  %6427 = vmatprep.subr.bf16.mxu0 %v6426_v48  ;;  %v555_v30 = vld [vmem:[%s10403_s3 + $0x130] sm:$0xff]  ;;  %v6438_v31 = vpack.c.bf16 %v563_v29, %v560_v28  ;;  %v558_v32 = vld [vmem:[%s10403_s3 + $0x148] sm:$0xff]  ;;  %v6470_v10 = vpack.c.bf16 %v564_v40, %v561_v39 }
  0xc9   : > { %v339_v41 = vmul.f32 0.0078125, %v319_v37  ;;  %v369_v11 = vmul.f32 %v7730_v35, %v7730_v35  ;;  %v340_v42 = vmul.f32 0.0078125, %v321_v38  ;;  %v370_v51 = vmul.f32 %v7733_v36, %v7733_v36 }
  0xca   : > { %6455 = vmatprep.subr.bf16.mxu1 %v6454_v49  ;;  %6429 = vmatpush1.bf16.msra.mxu0 %v6428_v50  ;;  %v6466_v37 = vpack.c.bf16 %v558_v32, %v555_v30 }
  0xcb   : > { %393 = vadd.xlane.f32.xlu1 %v368_v34  ;;  %395 = vadd.xlane.f32.xlu0 %v369_v11  ;;  %v7758_v54 = vsub.f32 %v7598_v12, %v339_v41  ;;  %v7761_v55 = vsub.f32 %v7601_v13, %v340_v42  ;;  %v543_v12 = vld [vmem:[%s10403_s3 + $0xd0] sm:$0xff]  ;;  %v562_v34 = vld [vmem:[%s10403_s3 + $0x168] sm:$0xff]  ;;  %v10250_v41 = vmov 0.0   ;;  %v1018_v11 = vld [vmem:[%s10404_s6] sm:$0xff]  ;;  %s10547_s3 = smov 289  }
  0xcc   : > { %v323_v56 = vpop.xlane.xlu0 %322  ;;  %v325_v57 = vpop.xlane.xlu1 %324  ;;  %6457 = vmatpush3.bf16.msra.mxu1 %v6454_v49  ;;  %v6458_v5 = vpack.c.bf16 %v546_v0, %v543_v12  ;;  %6431 = vmatprep.subr.bf16.mxu0 %v6430_v3  ;;  %v6440_v38 = vpack.c.bf16 %v562_v34, %v559_v33  ;;  %v1019_v42 = vld [vmem:[%s10404_s6 + $0x8] sm:$0xff] }
  0xcd   : > { %v341_v62 = vmul.f32 0.0078125, %v323_v56  ;;  %v371_v13 = vmul.f32 %v7758_v54, %v7758_v54  ;;  %v342_v63 = vmul.f32 0.0078125, %v325_v57  ;;  %v372_v18 = vmul.f32 %v7761_v55, %v7761_v55  ;;  %629 = vmatprep.mubr.f32.mxu0 %v10250_v41 }
  0xce   : > { %6459 = vmatprep.subr.bf16.mxu1 %v6458_v5  ;;  %6433 = vmatpush1.bf16.msra.mxu0 %v6432_v17  ;;  %v7844_v43 = vpack.c.bf16 %v1019_v42, %v1018_v11 }
  0xcf   : > { %397 = vadd.xlane.f32.xlu1 %v370_v51  ;;  %399 = vadd.xlane.f32.xlu0 %v371_v13  ;;  %v7786_v19 = vsub.f32 %v7606_v14, %v341_v62  ;;  %v7789_v20 = vsub.f32 %v7609_v15, %v342_v63  ;;  %v6434_v15 = vpack.c.bf16 %v557_v7, %v554_v21 }
  0xd0   : > { %6461 = vmatpush3.bf16.msra.mxu1 %v6458_v5 }
  0xd1   : > { %v373_v14 = vmul.f32 %v7786_v19, %v7786_v19  ;;  %v374_v9 = vmul.f32 %v7789_v20, %v7789_v20  ;;  %6435 = vmatprep.subr.bf16.mxu0 %v6434_v15  ;;  %6463 = vmatprep.subr.bf16.mxu1 %v6462_v27 }
  0xd2   : > { %6437 = vmatpush1.bf16.msra.mxu0 %v6436_v8  ;;  %v1020_v8 = vld [vmem:[%s10404_s6 + $0x10] sm:$0xff] }
  0xd3   : > { %401 = vadd.xlane.f32.xlu1 %v372_v18  ;;  %403 = vadd.xlane.f32.xlu0 %v373_v14 }
  0xd4   : > { %6465 = vmatpush3.bf16.msra.mxu1 %v6462_v27  ;;  %6439 = vmatprep.subr.bf16.mxu0 %v6438_v31  ;;  %v7864_v27 = vld [vmem:[%s10408_s2] ss:$0 sm:$0xff]  ;;  %s10546_s2 = smov 297  }
  0xd5   : > { %6467 = vmatprep.subr.bf16.mxu1 %v6466_v37 }
  0xd6   : > { %6441 = vmatpush1.bf16.msra.mxu0 %v6440_v38 }
  0xd7   : > { %405 = vadd.xlane.f32.xlu1 %v374_v9  ;;  %6476 = vmatprep.subr.msk.bf16.mxu0 %vm7848_vm1, %v7844_v43  ;;  %v1021_v9 = vld [vmem:[%s10404_s6 + $0x18] sm:$0xff] }
  0xd8   : > { %6469 = vmatpush3.bf16.msra.mxu1 %v6466_v37  ;;  %v6480_v38 = vpack.c.bf16 %v1021_v9, %v1020_v8 }
  0xd9   : > { %6471 = vmatprep.subr.bf16.mxu1 %v6470_v10 }
  0xdc   : > { %6473 = vmatpush3.bf16.msra.mxu1 %v6470_v10 }
 0x144   : > { %v376_v47 = vpop.xlane.xlu0 %375 }
 0x145   : > { %v407_v48 = vmul.f32 0.0078125, %v376_v47 }
 0x147   : > { %v423_v49 = vadd.f32 1e-05, %v407_v48 }
 0x148   : > { %v378_v50 = vpop.xlane.xlu1 %377  ;;  %v380_v51 = vpop.xlane.xlu0 %379 }
 0x149   : > { %7063 = vrsqrt.f32 %v423_v49  ;;  %v408_v56 = vmul.f32 0.0078125, %v378_v50  ;;  %v409_v57 = vmul.f32 0.0078125, %v380_v51 }
 0x14b   : > { %v424_v58 = vadd.f32 1e-05, %v408_v56  ;;  %v425_v59 = vadd.f32 1e-05, %v409_v57 }
 0x14c   : > { %v382_v12 = vpop.xlane.xlu1 %381  ;;  %v384_v62 = vpop.xlane.xlu0 %383 }
 0x14d   : > { %7065 = vrsqrt.f32 %v424_v58  ;;  %v410_v13 = vmul.f32 0.0078125, %v382_v12  ;;  %v411_v63 = vmul.f32 0.0078125, %v384_v62  ;;  %v1022_v12 = vld [vmem:[%s10404_s6 + $0x20] sm:$0xff] }
 0x14e   : > { %7067 = vrsqrt.f32 %v425_v59 }
 0x14f   : > { %v426_v0 = vadd.f32 1e-05, %v410_v13  ;;  %v427_v1 = vadd.f32 1e-05, %v411_v63 }
 0x150   : > { %v386_v2 = vpop.xlane.xlu1 %385  ;;  %v388_v3 = vpop.xlane.xlu0 %387 }
 0x151   : > { %7069 = vrsqrt.f32 %v426_v0  ;;  %v412_v5 = vmul.f32 0.0078125, %v386_v2  ;;  %v413_v17 = vmul.f32 0.0078125, %v388_v3 }
 0x152   : > { %7071 = vrsqrt.f32 %v427_v1 }
 0x153   : > { %v7064_v18 = vpop.eup %7063  ;;  %v428_v21 = vadd.f32 1e-05, %v412_v5  ;;  %v429_v7 = vadd.f32 1e-05, %v413_v17 }
 0x154   : > { %v390_v14 = vpop.xlane.xlu1 %389  ;;  %v392_v15 = vpop.xlane.xlu0 %391  ;;  %v455_v24 = vmul.f32 %v7064_v18, %v7662_v44 }
 0x155   : > { %7073 = vrsqrt.f32 %v428_v21  ;;  %v414_v25 = vmul.f32 0.0078125, %v390_v14  ;;  %v415_v26 = vmul.f32 0.0078125, %v392_v15 }
 0x156   : > { %7075 = vrsqrt.f32 %v429_v7  ;;  %v478_v28 = vmul.f32 %v7858_v23, %v455_v24 }
 0x157   : > { %v7066_v44 = vpop.eup %7065  ;;  %v430_v29 = vadd.f32 1e-05, %v414_v25  ;;  %v431_v30 = vadd.f32 1e-05, %v415_v26 }
 0x158   : > { %v7068_v31 = vpop.eup %7067  ;;  %v394_v32 = vpop.xlane.xlu1 %393  ;;  %v501_v34 = vadd.f32 %v7864_v27, %v478_v28  ;;  %v456_v37 = vmul.f32 %v7066_v44, %v7672_v52 }
 0x159   : > { %v396_v33 = vpop.xlane.xlu0 %395  ;;  %7077 = vrsqrt.f32 %v430_v29  ;;  %v416_v39 = vmul.f32 0.0078125, %v394_v32  ;;  %v457_v10 = vmul.f32 %v7068_v31, %v7665_v45 }
 0x15a   : > { %v417_v40 = vmul.f32 0.0078125, %v396_v33  ;;  %7079 = vrsqrt.f32 %v431_v30  ;;  %630 = vmatmul.mubr.f32.vlgmr.msra.gmra.mrb[0].mxu0 %v501_v34  ;;  %5778 = vmatprep.mubr.f32.mxu1 %v501_v34  ;;  %v479_v11 = vmul.f32 %v7858_v23, %v456_v37  ;;  %v1024_v33 = vld [vmem:[%s10404_s6 + $0x30] sm:$0xff] }
 0x15b   : > { %v7070_v42 = vpop.eup %7069  ;;  %v432_v47 = vadd.f32 1e-05, %v416_v39  ;;  %635 = vmatprep.mubr.f32.mxu0 %v10250_v41  ;;  %v480_v49 = vmul.f32 %v7858_v23, %v457_v10  ;;  %6479 = vmatpush3.bf16.xpose.msk.msra.mxu0 %vm7848_vm1, %v7844_v43  ;;  %v1023_v43 = vld [vmem:[%s10404_s6 + $0x28] sm:$0xff] }
 0x15c   : > { %v433_v48 = vadd.f32 1e-05, %v417_v40  ;;  %v7072_v52 = vpop.eup %7071  ;;  %v398_v50 = vpop.xlane.xlu1 %397  ;;  %v502_v45 = vadd.f32 %v7864_v27, %v479_v11  ;;  %v458_v56 = vmul.f32 %v7070_v42, %v7675_v53  ;;  %6482 = vmatprep.subr.msk.bf16.mxu0 %vm7848_vm1, %v6480_v38  ;;  %v6486_v21 = vpack.c.bf16 %v1023_v43, %v1022_v12 }
 0x15d   : > { %v400_v51 = vpop.xlane.xlu0 %399  ;;  %7081 = vrsqrt.f32 %v432_v47  ;;  %v418_v57 = vmul.f32 0.0078125, %v398_v50  ;;  %v503_v59 = vadd.f32 %v7864_v27, %v480_v49  ;;  %v459_v62 = vmul.f32 %v7072_v52, %v7682_v60 }
 0x15e   : > { %v419_v58 = vmul.f32 0.0078125, %v400_v51  ;;  %7083 = vrsqrt.f32 %v433_v48  ;;  %636 = vmatmul.mubr.f32.gmra.mrb[2].mxu0 %v502_v45  ;;  %5779 = vmatmul.mubr.f32.vlgmr.msra.gmra.mrb[0].mxu1 %v502_v45  ;;  %v481_v53 = vmul.f32 %v7858_v23, %v458_v56  ;;  %v1026_v56 = vld [vmem:[%s10404_s6 + $0x40] sm:$0xff] }
 0x15f   : > { %v7074_v13 = vpop.eup %7073  ;;  %v434_v63 = vadd.f32 1e-05, %v418_v57  ;;  %5781 = vmatprep.mubr.f32.mxu1 %v503_v59  ;;  %641 = vmatprep.mubr.f32.mxu0 %v10250_v41  ;;  %v482_v17 = vmul.f32 %v7858_v23, %v459_v62 }
 0x160   : > { %v435_v0 = vadd.f32 1e-05, %v419_v58  ;;  %v7076_v1 = vpop.eup %7075  ;;  %v402_v2 = vpop.xlane.xlu1 %401  ;;  %v504_v5 = vadd.f32 %v7864_v27, %v481_v53  ;;  %v460_v18 = vmul.f32 %v7074_v13, %v7685_v61 }
 0x161   : > { %v404_v3 = vpop.xlane.xlu0 %403  ;;  %7085 = vrsqrt.f32 %v434_v63  ;;  %v420_v7 = vmul.f32 0.0078125, %v402_v2  ;;  %v461_v60 = vmul.f32 %v7076_v1, %v7692_v16  ;;  %v505_v15 = vadd.f32 %v7864_v27, %v482_v17 }
 0x162   : > { %v421_v14 = vmul.f32 0.0078125, %v404_v3  ;;  %7087 = vrsqrt.f32 %v435_v0  ;;  %642 = vmatmul.mubr.f32.gmra.mrb[4].mxu0 %v503_v59  ;;  %5782 = vmatmul.mubr.f32.gmra.mrb[2].mxu1 %v504_v5  ;;  %v483_v24 = vmul.f32 %v7858_v23, %v460_v18  ;;  %v1028_v3 = vld [vmem:[%s10404_s6 + $0x50] sm:$0xff] }
 0x163   : > { %v7078_v25 = vpop.eup %7077  ;;  %v436_v26 = vadd.f32 1e-05, %v420_v7  ;;  %647 = vmatprep.mubr.f32.mxu0 %v10250_v41  ;;  %v484_v61 = vmul.f32 %v7858_v23, %v461_v60  ;;  %6485 = vmatpush3.bf16.xpose.msk.msra.mxu0 %vm7848_vm1, %v6480_v38  ;;  %v1033_v7 = vld [vmem:[%s10404_s6 + $0x78] sm:$0xff] }
 0x164   : > { %v437_v8 = vadd.f32 1e-05, %v421_v14  ;;  %v7080_v9 = vpop.eup %7079  ;;  %5784 = vmatprep.mubr.f32.mxu1 %v505_v15  ;;  %v406_v16 = vpop.xlane.xlu1 %405  ;;  %v506_v28 = vadd.f32 %v7864_v27, %v483_v24  ;;  %v462_v44 = vmul.f32 %v7078_v25, %v7695_v4  ;;  %6488 = vmatprep.subr.msk.bf16.mxu0 %vm7848_vm1, %v6486_v21  ;;  %v1025_v4 = vld [vmem:[%s10404_s6 + $0x38] sm:$0xff] }
 0x165   : > { %7089 = vrsqrt.f32 %v436_v26  ;;  %v422_v29 = vmul.f32 0.0078125, %v406_v16  ;;  %v507_v30 = vadd.f32 %v7864_v27, %v484_v61  ;;  %v463_v31 = vmul.f32 %v7080_v9, %v7702_v22 }
 0x166   : > { %7091 = vrsqrt.f32 %v437_v8  ;;  %648 = vmatmul.mubr.f32.gmra.mrb[6].mxu0 %v504_v5  ;;  %5785 = vmatmul.mubr.f32.gmra.mrb[4].mxu1 %v506_v28  ;;  %v485_v32 = vmul.f32 %v7858_v23, %v462_v44  ;;  %v6492_v42 = vpack.c.bf16 %v1025_v4, %v1024_v33 }
 0x167   : > { %v7082_v34 = vpop.eup %7081  ;;  %v438_v37 = vadd.f32 1e-05, %v422_v29  ;;  %5787 = vmatprep.mubr.f32.mxu1 %v507_v30  ;;  %653 = vmatprep.mubr.f32.mxu0 %v10250_v41  ;;  %v486_v22 = vmul.f32 %v7858_v23, %v463_v31 }
 0x168   : > { %v7084_v38 = vpop.eup %7083  ;;  %v508_v39 = vadd.f32 %v7864_v27, %v485_v32  ;;  %v464_v40 = vmul.f32 %v7082_v34, %v7705_v6 }
 0x169   : > { %7093 = vrsqrt.f32 %v438_v37  ;;  %v509_v10 = vadd.f32 %v7864_v27, %v486_v22  ;;  %v465_v11 = vmul.f32 %v7084_v38, %v7730_v35 }
 0x16a   : > { %654 = vmatmul.mubr.f32.gmra.mrb[8].mxu0 %v505_v15  ;;  %5788 = vmatmul.mubr.f32.gmra.mrb[6].mxu1 %v508_v39  ;;  %v487_v47 = vmul.f32 %v7858_v23, %v464_v40 }
 0x16b   : > { %v7086_v48 = vpop.eup %7085  ;;  %5790 = vmatprep.mubr.f32.mxu1 %v509_v10  ;;  %659 = vmatprep.mubr.f32.mxu0 %v10250_v41  ;;  %v488_v49 = vmul.f32 %v7858_v23, %v465_v11 }
 0x16c   : > { %v7088_v52 = vpop.eup %7087  ;;  %v510_v50 = vadd.f32 %v7864_v27, %v487_v47  ;;  %v466_v6 = vmul.f32 %v7086_v48, %v7733_v36  ;;  %6491 = vmatpush3.bf16.xpose.msk.msra.mxu0 %vm7848_vm1, %v6486_v21  ;;  %v1027_v36 = vld [vmem:[%s10404_s6 + $0x48] sm:$0xff]  ;;  %v1032_v21 = vld [vmem:[%s10404_s6 + $0x70] sm:$0xff] }
 0x16d   : > { %v511_v35 = vadd.f32 %v7864_v27, %v488_v49  ;;  %v467_v51 = vmul.f32 %v7088_v52, %v7758_v54  ;;  %6494 = vmatprep.subr.msk.bf16.mxu0 %vm7848_vm1, %v6492_v42  ;;  %v6498_v62 = vpack.c.bf16 %v1027_v36, %v1026_v56  ;;  %v6516_v14 = vpack.c.bf16 %v1033_v7, %v1032_v21 }
 0x16e   : > { %660 = vmatmul.mubr.f32.gmra.mrb[10].mxu0 %v506_v28  ;;  %5791 = vmatmul.mubr.f32.gmra.mrb[8].mxu1 %v510_v50  ;;  %v489_v45 = vmul.f32 %v7858_v23, %v466_v6 }
 0x16f   : > { %v7090_v57 = vpop.eup %7089  ;;  %5793 = vmatprep.mubr.f32.mxu1 %v511_v35  ;;  %665 = vmatprep.mubr.f32.mxu0 %v10250_v41  ;;  %v490_v54 = vmul.f32 %v7858_v23, %v467_v51 }
 0x170   : > { %v7092_v58 = vpop.eup %7091  ;;  %v512_v59 = vadd.f32 %v7864_v27, %v489_v45  ;;  %v468_v12 = vmul.f32 %v7090_v57, %v7761_v55 }
 0x171   : > { %v513_v43 = vadd.f32 %v7864_v27, %v490_v54  ;;  %v469_v53 = vmul.f32 %v7092_v58, %v7786_v19 }
 0x172   : > { %666 = vmatmul.mubr.f32.gmra.mrb[12].mxu0 %v507_v30  ;;  %5794 = vmatmul.mubr.f32.gmra.mrb[10].mxu1 %v512_v59  ;;  %v491_v13 = vmul.f32 %v7858_v23, %v468_v12 }
 0x173   : > { %v7094_v63 = vpop.eup %7093  ;;  %5796 = vmatprep.mubr.f32.mxu1 %v513_v43  ;;  %671 = vmatprep.mubr.f32.mxu0 %v10250_v41  ;;  %v492_v0 = vmul.f32 %v7858_v23, %v469_v53 }
 0x174   : > { %v514_v1 = vadd.f32 %v7864_v27, %v491_v13  ;;  %v470_v2 = vmul.f32 %v7094_v63, %v7789_v20  ;;  %6497 = vmatpush3.bf16.xpose.msk.msra.mxu0 %vm7848_vm1, %v6492_v42  ;;  %v1029_v20 = vld [vmem:[%s10404_s6 + $0x58] sm:$0xff] }
 0x175   : > { %v515_v55 = vadd.f32 %v7864_v27, %v492_v0  ;;  %6500 = vmatprep.subr.msk.bf16.mxu0 %vm7848_vm1, %v6498_v62  ;;  %v6504_v17 = vpack.c.bf16 %v1029_v20, %v1028_v3 }
 0x176   : > { %672 = vmatmul.mubr.f32.gmra.mrb[14].mxu0 %v508_v39  ;;  %5797 = vmatmul.mubr.f32.gmra.mrb[12].mxu1 %v514_v1  ;;  %v493_v19 = vmul.f32 %v7858_v23, %v470_v2  ;;  %v1030_v23 = vld [vmem:[%s10404_s6 + $0x60] sm:$0xff] }
 0x177   : > { %5799 = vmatprep.mubr.f32.mxu1 %v515_v55  ;;  %677 = vmatprep.mubr.f32.mxu0 %v10250_v41 }
 0x178   : > { %v516_v5 = vadd.f32 %v7864_v27, %v493_v19  ;;  %v1031_v27 = vld [vmem:[%s10404_s6 + $0x68] sm:$0xff] }
 0x179   : > { %v6510_v18 = vpack.c.bf16 %v1031_v27, %v1030_v23 }
 0x17a   : > { %678 = vmatmul.mubr.f32.gmra.mrb[16].mxu0 %v509_v10  ;;  %5800 = vmatmul.mubr.f32.gmra.mrb[14].mxu1 %v516_v5 }
 0x17b   : > { %683 = vmatprep.mubr.f32.mxu0 %v10250_v41 }
 0x17c   : > { %6503 = vmatpush3.bf16.xpose.msk.msra.mxu0 %vm7848_vm1, %v6498_v62 }
 0x17d   : > { %6506 = vmatprep.subr.msk.bf16.mxu0 %vm7848_vm1, %v6504_v17 }
 0x17e   : > { %684 = vmatmul.mubr.f32.gmra.mrb[18].mxu0 %v510_v50 }
 0x17f   : > { %689 = vmatprep.mubr.f32.mxu0 %v10250_v41 }
 0x182   : > { %690 = vmatmul.mubr.f32.gmra.mrb[20].mxu0 %v511_v35 }
 0x183   : > { %695 = vmatprep.mubr.f32.mxu0 %v10250_v41 }
 0x184   : > { %6509 = vmatpush3.bf16.xpose.msk.msra.mxu0 %vm7848_vm1, %v6504_v17 }
 0x185   : > { %6512 = vmatprep.subr.msk.bf16.mxu0 %vm7848_vm1, %v6510_v18 }
 0x186   : > { %696 = vmatmul.mubr.f32.gmra.mrb[22].mxu0 %v512_v59 }
 0x187   : > { %701 = vmatprep.mubr.f32.mxu0 %v10250_v41 }
 0x18a   : > { %702 = vmatmul.mubr.f32.gmra.mrb[24].mxu0 %v513_v43 }
 0x18b   : > { %707 = vmatprep.mubr.f32.mxu0 %v10250_v41 }
 0x18c   : > { %6515 = vmatpush3.bf16.xpose.msk.msra.mxu0 %vm7848_vm1, %v6510_v18 }
 0x18d   : > { %6518 = vmatprep.subr.msk.bf16.mxu0 %vm7848_vm1, %v6516_v14 }
 0x18e   : > { %708 = vmatmul.mubr.f32.gmra.mrb[26].mxu0 %v514_v1 }
 0x18f   : > { %713 = vmatprep.mubr.f32.mxu0 %v10250_v41 }
 0x192   : > { %714 = vmatmul.mubr.f32.gmra.mrb[28].mxu0 %v515_v55 }
 0x193   : > { %719 = vmatprep.mubr.f32.mxu0 %v10250_v41 }
 0x194   : > { %6521 = vmatpush3.bf16.xpose.msk.msra.mxu0 %vm7848_vm1, %v6516_v14 }
 0x196   : > { %720 = vmatmul.mubr.f32.gmra.mrb[30].mxu0 %v516_v5 }
 0x22d   : > { %v8001_v60 = vpop.f32.mrb[0].mxu0 }
 0x22e   : > { %10409 = vst [vmem:[#allocation7_spill] sm:$0xff] %v8001_v60  ;;  %1903 = vrot.lane.b32.xlu1 %v8001_v60, %s10327_s20  ;;  %v633_v15 = vpop.f32.mrb[1].mxu0  ;;  %5834 = vmatprep.mubr.msk.f32.mxu0 %vm1034_vm0, %v8001_v60 }
 0x22f   : > { %5890 = vmatprep.mubr.msk.f32.mxu1 %vm1034_vm0, %v8001_v60 }
 0x231   : > { %v8009_v24 = vpop.f32.mrb[2].mxu0  ;;  %v5780_v25 = vpop.f32.mrb[0].mxu1 }
 0x232   : > { %10410 = vst [vmem:[#allocation8_spill] sm:$0xff] %v8009_v24  ;;  %v792_v26 = vpop.f32.mrb[1].mxu1  ;;  %1905 = vrot.lane.b32.xlu1 %v8009_v24, %s10327_s20  ;;  %v639_v8 = vpop.f32.mrb[3].mxu0  ;;  %5835 = vmatmul.mubr.msk.f32.vlgmr.msra.gmra.mrb[32].mxu0 %vm1034_vm0, %v8009_v24 }
 0x233   : > { %v8015_v61 = vpack.c.bf16 %v5780_v25, %v792_v26  ;;  %v8017_v9 = vpack.i.bf16 %v639_v8, %v633_v15  ;;  %v6522_v16 = vpack.c.bf16 %v639_v8, %v633_v15 }
 0x235   : > { %10411 = vst [vmem:[#allocation9_spill] sm:$0xff] %v8015_v61  ;;  %10412 = vst [vmem:[#allocation10_spill] sm:$0xff] %v8017_v9  ;;  %5914 = vmatprep.subr.bf16.mxu0 %v8015_v61  ;;  %v8020_v28 = vpop.f32.mrb[4].mxu0  ;;  %v5783_v44 = vpop.f32.mrb[2].mxu1  ;;  %6524 = vmatprep.subr.msk.bf16.mxu1 %vm7848_vm1, %v6522_v16 }
 0x236   : > { %10413 = vst [vmem:[#allocation11_spill] sm:$0xff] %v8020_v28  ;;  %6936 = vrot.lane.b32.xlu0 %v8017_v9, %s10327_s20  ;;  %v645_v29 = vpop.f32.mrb[5].mxu0  ;;  %v802_v30 = vpop.f32.mrb[3].mxu1  ;;  %5837 = vmatprep.mubr.msk.f32.mxu0 %vm1034_vm0, %v8020_v28 }
 0x237   : > { %v8028_v31 = vpack.c.bf16 %v5783_v44, %v802_v30  ;;  %6527 = vmatpush3.bf16.xpose.msk.msra.mxu1 %vm7848_vm1, %v6522_v16  ;;  %5915 = vmatpush3.bf16.msra.mxu0 %v8015_v61  ;;  %v5122_v30 = vld [vmem:[%s10404_s6 + $0x80] sm:$0xff] }
 0x239   : > { %10414 = vst [vmem:[#allocation12_spill] sm:$0xff] %v8028_v31  ;;  %v8033_v32 = vpop.f32.mrb[6].mxu0  ;;  %v5786_v33 = vpop.f32.mrb[4].mxu1  ;;  %5916 = vmatprep.subr.bf16.mxu0 %v8028_v31 }
 0x23a   : > { %10415 = vst [vmem:[#allocation13_spill] sm:$0xff] %v8033_v32  ;;  %1907 = vrot.lane.b32.xlu0 %v8020_v28, %s10327_s20  ;;  %1909 = vrot.lane.b32.xlu1 %v8033_v32, %s10327_s20  ;;  %v651_v4 = vpop.f32.mrb[7].mxu0  ;;  %v812_v34 = vpop.f32.mrb[5].mxu1 }
 0x23b   : > { %v8040_v37 = vpack.i.bf16 %v651_v4, %v645_v29  ;;  %v6528_v22 = vpack.c.bf16 %v651_v4, %v645_v29  ;;  %v8042_v38 = vpack.c.bf16 %v5786_v33, %v812_v34  ;;  %5838 = vmatmul.mubr.msk.f32.gmra.mrb[34].mxu0 %vm1034_vm0, %v8033_v32  ;;  %v5123_v33 = vld [vmem:[%s10404_s6 + $0x88] sm:$0xff] }
 0x23c   : > { %5917 = vmatpush3.bf16.msra.mxu0 %v8028_v31 }
 0x23d   : > { %10416 = vst [vmem:[#allocation14_spill] sm:$0xff] %v8040_v37  ;;  %10417 = vst [vmem:[#allocation15_spill] sm:$0xff] %v8042_v38  ;;  %v8047_v39 = vpop.f32.mrb[8].mxu0  ;;  %v5789_v40 = vpop.f32.mrb[6].mxu1  ;;  %6530 = vmatprep.subr.msk.bf16.mxu1 %vm7848_vm1, %v6528_v22  ;;  %5918 = vmatprep.subr.bf16.mxu0 %v8042_v38 }
 0x23e   : > { %10418 = vst [vmem:[#allocation16_spill] sm:$0xff] %v8047_v39  ;;  %6941 = vrot.lane.b32.xlu1 %v8040_v37, %s10327_s20  ;;  %v657_v10 = vpop.f32.mrb[9].mxu0  ;;  %v822_v11 = vpop.f32.mrb[7].mxu1  ;;  %5840 = vmatprep.mubr.msk.f32.mxu0 %vm1034_vm0, %v8047_v39 }
 0x23f   : > { %v8056_v42 = vpack.c.bf16 %v5789_v40, %v822_v11  ;;  %6533 = vmatpush3.bf16.xpose.msk.msra.mxu1 %vm7848_vm1, %v6528_v22  ;;  %v6570_v40 = vpack.c.bf16 %v5123_v33, %v5122_v30  ;;  %v5125_v11 = vld [vmem:[%s10404_s6 + $0x98] sm:$0xff] }
 0x240   : > { %5919 = vmatpush3.bf16.msra.mxu0 %v8042_v38 }
 0x241   : > { %10419 = vst [vmem:[#allocation17_spill] sm:$0xff] %v8056_v42  ;;  %v8061_v47 = vpop.f32.mrb[10].mxu0  ;;  %v5792_v48 = vpop.f32.mrb[8].mxu1  ;;  %5920 = vmatprep.subr.bf16.mxu0 %v8056_v42 }
 0x242   : > { %10420 = vst [vmem:[#allocation18_spill] sm:$0xff] %v8061_v47  ;;  %1911 = vrot.lane.b32.xlu1 %v8047_v39, %s10327_s20  ;;  %v663_v49 = vpop.f32.mrb[11].mxu0  ;;  %v832_v52 = vpop.f32.mrb[9].mxu1  ;;  %5841 = vmatmul.mubr.msk.f32.gmra.mrb[36].mxu0 %vm1034_vm0, %v8061_v47 }
 0x243   : > { %v8068_v50 = vpack.i.bf16 %v663_v49, %v657_v10  ;;  %v6534_v6 = vpack.c.bf16 %v663_v49, %v657_v10  ;;  %v8070_v35 = vpack.c.bf16 %v5792_v48, %v832_v52  ;;  %v5124_v10 = vld [vmem:[%s10404_s6 + $0x90] sm:$0xff]  ;;  %v5126_v49 = vld [vmem:[%s10404_s6 + $0xa0] sm:$0xff]  ;;  %v5127_v52 = vld [vmem:[%s10404_s6 + $0xa8] sm:$0xff] }
 0x244   : > { %5921 = vmatpush3.bf16.msra.mxu0 %v8056_v42  ;;  %v6576_v48 = vpack.c.bf16 %v5125_v11, %v5124_v10 }
 0x245   : > { %10421 = vst [vmem:[#allocation19_spill] sm:$0xff] %v8068_v50  ;;  %10422 = vst [vmem:[#allocation20_spill] sm:$0xff] %v8070_v35  ;;  %v8073_v51 = vpop.f32.mrb[12].mxu0  ;;  %v5795_v45 = vpop.f32.mrb[10].mxu1  ;;  %6536 = vmatprep.subr.msk.bf16.mxu1 %vm7848_vm1, %v6534_v6  ;;  %5922 = vmatprep.subr.bf16.mxu0 %v8070_v35 }
 0x246   : > { %10423 = vst [vmem:[#allocation21_spill] sm:$0xff] %v8073_v51  ;;  %1913 = vrot.lane.b32.xlu1 %v8061_v47, %s10327_s20  ;;  %v669_v56 = vpop.f32.mrb[13].mxu0  ;;  %v842_v36 = vpop.f32.mrb[11].mxu1  ;;  %5843 = vmatprep.mubr.msk.f32.mxu0 %vm1034_vm0, %v8073_v51 }
 0x247   : > { %v8082_v57 = vpack.c.bf16 %v5795_v45, %v842_v36  ;;  %6539 = vmatpush3.bf16.xpose.msk.msra.mxu1 %vm7848_vm1, %v6534_v6  ;;  %v6582_v6 = vpack.c.bf16 %v5127_v52, %v5126_v49  ;;  %v5128_v45 = vld [vmem:[%s10404_s6 + $0xb0] sm:$0xff] }
 0x248   : > { %5923 = vmatpush3.bf16.msra.mxu0 %v8070_v35 }
 0x249   : > { %10424 = vst [vmem:[#allocation22_spill] sm:$0xff] %v8082_v57  ;;  %v8087_v54 = vpop.f32.mrb[14].mxu0  ;;  %v5798_v58 = vpop.f32.mrb[12].mxu1  ;;  %5924 = vmatprep.subr.bf16.mxu0 %v8082_v57 }
 0x24a   : > { %6946 = vrot.lane.b32.xlu1 %v8068_v50, %s10327_s20  ;;  %v675_v59 = vpop.f32.mrb[15].mxu0  ;;  %v852_v12 = vpop.f32.mrb[13].mxu1  ;;  %5844 = vmatmul.mubr.msk.f32.gmra.mrb[38].mxu0 %vm1034_vm0, %v8087_v54 }
 0x24b   : > { %v8094_v43 = vpack.i.bf16 %v675_v59, %v669_v56  ;;  %v6540_v53 = vpack.c.bf16 %v675_v59, %v669_v56  ;;  %v8096_v62 = vpack.c.bf16 %v5798_v58, %v852_v12  ;;  %v5129_v56 = vld [vmem:[%s10404_s6 + $0xb8] sm:$0xff]  ;;  %v5130_v58 = vld [vmem:[%s10404_s6 + $0xc0] sm:$0xff]  ;;  %v5131_v59 = vld [vmem:[%s10404_s6 + $0xc8] sm:$0xff] }
 0x24c   : > { %5925 = vmatpush3.bf16.msra.mxu0 %v8082_v57  ;;  %v6588_v36 = vpack.c.bf16 %v5129_v56, %v5128_v45  ;;  %v6594_v12 = vpack.c.bf16 %v5131_v59, %v5130_v58  ;;  %v919_v45 = vlaneseq }
 0x24d   : > { %10425 = vst [vmem:[#allocation23_spill] sm:$0xff] %v8094_v43  ;;  %10426 = vst [vmem:[#allocation24_spill] sm:$0xff] %v8096_v62  ;;  %v8099_v13 = vpop.f32.mrb[16].mxu0  ;;  %v5801_v63 = vpop.f32.mrb[14].mxu1  ;;  %6542 = vmatprep.subr.msk.bf16.mxu1 %vm7848_vm1, %v6540_v53  ;;  %5926 = vmatprep.subr.bf16.mxu0 %v8096_v62 }
 0x24e   : > { %6951 = vrot.lane.b32.xlu1 %v8094_v43, %s10327_s20  ;;  %v681_v0 = vpop.f32.mrb[17].mxu0  ;;  %v862_v1 = vpop.f32.mrb[15].mxu1  ;;  %5846 = vmatprep.mubr.msk.f32.mxu0 %vm1034_vm0, %v8099_v13  ;;  %v8319_v58 = vshrl.u32 %v919_v45, 7  ;;  %v8321_v59 = vand.u32 127, %v919_v45 }
 0x24f   : > { %v8108_v2 = vpack.c.bf16 %v5801_v63, %v862_v1  ;;  %6545 = vmatpush3.bf16.xpose.msk.msra.mxu1 %vm7848_vm1, %v6540_v53  ;;  %v5132_v53 = vld [vmem:[%s10404_s6 + $0xd0] sm:$0xff]  ;;  %v5133_v63 = vld [vmem:[%s10404_s6 + $0xd8] sm:$0xff]  ;;  %v5134_v1 = vld [vmem:[%s10404_s6 + $0xe0] sm:$0xff] }
 0x250   : > { %5927 = vmatpush3.bf16.msra.mxu0 %v8096_v62  ;;  %vm938_vm10 = vcmp.gt.s32.totalorder %v8321_v59, %v8319_v58  ;;  %v923_v9 = vadd.s32 24, %v8319_v58  ;;  %v927_v38 = vadd.s32 56, %v8319_v58  ;;  %v926_v61 = vadd.s32 48, %v8319_v58 }
 0x251   : > { %10427 = vst [vmem:[#allocation25_spill] sm:$0xff] %v8108_v2  ;;  %v8113_v55 = vpop.f32.mrb[18].mxu0  ;;  %5928 = vmatprep.subr.bf16.mxu0 %v8108_v2 }
 0x252   : > { %v687_v19 = vpop.f32.mrb[19].mxu0  ;;  %5847 = vmatmul.mubr.msk.f32.gmra.mrb[40].mxu0 %vm1034_vm0, %v8113_v55  ;;  %vm941_vm11 = vcmp.gt.s32.totalorder %v8321_v59, %v923_v9  ;;  %vm945_vm15 = vcmp.gt.s32.totalorder %v8321_v59, %v927_v38 }
 0x253   : > { %v8118_v3 = vpack.i.bf16 %v687_v19, %v681_v0  ;;  %v6546_v20 = vpack.c.bf16 %v687_v19, %v681_v0  ;;  %v6600_v0 = vpack.c.bf16 %v5133_v63, %v5132_v53  ;;  %v5135_v19 = vld [vmem:[%s10404_s6 + $0xe8] sm:$0xff] }
 0x254   : > { %5929 = vmatpush3.bf16.msra.mxu0 %v8108_v2 }
 0x255   : > { %10428 = vst [vmem:[#allocation26_spill] sm:$0xff] %v8118_v3  ;;  %6956 = vrot.lane.b32.xlu1 %v8118_v3, %s10327_s20  ;;  %v8123_v5 = vpop.f32.mrb[20].mxu0  ;;  %6548 = vmatprep.subr.msk.bf16.mxu1 %vm7848_vm1, %v6546_v20  ;;  %v921_v3 = vadd.s32 8, %v8319_v58 }
 0x256   : > { %v693_v17 = vpop.f32.mrb[21].mxu0  ;;  %5849 = vmatprep.mubr.msk.f32.mxu0 %vm1034_vm0, %v8123_v5 }
 0x257   : > { %6551 = vmatpush3.bf16.xpose.msk.msra.mxu1 %vm7848_vm1, %v6546_v20  ;;  %v6606_v20 = vpack.c.bf16 %v5135_v19, %v5134_v1  ;;  %v8336_v1 = vadd.s32 80, %v8319_v58  ;;  %vm939_vm9 = vcmp.gt.s32.totalorder %v8321_v59, %v921_v3 }
 0x259   : > { %v8131_v23 = vpop.f32.mrb[22].mxu0  ;;  %vm948_vm4 = vcmp.gt.s32.totalorder %v8321_v59, %v8336_v1 }
 0x25a   : > { %v699_v27 = vpop.f32.mrb[23].mxu0  ;;  %5850 = vmatmul.mubr.msk.f32.gmra.mrb[42].mxu0 %vm1034_vm0, %v8131_v23 }
 0x25b   : > { %v8135_v18 = vpack.i.bf16 %v699_v27, %v693_v17  ;;  %v6552_v21 = vpack.c.bf16 %v699_v27, %v693_v17  ;;  %v5136_v27 = vld [vmem:[%s10404_s6 + $0xf0] sm:$0xff] }
 0x25d   : > { %10429 = vst [vmem:[#allocation27_spill] sm:$0xff] %v8135_v18  ;;  %6961 = vrot.lane.b32.xlu0 %v8135_v18, %s10327_s20  ;;  %v8139_v7 = vpop.f32.mrb[24].mxu0  ;;  %6554 = vmatprep.subr.msk.bf16.mxu1 %vm7848_vm1, %v6552_v21  ;;  %v10433_v18 = vmov 0.0  }
 0x25e   : > { %v705_v14 = vpop.f32.mrb[25].mxu0  ;;  %5852 = vmatprep.mubr.msk.f32.mxu0 %vm1034_vm0, %v8139_v7  ;;  %v8406_v37 = vsel %vm939_vm9, -1e+09, %v10433_v18  ;;  %v8423_v62 = vsel %vm941_vm11, -1e+09, %v10433_v18  ;;  %vm944_vm9 = vcmp.gt.s32.totalorder %v8321_v59, %v926_v61 }
 0x25f   : > { %6557 = vmatpush3.bf16.xpose.msk.msra.mxu1 %vm7848_vm1, %v6552_v21  ;;  %v5137_v21 = vld [vmem:[%s10404_s6 + $0xf8] sm:$0xff]  ;;  %10434 = vst [vmem:[#allocation31_spill] sm:$0xff] %v8406_v37  ;;  %10436 = vst [vmem:[#allocation33_spill] sm:$0xff] %v8423_v62 }
 0x261   : > { %v8147_v15 = vpop.f32.mrb[26].mxu0 }
 0x262   : > { %v711_v25 = vpop.f32.mrb[27].mxu0  ;;  %5853 = vmatmul.mubr.msk.f32.gmra.mrb[44].mxu0 %vm1034_vm0, %v8147_v15 }
 0x263   : > { %v8151_v26 = vpack.i.bf16 %v711_v25, %v705_v14  ;;  %v6558_v8 = vpack.c.bf16 %v711_v25, %v705_v14  ;;  %v6612_v14 = vpack.c.bf16 %v5137_v21, %v5136_v27  ;;  %v8346_v27 = vadd.s32 104, %v8319_v58 }
 0x264   : > { %v8349_v21 = vadd.s32 96, %v8319_v58 }
 0x265   : > { %10430 = vst [vmem:[#allocation28_spill] sm:$0xff] %v8151_v26  ;;  %v8153_v16 = vpop.f32.mrb[28].mxu0  ;;  %6560 = vmatprep.subr.msk.bf16.mxu1 %vm7848_vm1, %v6558_v8  ;;  %vm951_vm5 = vcmp.gt.s32.totalorder %v8321_v59, %v8346_v27 }
 0x266   : > { %v717_v44 = vpop.f32.mrb[29].mxu0  ;;  %5855 = vmatprep.mubr.msk.f32.mxu0 %vm1034_vm0, %v8153_v16  ;;  %vm950_vm6 = vcmp.gt.s32.totalorder %v8321_v59, %v8349_v21 }
 0x267   : > { %6563 = vmatpush3.bf16.xpose.msk.msra.mxu1 %vm7848_vm1, %v6558_v8 }
 0x269   : > { %v8161_v29 = vpop.f32.mrb[30].mxu0 }
 0x26a   : > { %v723_v4 = vpop.f32.mrb[31].mxu0  ;;  %5856 = vmatmul.mubr.msk.f32.gmra.mrb[46].mxu0 %vm1034_vm0, %v8161_v29 }
 0x26b   : > { %v8171_v34 = vpack.i.bf16 %v723_v4, %v717_v44  ;;  %v6564_v22 = vpack.c.bf16 %v723_v4, %v717_v44 }
 0x26d   : > { %6566 = vmatprep.subr.msk.bf16.mxu1 %vm7848_vm1, %v6564_v22 }
 0x26f   : > { %6569 = vmatpush3.bf16.xpose.msk.msra.mxu1 %vm7848_vm1, %v6564_v22 }
 0x270   : > { %6572 = vmatprep.subr.msk.bf16.mxu1 %vm7848_vm1, %v6570_v40 }
 0x276   : > { %5891 = vmatmul.mubr.msk.f32.vlgmr.msra.gmra.mrb[16].mxu1 %vm1034_vm0, %v8009_v24  ;;  %v8409_v24 = vsel %vm938_vm10, -1e+09, %v10433_v18 }
 0x277   : > { %5893 = vmatprep.mubr.msk.f32.mxu1 %vm1034_vm0, %v8020_v28  ;;  %6575 = vmatpush3.bf16.xpose.msk.msra.mxu1 %vm7848_vm1, %v6570_v40  ;;  %10435 = vst [vmem:[#allocation32_spill] sm:$0xff] %v8409_v24 }
 0x278   : > { %6578 = vmatprep.subr.msk.bf16.mxu1 %vm7848_vm1, %v6576_v48 }
 0x27a   : > { %5894 = vmatmul.mubr.msk.f32.gmra.mrb[18].mxu1 %vm1034_vm0, %v8033_v32 }
 0x27b   : > { %5896 = vmatprep.mubr.msk.f32.mxu1 %vm1034_vm0, %v8047_v39 }
 0x27e   : > { %5897 = vmatmul.mubr.msk.f32.gmra.mrb[20].mxu1 %vm1034_vm0, %v8061_v47 }
 0x27f   : > { %5899 = vmatprep.mubr.msk.f32.mxu1 %vm1034_vm0, %v8073_v51  ;;  %6581 = vmatpush3.bf16.xpose.msk.msra.mxu1 %vm7848_vm1, %v6576_v48 }
 0x280   : > { %6584 = vmatprep.subr.msk.bf16.mxu1 %vm7848_vm1, %v6582_v6 }
 0x282   : > { %5900 = vmatmul.mubr.msk.f32.gmra.mrb[22].mxu1 %vm1034_vm0, %v8087_v54 }
 0x283   : > { %5902 = vmatprep.mubr.msk.f32.mxu1 %vm1034_vm0, %v8099_v13 }
 0x286   : > { %5903 = vmatmul.mubr.msk.f32.gmra.mrb[24].mxu1 %vm1034_vm0, %v8113_v55 }
 0x287   : > { %5905 = vmatprep.mubr.msk.f32.mxu1 %vm1034_vm0, %v8123_v5  ;;  %6587 = vmatpush3.bf16.xpose.msk.msra.mxu1 %vm7848_vm1, %v6582_v6 }
 0x288   : > { %6590 = vmatprep.subr.msk.bf16.mxu1 %vm7848_vm1, %v6588_v36 }
 0x28a   : > { %5906 = vmatmul.mubr.msk.f32.gmra.mrb[26].mxu1 %vm1034_vm0, %v8131_v23 }
 0x28b   : > { %5908 = vmatprep.mubr.msk.f32.mxu1 %vm1034_vm0, %v8139_v7 }
 0x28e   : > { %5909 = vmatmul.mubr.msk.f32.gmra.mrb[28].mxu1 %vm1034_vm0, %v8147_v15 }
 0x28f   : > { %5911 = vmatprep.mubr.msk.f32.mxu1 %vm1034_vm0, %v8153_v16  ;;  %6593 = vmatpush3.bf16.xpose.msk.msra.mxu1 %vm7848_vm1, %v6588_v36 }
 0x290   : > { %6596 = vmatprep.subr.msk.bf16.mxu1 %vm7848_vm1, %v6594_v12 }
 0x292   : > { %5912 = vmatmul.mubr.msk.f32.gmra.mrb[30].mxu1 %vm1034_vm0, %v8161_v29 }
 0x297   : > { %6599 = vmatpush3.bf16.xpose.msk.msra.mxu1 %vm7848_vm1, %v6594_v12  ;;  %v8324_v12 = vadd.s32 64, %v8319_v58 }
 0x298   : > { %6602 = vmatprep.subr.msk.bf16.mxu1 %vm7848_vm1, %v6600_v0 }
 0x299   : > { %vm946_vm2 = vcmp.gt.s32.totalorder %v8321_v59, %v8324_v12 }
 0x29f   : > { %6605 = vmatpush3.bf16.xpose.msk.msra.mxu1 %vm7848_vm1, %v6600_v0  ;;  %v8333_v0 = vadd.s32 88, %v8319_v58 }
 0x2a0   : > { %v8267_v17 = vpop.permute.xlu1 %1903  ;;  %6608 = vmatprep.subr.msk.bf16.mxu1 %vm7848_vm1, %v6606_v20 }
 0x2a1   : > { %5978 = vmatprep.mubr.msk.f32.mxu1 %vm1034_vm0, %v8267_v17  ;;  %vm949_vm3 = vcmp.gt.s32.totalorder %v8321_v59, %v8333_v0 }
 0x2a4   : > { %v8281_v25 = vpop.permute.xlu1 %1905 }
 0x2a7   : > { %6611 = vmatpush3.bf16.xpose.msk.msra.mxu1 %vm7848_vm1, %v6606_v20 }
 0x2a8   : > { %v6937_v8 = vpop.permute.xlu0 %6936  ;;  %6614 = vmatprep.subr.msk.bf16.mxu1 %vm7848_vm1, %v6612_v14 }
 0x2a9   : > { %v6939_v44 = vunpack.i.h.bf16 %v6937_v8  ;;  %v6938_v30 = vunpack.i.l.bf16 %v6937_v8 }
 0x2ab   : > { %v8285_v33 = vpack.c.bf16 %v6939_v44, %v6938_v30  ;;  %v8358_v44 = vadd.s32 120, %v8319_v58  ;;  %v8361_v30 = vadd.s32 112, %v8319_v58 }
 0x2ac   : > { %v8287_v4 = vpop.permute.xlu1 %1909  ;;  %v8296_v40 = vpop.permute.xlu0 %1907 }
 0x2ad   : > { %6620 = vmatprep.subr.msk.bf16.mxu0 %vm7848_vm1, %v8285_v33  ;;  %vm953_vm7 = vcmp.gt.s32.totalorder %v8321_v59, %v8358_v44  ;;  %vm952_vm8 = vcmp.gt.s32.totalorder %v8321_v59, %v8361_v30 }
 0x2af   : > { %6617 = vmatpush3.bf16.xpose.msk.msra.mxu1 %vm7848_vm1, %v6612_v14 }
 0x2b0   : > { %v8294_v22 = vpop.permute.xlu1 %6941 }
 0x2b4   : > { %v8300_v10 = vpop.permute.xlu1 %1911 }
 0x2b5   : > { %10431 = vst [vmem:[#allocation29_spill] sm:$0xff] %v8300_v10 }
 0x2b6   : > { %5979 = vmatmul.mubr.msk.f32.vlgmr.msra.gmra.mrb[32].mxu1 %vm1034_vm0, %v8281_v25 }
 0x2b7   : > { %5981 = vmatprep.mubr.msk.f32.mxu1 %vm1034_vm0, %v8296_v40 }
 0x2b8   : > { %v8308_v11 = vpop.permute.xlu1 %1913 }
 0x2b9   : > { %10432 = vst [vmem:[#allocation30_spill] sm:$0xff] %v8308_v11 }
 0x2ba   : > { %5982 = vmatmul.mubr.msk.f32.gmra.mrb[34].mxu1 %vm1034_vm0, %v8287_v4 }
 0x2bb   : > { %5984 = vmatprep.mubr.msk.f32.mxu1 %vm1034_vm0, %v8300_v10 }
 0x2bc   : > { %v8393_v47 = vpop.permute.xlu1 %6946 }
 0x2be   : > { %5985 = vmatmul.mubr.msk.f32.gmra.mrb[36].mxu1 %vm1034_vm0, %v8308_v11  ;;  %v8477_v11 = vsel %vm945_vm15, -1e+09, %v10433_v18 }
 0x2bf   : > { %10441 = vst [vmem:[#allocation38_spill] sm:$0xff] %v8477_v11 }
 0x2c0   : > { %v8395_v39 = vpop.permute.xlu1 %6951 }
 0x2c7   : > { %v8398_v43 = vpop.permute.xlu1 %6956 }
 0x2cf   : > { %v8400_v50 = vpop.permute.xlu0 %6961 }
 0x305   : > { %v5836_v48 = vpop.f32.mrb[32].mxu0 }
 0x306   : > { %1282 = vrot.lane.b32.xlu1 %v5836_v48, %s10325_s15  ;;  %v1197_v49 = vpop.f32.mrb[33].mxu0 }
 0x307   : > { %1278 = vrot.lane.b32.xlu0 %v1197_v49, %s10323_s16 }
 0x30e   : > { %v5839_v52 = vpop.f32.mrb[34].mxu0 }
 0x30f   : > { %1290 = vrot.lane.b32.xlu1 %v5839_v52, %s10321_s18  ;;  %v1207_v6 = vpop.f32.mrb[35].mxu0 }
 0x313   : > { %1286 = vrot.lane.b32.xlu1 %v1207_v6, %s10319_s19 }
 0x315   : > { %v5842_v56 = vpop.f32.mrb[36].mxu0 }
 0x316   : > { %v1217_v36 = vpop.f32.mrb[37].mxu0 }
 0x317   : > { %6966 = vrot.lane.b32.xlu1 %v8151_v26, %s10327_s20  ;;  %1294 = vrot.lane.b32.xlu0 %v1217_v36, %s10311_s21 }
 0x31b   : > { %1915 = vrot.lane.b32.xlu1 %v8073_v51, %s10327_s20 }
 0x31d   : > { %v5845_v53 = vpop.f32.mrb[38].mxu0 }
 0x31e   : > { %v1227_v63 = vpop.f32.mrb[39].mxu0 }
 0x31f   : > { %1298 = vrot.lane.b32.xlu1 %v5842_v56, %s10315_s22  ;;  %1302 = vrot.lane.b32.xlu0 %v1227_v63, %s10317_s23 }
 0x323   : > { %1306 = vrot.lane.b32.xlu1 %v5845_v53, %s10313_s29 }
 0x325   : > { %v5848_v19 = vpop.f32.mrb[40].mxu0 }
 0x326   : > { %v1237_v20 = vpop.f32.mrb[41].mxu0 }
 0x327   : > { %1314 = vrot.lane.b32.xlu1 %v5848_v19, %s10248_s8  ;;  %1310 = vrot.lane.b32.xlu0 %v1237_v20, %s10242_s9  ;;  %s10364_s9 = smov 361   ;;  %s10329_s8 = smov 369  }
 0x32d   : > { %v5851_v14 = vpop.f32.mrb[42].mxu0 }
 0x32e   : > { %1322 = vrot.lane.b32.xlu1 %v5851_v14, %s10244_s13  ;;  %v1247_v8 = vpop.f32.mrb[43].mxu0  ;;  %s10362_s13 = smov 353  }
 0x32f   : > { %1318 = vrot.lane.b32.xlu0 %v1247_v8, %s10246_s14  ;;  %s10360_s14 = smov 377  }
 0x335   : > { %v5854_v48 = vpop.f32.mrb[44].mxu0 }
 0x336   : > { %1330 = vrot.lane.b32.xlu1 %v5854_v48, %s10364_s9  ;;  %v1257_v49 = vpop.f32.mrb[45].mxu0 }
 0x337   : > { %1326 = vrot.lane.b32.xlu0 %v1257_v49, %s10362_s13 }
 0x33d   : > { %v5857_v52 = vpop.f32.mrb[46].mxu0 }
 0x33e   : > { %1338 = vrot.lane.b32.xlu1 %v5857_v52, %s10360_s14  ;;  %v1267_v6 = vpop.f32.mrb[47].mxu0 }
 0x33f   : > { %1334 = vrot.lane.b32.xlu0 %v1267_v6, %s10329_s8  ;;  %s10479_s8 = smov 337  }
 0x349   : > { %v5892_v45 = vpop.f32.mrb[16].mxu1 }
 0x34a   : > { %v1454_v56 = vpop.f32.mrb[17].mxu1 }
 0x34d   : > { %v5895_v36 = vpop.f32.mrb[18].mxu1 }
 0x34e   : > { %v1464_v53 = vpop.f32.mrb[19].mxu1 }
 0x351   : > { %v8371_v63 = vpop.f32.mrb[20].mxu1 }
 0x352   : > { %v1474_v19 = vpop.f32.mrb[21].mxu1 }
 0x355   : > { %v8373_v20 = vpop.f32.mrb[22].mxu1 }
 0x356   : > { %v8375_v14 = vpop.f32.mrb[23].mxu1 }
 0x359   : > { %v8377_v8 = vpop.f32.mrb[24].mxu1 }
 0x35a   : > { %v8379_v48 = vpop.f32.mrb[25].mxu1 }
 0x35d   : > { %v8381_v49 = vpop.f32.mrb[26].mxu1 }
 0x35e   : > { %v8383_v52 = vpop.f32.mrb[27].mxu1 }
 0x361   : > { %v8385_v6 = vpop.f32.mrb[28].mxu1 }
 0x362   : > { %v8387_v41 = vpop.f32.mrb[29].mxu1 }
 0x365   : > { %v8389_v51 = vpop.f32.mrb[30].mxu1 }
 0x366   : > { %v8391_v26 = vpop.f32.mrb[31].mxu1 }
 0x378   : > { %v1283_v32 = vpop.permute.xlu1 %1282 }
 0x379   : > { %v1460_v28 = vadd.f32 %v5892_v45, %v1283_v32  ;;  %v1279_v60 = vpop.permute.xlu0 %1278  ;;  %v922_v32 = vadd.s32 16, %v8319_v58 }
 0x37a   : > { %v1455_v2 = vadd.f32 %v1454_v56, %v1279_v60 }
 0x37b   : > { %v8413_v57 = vadd.f32 %v1460_v28, %v8406_v37  ;;  %vm940_vm12 = vcmp.gt.s32.totalorder %v8321_v59, %v922_v32  ;;  %v924_v28 = vadd.s32 32, %v8319_v58 }
 0x37c   : > { %v8416_v3 = vadd.f32 %v1455_v2, %v8409_v24  ;;  %v8431_v37 = vsel %vm940_vm12, -1e+09, %v10433_v18 }
 0x37d   : > { %1551 = vmax.xlane.f32.xlu1 %v8413_v57  ;;  %10437 = vst [vmem:[#allocation34_spill] sm:$0xff] %v8431_v37  ;;  %vm942_vm13 = vcmp.gt.s32.totalorder %v8321_v59, %v924_v28 }
 0x37e   : > { %1549 = vmax.xlane.f32.xlu0 %v8416_v3 }
 0x381   : > { %v1291_v45 = vpop.permute.xlu1 %1290 }
 0x382   : > { %v1470_v60 = vadd.f32 %v5895_v36, %v1291_v45 }
 0x384   : > { %v8428_v2 = vadd.f32 %v1470_v60, %v8423_v62  ;;  %v8446_v62 = vsel %vm942_vm13, -1e+09, %v10433_v18 }
 0x385   : > { %v1287_v56 = vpop.permute.xlu1 %1286  ;;  %10438 = vst [vmem:[#allocation35_spill] sm:$0xff] %v8446_v62 }
 0x386   : > { %v1465_v24 = vadd.f32 %v1464_v53, %v1287_v56  ;;  %1555 = vmax.xlane.f32.xlu0 %v8428_v2  ;;  %v925_v53 = vadd.s32 40, %v8319_v58 }
 0x388   : > { %v8436_v9 = vadd.f32 %v1465_v24, %v8431_v37  ;;  %vm943_vm14 = vcmp.gt.s32.totalorder %v8321_v59, %v925_v53 }
 0x389   : > { %v8438_v36 = vpop.f32.mrb[32].mxu1  ;;  %v8440_v32 = vpop.permute.xlu1 %6966 }
 0x38a   : > { %v8442_v45 = vpop.f32.mrb[33].mxu1  ;;  %1553 = vmax.xlane.f32.xlu0 %v8436_v9  ;;  %v1295_v60 = vpop.permute.xlu0 %1294 }
 0x38b   : > { %v1475_v56 = vadd.f32 %v1474_v19, %v1295_v60  ;;  %v8466_v60 = vsel %vm943_vm14, -1e+09, %v10433_v18 }
 0x38c   : > { %10440 = vst [vmem:[#allocation37_spill] sm:$0xff] %v8466_v60 }
 0x38d   : > { %v8449_v35 = vpop.permute.xlu1 %1915  ;;  %v8451_v28 = vpop.f32.mrb[34].mxu1  ;;  %v8454_v24 = vadd.f32 %v1475_v56, %v8446_v62 }
 0x38e   : > { %10439 = vst [vmem:[#allocation36_spill] sm:$0xff] %v8449_v35  ;;  %v8456_v37 = vpop.f32.mrb[35].mxu1  ;;  %5987 = vmatprep.mubr.msk.f32.mxu1 %vm1034_vm0, %v8449_v35 }
 0x38f   : > { %1557 = vmax.xlane.f32.xlu0 %v8454_v24 }
 0x391   : > { %v1299_v42 = vpop.permute.xlu1 %1298  ;;  %v8463_v19 = vpop.f32.mrb[36].mxu1 }
 0x392   : > { %v1480_v56 = vadd.f32 %v8371_v63, %v1299_v42  ;;  %v8469_v62 = vpop.f32.mrb[37].mxu1  ;;  %v1303_v31 = vpop.permute.xlu0 %1302  ;;  %v929_v42 = vadd.s32 72, %v8319_v58 }
 0x393   : > { %v1485_v38 = vadd.f32 %v8375_v14, %v1303_v31  ;;  %v8513_v14 = vsel %vm946_vm2, -1e+09, %v10433_v18  ;;  %vm3775_vm2 = vcmask 785920  }
 0x394   : > { %v8474_v53 = vadd.f32 %v1480_v56, %v8466_v60  ;;  %v8488_v60 = vsel %vm944_vm9, -1e+09, %v10433_v18  ;;  %vm947_vm10 = vcmp.gt.s32.totalorder %v8321_v59, %v929_v42  ;;  %10444 = vst [vmem:[#allocation41_spill] sm:$0xff] %v8513_v14 }
 0x395   : > { %v1307_v35 = vpop.permute.xlu1 %1306  ;;  %10442 = vst [vmem:[#allocation39_spill] sm:$0xff] %v8488_v60  ;;  %v8497_v61 = vsel %vm947_vm10, -1e+09, %v10433_v18 }
 0x396   : > { %v1490_v10 = vadd.f32 %v8373_v20, %v1307_v35  ;;  %1559 = vmax.xlane.f32.xlu1 %v8474_v53  ;;  %v8494_v20 = vadd.f32 %v1485_v38, %v8488_v60  ;;  %10443 = vst [vmem:[#allocation40_spill] sm:$0xff] %v8497_v61 }
 0x398   : > { %v8485_v63 = vadd.f32 %v1490_v10, %v8477_v11 }
 0x399   : > { %v1315_v56 = vpop.permute.xlu1 %1314  ;;  %v1311_v10 = vpop.permute.xlu0 %1310 }
 0x39a   : > { %1563 = vmax.xlane.f32.xlu0 %v8485_v63  ;;  %v1500_v35 = vadd.f32 %v8377_v8, %v1315_v56  ;;  %v1495_v58 = vadd.f32 %v8379_v48, %v1311_v10  ;;  %v8524_v48 = vsel %vm949_vm3, -1e+09, %v10433_v18 }
 0x39c   : > { %v8501_v31 = vadd.f32 %v1500_v35, %v8497_v61  ;;  %v8516_v8 = vadd.f32 %v1495_v58, %v8513_v14  ;;  %v8534_v58 = vsel %vm948_vm4, -1e+09, %v10433_v18 }
 0x39e   : > { %1561 = vmax.xlane.f32.xlu0 %v8494_v20 }
 0x3a0   : > { %v1323_v42 = vpop.permute.xlu1 %1322 }
 0x3a1   : > { %v1510_v38 = vadd.f32 %v8381_v49, %v1323_v42  ;;  %v1319_v56 = vpop.permute.xlu0 %1318 }
 0x3a2   : > { %1567 = vmax.xlane.f32.xlu0 %v8501_v31  ;;  %v1505_v35 = vadd.f32 %v8383_v52, %v1319_v56  ;;  %v8545_v52 = vsel %vm951_vm5, -1e+09, %v10433_v18  ;;  %v8558_v56 = vsel %vm950_vm6, -1e+09, %v10433_v18 }
 0x3a3   : > { %v8528_v12 = vadd.f32 %v1510_v38, %v8524_v48 }
 0x3a4   : > { %v8539_v0 = vadd.f32 %v1505_v35, %v8534_v58 }
 0x3a7   : > { %1917 = vrot.lane.b32.xlu1 %v8087_v54, %s10327_s20 }
 0x3a8   : > { %v1331_v10 = vpop.permute.xlu1 %1330 }
 0x3a9   : > { %v1520_v49 = vadd.f32 %v8385_v6, %v1331_v10  ;;  %v1327_v42 = vpop.permute.xlu0 %1326  ;;  %v8571_v10 = vsel %vm953_vm7, -1e+09, %v10433_v18 }
 0x3aa   : > { %v1515_v1 = vadd.f32 %v8387_v41, %v1327_v42 }
 0x3ab   : > { %v8552_v38 = vadd.f32 %v1520_v49, %v8545_v52 }
 0x3ac   : > { %v8565_v35 = vadd.f32 %v1515_v1, %v8558_v56 }
 0x3b0   : > { %v1339_v6 = vpop.permute.xlu1 %1338 }
 0x3b1   : > { %v1530_v27 = vadd.f32 %v8389_v51, %v1339_v6  ;;  %v1335_v41 = vpop.permute.xlu0 %1334  ;;  %v8584_v51 = vsel %vm952_vm8, -1e+09, %v10433_v18 }
 0x3b2   : > { %v1525_v21 = vadd.f32 %v8391_v26, %v1335_v41 }
 0x3b3   : > { %v8578_v49 = vadd.f32 %v1530_v27, %v8571_v10 }
 0x3b4   : > { %v8590_v44 = vadd.f32 %v1525_v21, %v8584_v51 }
 0x3b8   : > { %1921 = vrot.lane.b32.xlu0 %v8113_v55, %s10327_s20 }
 0x3cb   : > { %1565 = vmax.xlane.f32.xlu1 %v8516_v8 }
 0x3d7   : > { %1571 = vmax.xlane.f32.xlu0 %v8528_v12 }
 0x3db   : > { %1569 = vmax.xlane.f32.xlu0 %v8539_v0 }
 0x3dc   : > { %1919 = vrot.lane.b32.xlu1 %v8099_v13, %s10327_s20 }
 0x3df   : > { %1575 = vmax.xlane.f32.xlu0 %v8552_v38 }
 0x3e0   : > { %6971 = vrot.lane.b32.xlu1 %v8171_v34, %s10327_s20 }
 0x3e3   : > { %1573 = vmax.xlane.f32.xlu0 %v8565_v35 }
 0x3e4   : > { %1925 = vrot.lane.b32.xlu1 %v8131_v23, %s10327_s20 }
 0x3e7   : > { %1579 = vmax.xlane.f32.xlu0 %v8578_v49 }
 0x3e8   : > { %1929 = vrot.lane.b32.xlu1 %v8147_v15, %s10327_s20 }
 0x3eb   : > { %1577 = vmax.xlane.f32.xlu0 %v8590_v44 }
 0x3ec   : > { %1933 = vrot.lane.b32.xlu1 %v8161_v29, %s10327_s20 }
 0x3f0   : > { %2166 = vrot.lane.b32.xlu1 %v8438_v36, %s10325_s15  ;;  %s10472_s15 = smov 329  }
 0x3f4   : > { %2174 = vrot.lane.b32.xlu1 %v8451_v28, %s10321_s18  ;;  %s10568_s18 = smov 353  }
 0x3f8   : > { %2182 = vrot.lane.b32.xlu1 %v8463_v19, %s10315_s22  ;;  %s10358_s22 = smov 64  }
 0x401   : > { %1923 = vrot.lane.b32.xlu0 %v8123_v5, %s10327_s20 }
 0x405   : > { %1927 = vrot.lane.b32.xlu0 %v8139_v7, %s10327_s20 }
 0x409   : > { %1931 = vrot.lane.b32.xlu0 %v8153_v16, %s10327_s20  ;;  %s10478_s20 = smov 345  }
 0x40a   : > { %v1552_v18 = vpop.xlane.xlu1 %1551 }
 0x40b   : > { %v1582_v26 = vsub.f32 %v8413_v57, %v1552_v18  ;;  %v1550_v59 = vpop.xlane.xlu0 %1549 }
 0x40c   : > { %v1581_v30 = vsub.f32 %v8416_v3, %v1550_v59  ;;  %v6943_v59 = vunpack.i.l.bf16 %v8294_v22 }
 0x40d   : > { %v1599_v36 = vmul.f32 1.442695, %v1582_v26  ;;  %2162 = vrot.lane.b32.xlu0 %v8442_v45, %s10323_s16  ;;  %s10473_s16 = smov 321  }
 0x40e   : > { %v1597_v28 = vmul.f32 1.442695, %v1581_v30 }
 0x40f   : > { %7095 = vpow2.f32 %v1599_v36 }
 0x410   : > { %7097 = vpow2.f32 %v1597_v28 }
 0x411   : > { %2170 = vrot.lane.b32.xlu0 %v8456_v37, %s10319_s19  ;;  %s10483_s19 = smov 96  }
 0x413   : > { %v1556_v19 = vpop.xlane.xlu0 %1555 }
 0x414   : > { %v1584_v42 = vsub.f32 %v8428_v2, %v1556_v19 }
 0x415   : > { %2178 = vrot.lane.b32.xlu0 %v8469_v62, %s10311_s21  ;;  %s10480_s21 = smov 369  }
 0x416   : > { %v1603_v57 = vmul.f32 1.442695, %v1584_v42 }
 0x417   : > { %v1554_v1 = vpop.xlane.xlu0 %1553 }
 0x418   : > { %v1583_v3 = vsub.f32 %v8436_v9, %v1554_v1  ;;  %7099 = vpow2.f32 %v1603_v57  ;;  %v6944_v9 = vunpack.i.h.bf16 %v8294_v22 }
 0x419   : > { %v8617_v6 = vpop.eup %7095 }
 0x41a   : > { %10445 = vst [vmem:[#allocation42_spill] sm:$0xff] %v8617_v6  ;;  %v8619_v27 = vpop.eup %7097  ;;  %v1601_v45 = vmul.f32 1.442695, %v1583_v3  ;;  %v6949_v3 = vunpack.i.h.bf16 %v8393_v47 }
 0x41b   : > { %10446 = vst [vmem:[#allocation43_spill] sm:$0xff] %v8619_v27  ;;  %v1677_v41 = vpack.c.bf16 %v8617_v6, %v8619_v27  ;;  %v10506_v27 = vld [vmem:[#allocation28_spill] sm:$0xff] }
 0x41c   : > { %7101 = vpow2.f32 %v1601_v45  ;;  %v1558_v37 = vpop.xlane.xlu0 %1557 }
 0x41d   : > { %5930 = vmatprep.mubr.bf16.mxu0 %v1677_v41  ;;  %v1585_v2 = vsub.f32 %v8454_v24, %v1558_v37 }
 0x41f   : > { %v1605_v21 = vmul.f32 1.442695, %v1585_v2 }
 0x421   : > { %7103 = vpow2.f32 %v1605_v21 }
 0x422   : > { %v8625_v26 = vpop.eup %7099 }
 0x423   : > { %v1560_v62 = vpop.xlane.xlu1 %1559  ;;  %10447 = vst [vmem:[#allocation44_spill] sm:$0xff] %v8625_v26 }
 0x424   : > { %v1586_v18 = vsub.f32 %v8474_v53, %v1560_v62  ;;  %v6624_v53 = vpack.c.bf16 %v6944_v9, %v6943_v59  ;;  %v6959_v59 = vunpack.i.h.bf16 %v8398_v43 }
 0x426   : > { %v8629_v30 = vpop.eup %7101  ;;  %v1607_v36 = vmul.f32 1.442695, %v1586_v18 }
 0x427   : > { %10448 = vst [vmem:[#allocation45_spill] sm:$0xff] %v8629_v30  ;;  %v8631_v28 = vpop.permute.xlu1 %1917  ;;  %v1564_v19 = vpop.xlane.xlu0 %1563  ;;  %v1678_v24 = vpack.c.bf16 %v8625_v26, %v8629_v30 }
 0x428   : > { %7105 = vpow2.f32 %v1607_v36  ;;  %v1588_v42 = vsub.f32 %v8485_v63, %v1564_v19  ;;  %5988 = vmatmul.mubr.msk.f32.gmra.mrb[38].mxu1 %vm1034_vm0, %v8631_v28  ;;  %v6948_v63 = vunpack.i.l.bf16 %v8393_v47  ;;  %v6953_v47 = vunpack.i.l.bf16 %v8395_v39 }
 0x429   : > { %5931 = vmatmul.mubr.bf16.vlgmr.msra.gmra.mrb[48].mxu0 %v1678_v24  ;;  %v6958_v36 = vunpack.i.l.bf16 %v8398_v43  ;;  %v6964_v19 = vunpack.i.h.bf16 %v8400_v50  ;;  %v6963_v24 = vunpack.i.l.bf16 %v8400_v50  ;;  %v6969_v43 = vunpack.i.h.bf16 %v8440_v32 }
 0x42a   : > { %6623 = vmatpush3.bf16.xpose.msk.msra.mxu0 %vm7848_vm1, %v8285_v33  ;;  %v1611_v22 = vmul.f32 1.442695, %v1588_v42  ;;  %v6630_v37 = vpack.c.bf16 %v6949_v3, %v6948_v63 }
 0x42b   : > { %6626 = vmatprep.subr.msk.bf16.mxu0 %vm7848_vm1, %v6624_v53  ;;  %v1562_v57 = vpop.xlane.xlu0 %1561  ;;  %v8646_v41 = vpop.eup %7103  ;;  %v6648_v42 = vpack.c.bf16 %v6964_v19, %v6963_v24 }
 0x42c   : > { %v1587_v1 = vsub.f32 %v8494_v20, %v1562_v57  ;;  %7107 = vpow2.f32 %v1611_v22  ;;  %10449 = vst [vmem:[#allocation46_spill] sm:$0xff] %v8646_v41  ;;  %v6954_v20 = vunpack.i.h.bf16 %v8395_v39  ;;  %v6642_v39 = vpack.c.bf16 %v6959_v59, %v6958_v36 }
 0x42e   : > { %v1609_v45 = vmul.f32 1.442695, %v1587_v1  ;;  %v6636_v62 = vpack.c.bf16 %v6954_v20, %v6953_v47 }
 0x42f   : > { %v1568_v57 = vpop.xlane.xlu0 %1567 }
 0x430   : > { %7109 = vpow2.f32 %v1609_v45  ;;  %v1590_v50 = vsub.f32 %v8501_v31, %v1568_v57 }
 0x432   : > { %v8648_v2 = vpop.eup %7105  ;;  %6629 = vmatpush3.bf16.xpose.msk.msra.mxu0 %vm7848_vm1, %v6624_v53  ;;  %v6968_v53 = vunpack.i.l.bf16 %v8440_v32  ;;  %v1615_v1 = vmul.f32 1.442695, %v1590_v50 }
 0x433   : > { %10450 = vst [vmem:[#allocation47_spill] sm:$0xff] %v8648_v2  ;;  %6632 = vmatprep.subr.msk.bf16.mxu0 %vm7848_vm1, %v6630_v37  ;;  %v1679_v33 = vpack.c.bf16 %v8648_v2, %v8646_v41  ;;  %v10503_v41 = vld [vmem:[#allocation26_spill] sm:$0xff] }
 0x434   : > { %v6654_v22 = vpack.c.bf16 %v6969_v43, %v6968_v53  ;;  %7111 = vpow2.f32 %v1615_v1  ;;  %v10505_v2 = vld [vmem:[#allocation18_spill] sm:$0xff] }
 0x435   : > { %5934 = vmatprep.mubr.bf16.mxu0 %v1679_v33 }
 0x436   : > { %v8658_v21 = vpop.eup %7107 }
 0x437   : > { %10451 = vst [vmem:[#allocation48_spill] sm:$0xff] %v8658_v21 }
 0x43a   : > { %v8660_v18 = vpop.eup %7109  ;;  %6635 = vmatpush3.bf16.xpose.msk.msra.mxu0 %vm7848_vm1, %v6630_v37  ;;  %v8692_v37 = vpop.permute.xlu0 %1921 }
 0x43b   : > { %10452 = vst [vmem:[#allocation49_spill] sm:$0xff] %v8660_v18  ;;  %6638 = vmatprep.subr.msk.bf16.mxu0 %vm7848_vm1, %v6636_v62  ;;  %v1680_v9 = vpack.c.bf16 %v8658_v21, %v8660_v18 }
 0x43d   : > { %5935 = vmatmul.mubr.bf16.gmra.mrb[52].mxu0 %v1680_v9 }
 0x43e   : > { %v8701_v9 = vpop.eup %7111 }
 0x43f   : > { %10453 = vst [vmem:[#allocation50_spill] sm:$0xff] %v8701_v9 }
 0x442   : > { %6641 = vmatpush3.bf16.xpose.msk.msra.mxu0 %vm7848_vm1, %v6636_v62 }
 0x443   : > { %6644 = vmatprep.subr.msk.bf16.mxu0 %vm7848_vm1, %v6642_v39 }
 0x44a   : > { %6647 = vmatpush3.bf16.xpose.msk.msra.mxu0 %vm7848_vm1, %v6642_v39 }
 0x44b   : > { %6650 = vmatprep.subr.msk.bf16.mxu0 %vm7848_vm1, %v6648_v42 }
 0x452   : > { %6653 = vmatpush3.bf16.xpose.msk.msra.mxu0 %vm7848_vm1, %v6648_v42 }
 0x453   : > { %6656 = vmatprep.subr.msk.bf16.mxu0 %vm7848_vm1, %v6654_v22 }
 0x458   : > { %v1566_v3 = vpop.xlane.xlu1 %1565 }
 0x459   : > { %v1589_v63 = vsub.f32 %v8516_v8, %v1566_v3 }
 0x45a   : > { %6659 = vmatpush3.bf16.xpose.msk.msra.mxu0 %vm7848_vm1, %v6654_v22 }
 0x45b   : > { %v1613_v45 = vmul.f32 1.442695, %v1589_v63 }
 0x45c   : > { %v8690_v32 = vpop.permute.xlu1 %1919 }
 0x45d   : > { %7113 = vpow2.f32 %v1613_v45  ;;  %5990 = vmatprep.mubr.msk.f32.mxu1 %vm1034_vm0, %v8690_v32 }
 0x45e   : > { %5991 = vmatmul.mubr.msk.f32.gmra.mrb[40].mxu1 %vm1034_vm0, %v8692_v37 }
 0x460   : > { %v6972_v31 = vpop.permute.xlu1 %6971 }
 0x461   : > { %v6974_v33 = vunpack.i.h.bf16 %v6972_v31  ;;  %v6973_v20 = vunpack.i.l.bf16 %v6972_v31 }
 0x463   : > { %v6660_v8 = vpack.c.bf16 %v6974_v33, %v6973_v20 }
 0x464   : > { %v1572_v47 = vpop.xlane.xlu0 %1571 }
 0x465   : > { %v1592_v62 = vsub.f32 %v8528_v12, %v1572_v47  ;;  %6662 = vmatprep.subr.msk.bf16.mxu0 %vm7848_vm1, %v6660_v8 }
 0x466   : > { %6665 = vmatpush3.bf16.xpose.msk.msra.mxu0 %vm7848_vm1, %v6660_v8 }
 0x467   : > { %v8705_v59 = vpop.eup %7113  ;;  %v1619_v36 = vmul.f32 1.442695, %v1592_v62 }
 0x468   : > { %10454 = vst [vmem:[#allocation51_spill] sm:$0xff] %v8705_v59  ;;  %v1570_v39 = vpop.xlane.xlu0 %1569  ;;  %v1681_v19 = vpack.c.bf16 %v8701_v9, %v8705_v59  ;;  %v10507_v9 = vld [vmem:[#allocation32_spill] sm:$0xff] }
 0x469   : > { %v1591_v24 = vsub.f32 %v8539_v0, %v1570_v39  ;;  %7115 = vpow2.f32 %v1619_v36 }
 0x46a   : > { %5938 = vmatprep.mubr.bf16.mxu0 %v1681_v19 }
 0x46b   : > { %v1617_v42 = vmul.f32 1.442695, %v1591_v24 }
 0x46c   : > { %v1576_v12 = vpop.xlane.xlu0 %1575 }
 0x46d   : > { %7117 = vpow2.f32 %v1617_v42  ;;  %v1594_v43 = vsub.f32 %v8552_v38, %v1576_v12  ;;  %v1926_v38 = vpop.permute.xlu1 %1925 }
 0x46f   : > { %v1623_v53 = vmul.f32 1.442695, %v1594_v43  ;;  %v10461_v43 = vld [vmem:[#allocation29_spill] sm:$0xff] }
 0x470   : > { %v1574_v22 = vpop.xlane.xlu0 %1573 }
 0x471   : > { %v1593_v57 = vsub.f32 %v8565_v35, %v1574_v22  ;;  %7119 = vpow2.f32 %v1623_v53  ;;  %v1930_v62 = vpop.permute.xlu1 %1929  ;;  %v10462_v53 = vld [vmem:[#allocation30_spill] sm:$0xff]  ;;  %v10463_v22 = vld [vmem:[#allocation36_spill] sm:$0xff] }
 0x473   : > { %v1621_v50 = vmul.f32 1.442695, %v1593_v57  ;;  %v8713_v63 = vpop.eup %7115 }
 0x474   : > { %v1580_v1 = vpop.xlane.xlu0 %1579  ;;  %10455 = vst [vmem:[#allocation52_spill] sm:$0xff] %v8713_v63 }
 0x475   : > { %7121 = vpow2.f32 %v1621_v50  ;;  %v1596_v3 = vsub.f32 %v8578_v49, %v1580_v1  ;;  %v1934_v19 = vpop.permute.xlu1 %1933 }
 0x477   : > { %v8715_v0 = vpop.eup %7117  ;;  %v1627_v45 = vmul.f32 1.442695, %v1596_v3  ;;  %v5202_v3 = vld [vmem:[%s10404_s6 + $0x100] sm:$0xff] }
 0x478   : > { %10456 = vst [vmem:[#allocation53_spill] sm:$0xff] %v8715_v0  ;;  %v1578_v31 = vpop.xlane.xlu0 %1577  ;;  %v1682_v33 = vpack.c.bf16 %v8713_v63, %v8715_v0  ;;  %v10504_v0 = vld [vmem:[#allocation16_spill] sm:$0xff] }
 0x479   : > { %v1595_v20 = vsub.f32 %v8590_v44, %v1578_v31  ;;  %7123 = vpow2.f32 %v1627_v45  ;;  %v5203_v45 = vld [vmem:[%s10404_s6 + $0x108] sm:$0xff]  ;;  %v2167_v30 = vpop.permute.xlu1 %2166 }
 0x47a   : > { %5939 = vmatmul.mubr.bf16.gmra.mrb[56].mxu0 %v1682_v33  ;;  %v6666_v31 = vpack.c.bf16 %v5203_v45, %v5202_v3  ;;  %v5204_v33 = vld [vmem:[%s10404_s6 + $0x110] sm:$0xff] }
 0x47b   : > { %v1625_v35 = vmul.f32 1.442695, %v1595_v20  ;;  %v8721_v49 = vpop.eup %7119 }
 0x47c   : > { %v1924_v8 = vpop.permute.xlu0 %1923  ;;  %10457 = vst [vmem:[#allocation54_spill] sm:$0xff] %v8721_v49  ;;  %6668 = vmatprep.subr.msk.bf16.mxu0 %vm7848_vm1, %v6666_v31 }
 0x47d   : > { %7125 = vpow2.f32 %v1625_v35  ;;  %5993 = vmatprep.mubr.msk.f32.mxu1 %vm1034_vm0, %v1924_v8  ;;  %v5206_v35 = vld [vmem:[%s10404_s6 + $0x120] sm:$0xff]  ;;  %v2175_v26 = vpop.permute.xlu1 %2174 }
 0x47e   : > { %5994 = vmatmul.mubr.msk.f32.gmra.mrb[42].mxu1 %vm1034_vm0, %v1926_v38 }
 0x47f   : > { %v8724_v47 = vpop.eup %7121 }
 0x480   : > { %10458 = vst [vmem:[#allocation55_spill] sm:$0xff] %v8724_v47  ;;  %v1928_v36 = vpop.permute.xlu0 %1927  ;;  %v1683_v39 = vpack.c.bf16 %v8721_v49, %v8724_v47  ;;  %v10502_v47 = vld [vmem:[#allocation23_spill] sm:$0xff] }
 0x481   : > { %5996 = vmatprep.mubr.msk.f32.mxu1 %vm1034_vm0, %v1928_v36 }
 0x482   : > { %5942 = vmatprep.mubr.bf16.mxu0 %v1683_v39  ;;  %5997 = vmatmul.mubr.msk.f32.gmra.mrb[44].mxu1 %vm1034_vm0, %v1930_v62 }
 0x483   : > { %v8731_v24 = vpop.eup %7123 }
 0x484   : > { %v1932_v44 = vpop.permute.xlu0 %1931  ;;  %10459 = vst [vmem:[#allocation56_spill] sm:$0xff] %v8731_v24 }
 0x485   : > { %5999 = vmatprep.mubr.msk.f32.mxu1 %vm1034_vm0, %v1932_v44 }
 0x486   : > { %6000 = vmatmul.mubr.msk.f32.gmra.mrb[46].mxu1 %vm1034_vm0, %v1934_v19 }
 0x487   : > { %v8734_v42 = vpop.eup %7125 }
 0x488   : > { %10460 = vst [vmem:[#allocation57_spill] sm:$0xff] %v8734_v42  ;;  %v1684_v12 = vpack.c.bf16 %v8731_v24, %v8734_v42  ;;  %v10501_v24 = vld [vmem:[#allocation19_spill] sm:$0xff]  ;;  %v2163_v59 = vpop.permute.xlu0 %2162 }
 0x48a   : > { %5943 = vmatmul.mubr.bf16.gmra.mrb[60].mxu0 %v1684_v12 }
 0x48b   : > { %6034 = vmatprep.mubr.msk.f32.mxu0 %vm1034_vm0, %v8267_v17 }
 0x492   : > { %6035 = vmatmul.mubr.msk.f32.vlgmr.msra.gmra.mrb[64].mxu0 %vm1034_vm0, %v8281_v25 }
 0x493   : > { %6037 = vmatprep.mubr.msk.f32.mxu0 %vm1034_vm0, %v8296_v40  ;;  %6671 = vmatpush3.bf16.xpose.msk.msra.mxu0 %vm7848_vm1, %v6666_v31 }
 0x496   : > { %6038 = vmatmul.mubr.msk.f32.gmra.mrb[66].mxu0 %vm1034_vm0, %v8287_v4 }
 0x497   : > { %6040 = vmatprep.mubr.msk.f32.mxu0 %vm1034_vm0, %v10461_v43  ;;  %v5210_v43 = vld [vmem:[%s10404_s6 + $0x140] sm:$0xff] }
 0x49a   : > { %6041 = vmatmul.mubr.msk.f32.gmra.mrb[68].mxu0 %vm1034_vm0, %v10462_v53  ;;  %v5211_v53 = vld [vmem:[%s10404_s6 + $0x148] sm:$0xff] }
 0x49b   : > { %6043 = vmatprep.mubr.msk.f32.mxu0 %vm1034_vm0, %v10463_v22  ;;  %v6690_v22 = vpack.c.bf16 %v5211_v53, %v5210_v43  ;;  %v5216_v43 = vld [vmem:[%s10404_s6 + $0x170] sm:$0xff]  ;;  %v5217_v53 = vld [vmem:[%s10404_s6 + $0x178] sm:$0xff] }
 0x49e   : > { %6044 = vmatmul.mubr.msk.f32.gmra.mrb[70].mxu0 %vm1034_vm0, %v8631_v28 }
 0x49f   : > { %6046 = vmatprep.mubr.msk.f32.mxu0 %vm1034_vm0, %v8690_v32 }
 0x4a2   : > { %6047 = vmatmul.mubr.msk.f32.gmra.mrb[72].mxu0 %vm1034_vm0, %v8692_v37 }
 0x4a3   : > { %6049 = vmatprep.mubr.msk.f32.mxu0 %vm1034_vm0, %v1924_v8  ;;  %v5207_v8 = vld [vmem:[%s10404_s6 + $0x128] sm:$0xff] }
 0x4a6   : > { %6050 = vmatmul.mubr.msk.f32.gmra.mrb[74].mxu0 %vm1034_vm0, %v1926_v38  ;;  %v5205_v38 = vld [vmem:[%s10404_s6 + $0x118] sm:$0xff] }
 0x4a7   : > { %6052 = vmatprep.mubr.msk.f32.mxu0 %vm1034_vm0, %v1928_v36  ;;  %v6672_v20 = vpack.c.bf16 %v5205_v38, %v5204_v33 }
 0x4a9   : > { %6674 = vmatprep.subr.msk.bf16.mxu0 %vm7848_vm1, %v6672_v20 }
 0x4aa   : > { %6053 = vmatmul.mubr.msk.f32.gmra.mrb[76].mxu0 %vm1034_vm0, %v1930_v62  ;;  %v6678_v62 = vpack.c.bf16 %v5207_v8, %v5206_v35  ;;  %v5214_v8 = vld [vmem:[%s10404_s6 + $0x160] sm:$0xff] }
 0x4ab   : > { %6055 = vmatprep.mubr.msk.f32.mxu0 %vm1034_vm0, %v1932_v44  ;;  %6677 = vmatpush3.bf16.xpose.msk.msra.mxu0 %vm7848_vm1, %v6672_v20  ;;  %v5208_v44 = vld [vmem:[%s10404_s6 + $0x130] sm:$0xff] }
 0x4ac   : > { %6680 = vmatprep.subr.msk.bf16.mxu0 %vm7848_vm1, %v6678_v62 }
 0x4ae   : > { %6056 = vmatmul.mubr.msk.f32.gmra.mrb[78].mxu0 %vm1034_vm0, %v1934_v19  ;;  %v5209_v19 = vld [vmem:[%s10404_s6 + $0x138] sm:$0xff] }
 0x4af   : > { %v6684_v12 = vpack.c.bf16 %v5209_v19, %v5208_v44 }
 0x4b3   : > { %6683 = vmatpush3.bf16.xpose.msk.msra.mxu0 %vm7848_vm1, %v6678_v62  ;;  %v5215_v62 = vld [vmem:[%s10404_s6 + $0x168] sm:$0xff] }
 0x4b4   : > { %6686 = vmatprep.subr.msk.bf16.mxu0 %vm7848_vm1, %v6684_v12 }
 0x4bb   : > { %6689 = vmatpush3.bf16.xpose.msk.msra.mxu0 %vm7848_vm1, %v6684_v12 }
 0x4bc   : > { %6692 = vmatprep.subr.msk.bf16.mxu0 %vm7848_vm1, %v6690_v22 }
 0x4c3   : > { %6695 = vmatpush3.bf16.xpose.msk.msra.mxu0 %vm7848_vm1, %v6690_v22 }
 0x4fb   : > { %v5989_v17 = vpop.f32.mrb[38].mxu1 }
 0x4fc   : > { %v2111_v25 = vpop.f32.mrb[39].mxu1  ;;  %2190 = vrot.lane.b32.xlu1 %v5989_v17, %s10313_s29  ;;  %v8765_v4 = vpop.f32.mrb[48].mxu0  ;;  %v5212_v17 = vld [vmem:[%s10404_s6 + $0x150] sm:$0xff]  ;;  %s10556_s29 = smov 305  }
 0x4fd   : > { %10464 = vst [vmem:[#allocation29_spill] sm:$0xff] %v8765_v4  ;;  %2186 = vrot.lane.b32.xlu0 %v2111_v25, %s10317_s23  ;;  %v8768_v40 = vpop.f32.mrb[49].mxu0  ;;  %v5213_v25 = vld [vmem:[%s10404_s6 + $0x158] sm:$0xff]  ;;  %s10366_s23 = smov 32  }
 0x4fe   : > { %10465 = vst [vmem:[#allocation30_spill] sm:$0xff] %v8768_v40  ;;  %v8770_v28 = vpop.f32.mrb[50].mxu0  ;;  %v6696_v45 = vpack.c.bf16 %v5213_v25, %v5212_v17  ;;  %v6708_v17 = vpack.c.bf16 %v5217_v53, %v5216_v43  ;;  %v10492_v53 = vld [vmem:[#allocation22_spill] sm:$0xff] }
 0x4ff   : > { %10466 = vst [vmem:[#allocation36_spill] sm:$0xff] %v8770_v28  ;;  %v8772_v32 = vpop.f32.mrb[51].mxu0  ;;  %v10498_v4 = vld [vmem:[#allocation14_spill] sm:$0xff] }
 0x500   : > { %10467 = vst [vmem:[#allocation58_spill] sm:$0xff] %v8772_v32  ;;  %6698 = vmatprep.subr.msk.bf16.mxu0 %vm7848_vm1, %v6696_v45  ;;  %v10500_v32 = vld [vmem:[#allocation13_spill] sm:$0xff] }
 0x501   : > { %6701 = vmatpush3.bf16.xpose.msk.msra.mxu0 %vm7848_vm1, %v6696_v45  ;;  %v10484_v45 = vld [vmem:[#allocation12_spill] sm:$0xff] }
 0x510   : > { %v8774_v37 = vpop.f32.mrb[52].mxu0 }
 0x511   : > { %10468 = vst [vmem:[#allocation59_spill] sm:$0xff] %v8774_v37  ;;  %v8776_v57 = vpop.f32.mrb[53].mxu0  ;;  %v10494_v37 = vld [vmem:[#allocation25_spill] sm:$0xff] }
 0x512   : > { %10469 = vst [vmem:[#allocation60_spill] sm:$0xff] %v8776_v57  ;;  %v8778_v50 = vpop.f32.mrb[54].mxu0  ;;  %v10496_v57 = vld [vmem:[#allocation7_spill] sm:$0xff] }
 0x513   : > { %10470 = vst [vmem:[#allocation61_spill] sm:$0xff] %v8778_v50  ;;  %v8780_v1 = vpop.f32.mrb[55].mxu0 }
 0x514   : > { %10471 = vst [vmem:[#allocation62_spill] sm:$0xff] %v8780_v1 }
 0x531   : > { %v5992_v36 = vpop.f32.mrb[40].mxu1 }
 0x532   : > { %2198 = vrot.lane.b32.xlu1 %v5992_v36, %s10472_s15  ;;  %v2121_v39 = vpop.f32.mrb[41].mxu1 }
 0x533   : > { %2194 = vrot.lane.b32.xlu0 %v2121_v39, %s10473_s16  ;;  %v6702_v39 = vpack.c.bf16 %v5215_v62, %v5214_v8  ;;  %v10488_v62 = vld [vmem:[#allocation17_spill] sm:$0xff] }
 0x535   : > { %6704 = vmatprep.subr.msk.bf16.mxu0 %vm7848_vm1, %v6702_v39 }
 0x536   : > { %6707 = vmatpush3.bf16.xpose.msk.msra.mxu0 %vm7848_vm1, %v6702_v39 }
 0x537   : > { %6710 = vmatprep.subr.msk.bf16.mxu0 %vm7848_vm1, %v6708_v17 }
 0x53e   : > { %6713 = vmatpush3.bf16.xpose.msk.msra.mxu0 %vm7848_vm1, %v6708_v17 }
 0x54d   : > { %v8840_v3 = vpop.f32.mrb[56].mxu0 }
 0x54e   : > { %10474 = vst [vmem:[#allocation63_spill] sm:$0xff] %v8840_v3  ;;  %v8842_v31 = vpop.f32.mrb[57].mxu0 }
 0x54f   : > { %10475 = vst [vmem:[#allocation64_spill] sm:$0xff] %v8842_v31  ;;  %v8844_v33 = vpop.f32.mrb[58].mxu0  ;;  %v10499_v31 = vld [vmem:[#allocation27_spill] sm:$0xff] }
 0x550   : > { %10476 = vst [vmem:[#allocation65_spill] sm:$0xff] %v8844_v33  ;;  %v8848_v38 = vpop.f32.mrb[59].mxu0  ;;  %v10497_v33 = vld [vmem:[#allocation11_spill] sm:$0xff] }
 0x551   : > { %10477 = vst [vmem:[#allocation66_spill] sm:$0xff] %v8848_v38  ;;  %v5995_v20 = vpop.f32.mrb[42].mxu1 }
 0x552   : > { %2206 = vrot.lane.b32.xlu1 %v5995_v20, %s10478_s20  ;;  %v2131_v35 = vpop.f32.mrb[43].mxu1 }
 0x553   : > { %2202 = vrot.lane.b32.xlu0 %v2131_v35, %s10479_s8  ;;  %v10486_v35 = vld [vmem:[#allocation9_spill] sm:$0xff] }
 0x555   : > { %v5998_v36 = vpop.f32.mrb[44].mxu1 }
 0x556   : > { %2214 = vrot.lane.b32.xlu1 %v5998_v36, %s10364_s9  ;;  %v2141_v44 = vpop.f32.mrb[45].mxu1  ;;  %v10489_v36 = vld [vmem:[#allocation15_spill] sm:$0xff]  ;;  %s10541_s9 = smov 257  }
 0x557   : > { %2210 = vrot.lane.b32.xlu0 %v2141_v44, %s10362_s13  ;;  %v10490_v44 = vld [vmem:[#allocation20_spill] sm:$0xff]  ;;  %s10540_s13 = smov 265  }
 0x559   : > { %v6001_v19 = vpop.f32.mrb[46].mxu1 }
 0x55a   : > { %2222 = vrot.lane.b32.xlu1 %v6001_v19, %s10360_s14  ;;  %v2151_v12 = vpop.f32.mrb[47].mxu1  ;;  %s10545_s14 = smov 32  }
 0x55b   : > { %2218 = vrot.lane.b32.xlu0 %v2151_v12, %s10480_s21  ;;  %v10491_v12 = vld [vmem:[#allocation24_spill] sm:$0xff] }
 0x55d   : > { %v8874_v22 = vpop.f32.mrb[60].mxu0 }
 0x55e   : > { %10481 = vst [vmem:[#allocation67_spill] sm:$0xff] %v8874_v22  ;;  %v8876_v25 = vpop.f32.mrb[61].mxu0  ;;  %2619 = vrot.lane.b32.xlu1 %v10484_v45, %s10483_s19 }
 0x55f   : > { %10482 = vst [vmem:[#allocation68_spill] sm:$0xff] %v8876_v25  ;;  %v8880_v20 = vpop.f32.mrb[62].mxu0  ;;  %2617 = vrot.lane.b32.xlu0 %v10486_v35, %s10483_s19 }
 0x560   : > { %10485 = vst [vmem:[#allocation69_spill] sm:$0xff] %v8880_v20  ;;  %v8886_v8 = vpop.f32.mrb[63].mxu0  ;;  %v10493_v20 = vld [vmem:[#allocation10_spill] sm:$0xff] }
 0x561   : > { %10487 = vst [vmem:[#allocation9_spill] sm:$0xff] %v8886_v8  ;;  %v10495_v8 = vld [vmem:[#allocation8_spill] sm:$0xff] }
 0x562   : > { %2623 = vrot.lane.b32.xlu1 %v10488_v62, %s10483_s19 }
 0x563   : > { %2621 = vrot.lane.b32.xlu0 %v10489_v36, %s10483_s19 }
 0x565   : > { %v8894_v39 = vpop.f32.mrb[64].mxu0 }
 0x566   : > { %2625 = vrot.lane.b32.xlu1 %v10490_v44, %s10483_s19  ;;  %v2370_v19 = vpop.f32.mrb[65].mxu0 }
 0x567   : > { %2629 = vrot.lane.b32.xlu0 %v10491_v12, %s10483_s19  ;;  %v2371_v63 = vadd.f32 %v2370_v19, %v2163_v59  ;;  %v2183_v59 = vpop.permute.xlu1 %2182 }
 0x569   : > { %v6039_v43 = vpop.f32.mrb[66].mxu0  ;;  %v8945_v6 = vadd.f32 %v2371_v63, %v10507_v9 }
 0x56a   : > { %2627 = vrot.lane.b32.xlu1 %v10492_v53, %s10483_s19  ;;  %v2380_v17 = vpop.f32.mrb[67].mxu0 }
 0x56b   : > { %6976 = vrot.lane.b32.xlu0 %v10493_v20, %s10358_s22 }
 0x56d   : > { %v6042_v22 = vpop.f32.mrb[68].mxu0 }
 0x56e   : > { %2631 = vrot.lane.b32.xlu1 %v10494_v37, %s10483_s19  ;;  %v2390_v50 = vpop.f32.mrb[69].mxu0 }
 0x56f   : > { %2886 = vrot.lane.b32.xlu0 %v10495_v8, %s10358_s22 }
 0x571   : > { %v6045_v25 = vpop.f32.mrb[70].mxu0 }
 0x572   : > { %2884 = vrot.lane.b32.xlu1 %v10496_v57, %s10358_s22  ;;  %v2400_v1 = vpop.f32.mrb[71].mxu0 }
 0x573   : > { %2888 = vrot.lane.b32.xlu0 %v10497_v33, %s10358_s22 }
 0x575   : > { %v6048_v3 = vpop.f32.mrb[72].mxu0 }
 0x576   : > { %6981 = vrot.lane.b32.xlu1 %v10498_v4, %s10358_s22  ;;  %v8914_v28 = vpop.f32.mrb[73].mxu0 }
 0x577   : > { %7001 = vrot.lane.b32.xlu0 %v10499_v31, %s10358_s22  ;;  %v2386_v31 = vadd.f32 %v6039_v43, %v2175_v26  ;;  %v2191_v26 = vpop.permute.xlu1 %2190  ;;  %v10511_v43 = vld [vmem:[#allocation35_spill] sm:$0xff] }
 0x579   : > { %v8918_v38 = vpop.f32.mrb[74].mxu0 }
 0x57a   : > { %2890 = vrot.lane.b32.xlu1 %v10500_v32, %s10358_s22  ;;  %v8922_v40 = vpop.f32.mrb[75].mxu0 }
 0x57d   : > { %v8924_v42 = vpop.f32.mrb[76].mxu0 }
 0x57e   : > { %6986 = vrot.lane.b32.xlu1 %v10501_v24, %s10358_s22  ;;  %v8928_v18 = vpop.f32.mrb[77].mxu0 }
 0x581   : > { %v8930_v21 = vpop.f32.mrb[78].mxu0 }
 0x582   : > { %6991 = vrot.lane.b32.xlu1 %v10502_v47, %s10358_s22  ;;  %v8934_v49 = vpop.f32.mrb[79].mxu0  ;;  %v2171_v47 = vpop.permute.xlu0 %2170 }
 0x586   : > { %6996 = vrot.lane.b32.xlu1 %v10503_v41, %s10358_s22  ;;  %v10508_v41 = vld [vmem:[#allocation21_spill] sm:$0xff]  ;;  %v2179_v19 = vpop.permute.xlu0 %2178 }
 0x587   : > { %v2391_v63 = vadd.f32 %v2390_v50, %v2179_v19 }
 0x589   : > { %v8959_v9 = vadd.f32 %v2391_v63, %v10511_v43  ;;  %v10514_v63 = vld [vmem:[#allocation31_spill] sm:$0xff] }
 0x58a   : > { %2892 = vrot.lane.b32.xlu1 %v10504_v0, %s10358_s22  ;;  %v10509_v0 = vld [vmem:[#allocation33_spill] sm:$0xff] }
 0x58b   : > { %v8951_v32 = vadd.f32 %v2386_v31, %v10509_v0  ;;  %v2187_v31 = vpop.permute.xlu0 %2186 }
 0x58e   : > { %2894 = vrot.lane.b32.xlu1 %v10505_v2, %s10358_s22  ;;  %v2381_v2 = vadd.f32 %v2380_v17, %v2171_v47  ;;  %v2401_v17 = vadd.f32 %v2400_v1, %v2187_v31  ;;  %v2396_v1 = vadd.f32 %v6042_v22, %v2183_v59 }
 0x592   : > { %7006 = vrot.lane.b32.xlu1 %v10506_v27, %s10358_s22  ;;  %v10510_v27 = vld [vmem:[#allocation34_spill] sm:$0xff] }
 0x593   : > { %v8955_v24 = vadd.f32 %v2381_v2, %v10510_v27  ;;  %v8967_v2 = vadd.f32 %v2401_v17, %v8488_v60 }
 0x596   : > { %2896 = vrot.lane.b32.xlu1 %v10508_v41, %s10358_s22  ;;  %2465 = vmax.xlane.f32.xlu0 %v8945_v6  ;;  %v2406_v41 = vadd.f32 %v6045_v25, %v2191_v26  ;;  %v2376_v25 = vadd.f32 %v8894_v39, %v2167_v30  ;;  %v10515_v26 = vld [vmem:[#allocation37_spill] sm:$0xff] }
 0x597   : > { %v8980_v31 = vadd.f32 %v2396_v1, %v10515_v26 }
 0x598   : > { %v8963_v47 = vadd.f32 %v2406_v41, %v8477_v11  ;;  %v8976_v41 = vadd.f32 %v2376_v25, %v10514_v63 }
 0x59a   : > { %2471 = vmax.xlane.f32.xlu0 %v8951_v32  ;;  %10512 = vst [vmem:[#allocation17_spill] sm:$0xff] %v8963_v47 }
 0x59e   : > { %2469 = vmax.xlane.f32.xlu0 %v8955_v24 }
 0x5a2   : > { %2473 = vmax.xlane.f32.xlu0 %v8959_v9 }
 0x5a4   : > { %v2199_v0 = vpop.permute.xlu1 %2198 }
 0x5a5   : > { %v2416_v50 = vadd.f32 %v6048_v3, %v2199_v0  ;;  %v2195_v0 = vpop.permute.xlu0 %2194 }
 0x5a6   : > { %2479 = vmax.xlane.f32.xlu0 %v8963_v47 }
 0x5a7   : > { %v8971_v19 = vadd.f32 %v2416_v50, %v8497_v61 }
 0x5a9   : > { %10513 = vst [vmem:[#allocation15_spill] sm:$0xff] %v8971_v19 }
 0x5aa   : > { %2477 = vmax.xlane.f32.xlu0 %v8967_v2 }
 0x5ae   : > { %2483 = vmax.xlane.f32.xlu0 %v8971_v19 }
 0x5ba   : > { %2467 = vmax.xlane.f32.xlu1 %v8976_v41 }
 0x5be   : > { %2475 = vmax.xlane.f32.xlu1 %v8980_v31 }
 0x5c4   : > { %v2207_v3 = vpop.permute.xlu1 %2206  ;;  %2902 = vrot.lane.b32.xlu0 %v8113_v55, %s10358_s22 }
 0x5c5   : > { %v2203_v17 = vpop.permute.xlu0 %2202  ;;  %v2426_v26 = vadd.f32 %v8918_v38, %v2207_v3 }
 0x5c6   : > { %v2421_v47 = vadd.f32 %v8922_v40, %v2203_v17 }
 0x5c7   : > { %v8989_v19 = vadd.f32 %v2426_v26, %v8524_v48 }
 0x5c8   : > { %v2215_v50 = vpop.permute.xlu1 %2214  ;;  %v9002_v38 = vadd.f32 %v2421_v47, %v8534_v58 }
 0x5c9   : > { %v2211_v61 = vpop.permute.xlu0 %2210  ;;  %v2436_v26 = vadd.f32 %v8924_v42, %v2215_v50 }
 0x5ca   : > { %v2431_v47 = vadd.f32 %v8928_v18, %v2211_v61 }
 0x5cb   : > { %v9013_v40 = vadd.f32 %v2436_v26, %v8545_v52 }
 0x5cc   : > { %v2223_v30 = vpop.permute.xlu1 %2222  ;;  %v9023_v50 = vadd.f32 %v2431_v47, %v8558_v56 }
 0x5cd   : > { %v2219_v39 = vpop.permute.xlu0 %2218 }
 0x5ce   : > { %v2441_v18 = vadd.f32 %v8934_v49, %v2219_v39 }
 0x5cf   : > { %2898 = vrot.lane.b32.xlu1 %v8087_v54, %s10358_s22 }
 0x5d0   : > { %v2620_v22 = vpop.permute.xlu1 %2619 }
 0x5d1   : > { %v2618_v59 = vpop.permute.xlu0 %2617 }
 0x5d2   : > { %6058 = vmatprep.subr.bf16.mxu1 %v2618_v59 }
 0x5d3   : > { %6059 = vmatpush3.bf16.msra.mxu1 %v2618_v59 }
 0x5d4   : > { %v2624_v25 = vpop.permute.xlu1 %2623  ;;  %6060 = vmatprep.subr.bf16.mxu1 %v2620_v22 }
 0x5d5   : > { %v2622_v1 = vpop.permute.xlu0 %2621 }
 0x5d7   : > { %6061 = vmatpush3.bf16.msra.mxu1 %v2620_v22 }
 0x5d8   : > { %v2626_v60 = vpop.permute.xlu1 %2625  ;;  %6062 = vmatprep.subr.bf16.mxu1 %v2622_v1 }
 0x5d9   : > { %v2630_v11 = vpop.permute.xlu0 %2629 }
 0x5db   : > { %6063 = vmatpush3.bf16.msra.mxu1 %v2622_v1 }
 0x5dc   : > { %v2628_v43 = vpop.permute.xlu1 %2627  ;;  %6064 = vmatprep.subr.bf16.mxu1 %v2624_v25 }
 0x5dd   : > { %v6977_v27 = vpop.permute.xlu0 %6976 }
 0x5de   : > { %v6979_v3 = vunpack.i.h.bf16 %v6977_v27  ;;  %v6978_v17 = vunpack.i.l.bf16 %v6977_v27 }
 0x5df   : > { %6065 = vmatpush3.bf16.msra.mxu1 %v2624_v25  ;;  %v2446_v25 = vadd.f32 %v8930_v21, %v2223_v30 }
 0x5e0   : > { %v2632_v63 = vpop.permute.xlu1 %2631  ;;  %6066 = vmatprep.subr.bf16.mxu1 %v2626_v60  ;;  %v9026_v26 = vpack.c.bf16 %v6979_v3, %v6978_v17 }
 0x5e1   : > { %v8991_v59 = vpop.permute.xlu0 %2886  ;;  %v9038_v27 = vadd.f32 %v2446_v25, %v8571_v10 }
 0x5e3   : > { %6067 = vmatpush3.bf16.msra.mxu1 %v2626_v60  ;;  %2487 = vmax.xlane.f32.xlu0 %v8989_v19 }
 0x5e4   : > { %v8995_v22 = vpop.permute.xlu1 %2884  ;;  %6068 = vmatprep.subr.bf16.mxu1 %v2628_v43 }
 0x5e5   : > { %v8997_v1 = vpop.permute.xlu0 %2888  ;;  %6122 = vmatprep.mubr.msk.f32.mxu0 %vm1034_vm0, %v8995_v22 }
 0x5e6   : > { %6123 = vmatmul.mubr.msk.f32.vlgmr.msra.gmra.mrb[80].mxu0 %vm1034_vm0, %v8991_v59 }
 0x5e7   : > { %6069 = vmatpush3.bf16.msra.mxu1 %v2628_v43  ;;  %6125 = vmatprep.mubr.msk.f32.mxu0 %vm1034_vm0, %v8997_v1  ;;  %v2411_v43 = vadd.f32 %v8914_v28, %v2195_v0  ;;  %v9046_v28 = vadd.f32 %v2441_v18, %v8584_v51 }
 0x5e8   : > { %2485 = vmax.xlane.f32.xlu0 %v9002_v38  ;;  %v9010_v60 = vpop.permute.xlu1 %6981  ;;  %6070 = vmatprep.subr.bf16.mxu1 %v2630_v11 }
 0x5e9   : > { %v9035_v61 = vadd.f32 %v2411_v43, %v8513_v14  ;;  %v9095_v47 = vpop.permute.xlu0 %7001  ;;  %v10516_v43 = vld [vmem:[#allocation19_spill] sm:$0xff] }
 0x5eb   : > { %6071 = vmatpush3.bf16.msra.mxu1 %v2630_v11 }
 0x5ec   : > { %2491 = vmax.xlane.f32.xlu0 %v9013_v40  ;;  %v9017_v42 = vpop.permute.xlu1 %2890  ;;  %6072 = vmatprep.subr.bf16.mxu1 %v2632_v63 }
 0x5ed   : > { %6126 = vmatmul.mubr.msk.f32.gmra.mrb[82].mxu0 %vm1034_vm0, %v9017_v42 }
 0x5ef   : > { %6073 = vmatpush3.bf16.msra.mxu1 %v2632_v63 }
 0x5f0   : > { %2489 = vmax.xlane.f32.xlu0 %v9023_v50  ;;  %v9029_v11 = vpop.permute.xlu1 %6986  ;;  %6716 = vmatprep.subr.msk.bf16.mxu1 %vm7848_vm1, %v9026_v26 }
 0x5f3   : > { %2481 = vmax.xlane.f32.xlu1 %v9035_v61 }
 0x5f4   : > { %2495 = vmax.xlane.f32.xlu0 %v9038_v27  ;;  %v9043_v21 = vpop.permute.xlu1 %6991 }
 0x5f8   : > { %2493 = vmax.xlane.f32.xlu0 %v9046_v28  ;;  %v9049_v63 = vpop.permute.xlu1 %6996 }
 0x5fc   : > { %v9051_v0 = vpop.permute.xlu1 %2892 }
 0x5fd   : > { %6128 = vmatprep.mubr.msk.f32.mxu0 %vm1034_vm0, %v9051_v0 }
 0x600   : > { %v9055_v30 = vpop.permute.xlu1 %2894 }
 0x601   : > { %6129 = vmatmul.mubr.msk.f32.gmra.mrb[84].mxu0 %vm1034_vm0, %v9055_v30 }
 0x604   : > { %v9059_v49 = vpop.permute.xlu1 %7006  ;;  %2900 = vrot.lane.b32.xlu1 %v8099_v13, %s10358_s22 }
 0x608   : > { %v9063_v39 = vpop.permute.xlu1 %2896  ;;  %7011 = vrot.lane.b32.xlu1 %v8171_v34, %s10358_s22 }
 0x609   : > { %6131 = vmatprep.mubr.msk.f32.mxu0 %vm1034_vm0, %v9063_v39 }
 0x60c   : > { %2906 = vrot.lane.b32.xlu1 %v8131_v23, %s10358_s22 }
 0x60e   : > { %2904 = vrot.lane.b32.xlu0 %v8123_v5, %s10358_s22 }
 0x610   : > { %2910 = vrot.lane.b32.xlu1 %v8147_v15, %s10358_s22 }
 0x612   : > { %2908 = vrot.lane.b32.xlu0 %v8139_v7, %s10358_s22 }
 0x614   : > { %2914 = vrot.lane.b32.xlu1 %v8161_v29, %s10358_s22 }
 0x616   : > { %2912 = vrot.lane.b32.xlu0 %v8153_v16, %s10358_s22 }
 0x618   : > { %3600 = vrot.lane.b32.xlu1 %v10484_v45, %s10358_s22 }
 0x61a   : > { %3598 = vrot.lane.b32.xlu0 %v10486_v35, %s10358_s22 }
 0x61c   : > { %3604 = vrot.lane.b32.xlu1 %v10488_v62, %s10358_s22 }
 0x61e   : > { %3602 = vrot.lane.b32.xlu0 %v10489_v36, %s10358_s22 }
 0x620   : > { %3606 = vrot.lane.b32.xlu1 %v10490_v44, %s10358_s22 }
 0x622   : > { %3610 = vrot.lane.b32.xlu0 %v10491_v12, %s10358_s22 }
 0x623   : > { %v2466_v3 = vpop.xlane.xlu0 %2465 }
 0x624   : > { %3608 = vrot.lane.b32.xlu1 %v10492_v53, %s10358_s22  ;;  %v2497_v18 = vsub.f32 %v8945_v6, %v2466_v3 }
 0x626   : > { %7016 = vrot.lane.b32.xlu0 %v10493_v20, %s10366_s23  ;;  %v10517_v20 = vld [vmem:[#allocation13_spill] sm:$0xff] }
 0x627   : > { %v2472_v17 = vpop.xlane.xlu0 %2471 }
 0x628   : > { %3612 = vrot.lane.b32.xlu1 %v10494_v37, %s10358_s22  ;;  %s10555_s22 = smov 313  }
 0x62a   : > { %3867 = vrot.lane.b32.xlu0 %v10495_v8, %s10366_s23  ;;  %v10518_v8 = vld [vmem:[#allocation16_spill] sm:$0xff] }
 0x62b   : > { %v2470_v25 = vpop.xlane.xlu0 %2469 }
 0x62c   : > { %3865 = vrot.lane.b32.xlu1 %v10496_v57, %s10366_s23 }
 0x62e   : > { %3869 = vrot.lane.b32.xlu0 %v10497_v33, %s10366_s23  ;;  %v10519_v33 = vld [vmem:[#allocation18_spill] sm:$0xff] }
 0x62f   : > { %v2474_v57 = vpop.xlane.xlu0 %2473 }
 0x630   : > { %7021 = vrot.lane.b32.xlu1 %v10498_v4, %s10366_s23  ;;  %v10520_v4 = vld [vmem:[#allocation21_spill] sm:$0xff] }
 0x632   : > { %7026 = vrot.lane.b32.xlu0 %v10516_v43, %s10366_s23 }
 0x633   : > { %v2480_v43 = vpop.xlane.xlu0 %2479 }
 0x634   : > { %3871 = vrot.lane.b32.xlu1 %v10517_v20, %s10366_s23  ;;  %v2499_v20 = vsub.f32 %v8955_v24, %v2470_v25 }
 0x636   : > { %3879 = vrot.lane.b32.xlu0 %v8087_v54, %s10366_s23  ;;  %v2500_v54 = vsub.f32 %v8951_v32, %v2472_v17  ;;  %v2517_v37 = vmul.f32 1.442695, %v2499_v20  ;;  %v10522_v17 = vld [vmem:[#allocation17_spill] sm:$0xff] }
 0x637   : > { %v2478_v44 = vpop.xlane.xlu0 %2477 }
 0x638   : > { %3873 = vrot.lane.b32.xlu1 %v10518_v8, %s10366_s23  ;;  %v2513_v8 = vmul.f32 1.442695, %v2497_v18  ;;  %v2519_v6 = vmul.f32 1.442695, %v2500_v54  ;;  %v6983_v18 = vunpack.i.l.bf16 %v9010_v60 }
 0x63a   : > { %3885 = vrot.lane.b32.xlu0 %v8123_v5, %s10366_s23  ;;  %v2501_v5 = vsub.f32 %v8959_v9, %v2474_v57  ;;  %7127 = vpow2.f32 %v2513_v8  ;;  %v10521_v9 = vld [vmem:[#allocation23_spill] sm:$0xff] }
 0x63b   : > { %7129 = vpow2.f32 %v2517_v37 }
 0x63c   : > { %3875 = vrot.lane.b32.xlu1 %v10519_v33, %s10366_s23  ;;  %v2521_v24 = vmul.f32 1.442695, %v2501_v5 }
 0x640   : > { %3877 = vrot.lane.b32.xlu1 %v10520_v4, %s10366_s23  ;;  %v6984_v4 = vunpack.i.h.bf16 %v9010_v60 }
 0x642   : > { %v6720_v8 = vpack.c.bf16 %v6984_v4, %v6983_v18  ;;  %v7003_v4 = vunpack.i.l.bf16 %v9095_v47 }
 0x644   : > { %3881 = vrot.lane.b32.xlu1 %v8099_v13, %s10366_s23  ;;  %v2503_v13 = vsub.f32 %v8967_v2, %v2478_v44  ;;  %v9143_v44 = vpop.eup %7127 }
 0x645   : > { %10523 = vst [vmem:[#allocation22_spill] sm:$0xff] %v9143_v44  ;;  %v9147_v2 = vpop.eup %7129 }
 0x646   : > { %10524 = vst [vmem:[#allocation10_spill] sm:$0xff] %v9147_v2 }
 0x647   : > { %v2468_v12 = vpop.xlane.xlu1 %2467 }
 0x648   : > { %v2498_v33 = vsub.f32 %v8976_v41, %v2468_v12  ;;  %3883 = vrot.lane.b32.xlu1 %v8113_v55, %s10366_s23  ;;  %v2504_v12 = vsub.f32 %v10522_v17, %v2480_v43  ;;  %v2525_v55 = vmul.f32 1.442695, %v2503_v13  ;;  %v6999_v17 = vunpack.i.h.bf16 %v9049_v63 }
 0x64a   : > { %v2515_v3 = vmul.f32 1.442695, %v2498_v33  ;;  %v2527_v37 = vmul.f32 1.442695, %v2504_v12  ;;  %v6989_v33 = vunpack.i.h.bf16 %v9029_v11  ;;  %v6998_v12 = vunpack.i.l.bf16 %v9049_v63 }
 0x64b   : > { %v2476_v25 = vpop.xlane.xlu1 %2475 }
 0x64c   : > { %7131 = vpow2.f32 %v2515_v3  ;;  %v2502_v32 = vsub.f32 %v8980_v31, %v2476_v25  ;;  %7031 = vrot.lane.b32.xlu1 %v10521_v9, %s10366_s23  ;;  %v6993_v25 = vunpack.i.l.bf16 %v9043_v21 }
 0x64d   : > { %7133 = vpow2.f32 %v2519_v6  ;;  %v6988_v6 = vunpack.i.l.bf16 %v9029_v11 }
 0x64e   : > { %v2523_v41 = vmul.f32 1.442695, %v2502_v32  ;;  %7135 = vpow2.f32 %v2521_v24  ;;  %v2484_v32 = vpop.xlane.xlu0 %2483 }
 0x64f   : > { %v9137_v57 = vpop.permute.xlu1 %2898  ;;  %v6726_v13 = vpack.c.bf16 %v6989_v33, %v6988_v6  ;;  %v7009_v33 = vunpack.i.h.bf16 %v9059_v49  ;;  %v7008_v6 = vunpack.i.l.bf16 %v9059_v49 }
 0x650   : > { %7137 = vpow2.f32 %v2523_v41  ;;  %6132 = vmatmul.mubr.msk.f32.gmra.mrb[86].mxu0 %vm1034_vm0, %v9137_v57  ;;  %3887 = vrot.lane.b32.xlu1 %v8131_v23, %s10366_s23 }
 0x651   : > { %7139 = vpow2.f32 %v2525_v55  ;;  %v6738_v55 = vpack.c.bf16 %v6999_v17, %v6998_v12  ;;  %v6750_v17 = vpack.c.bf16 %v7009_v33, %v7008_v6  ;;  %v5283_v33 = vld [vmem:[%s10404_s6 + $0x188] sm:$0xff] }
 0x652   : > { %7141 = vpow2.f32 %v2527_v37  ;;  %v9186_v11 = vpop.permute.xlu0 %2902  ;;  %v7004_v37 = vunpack.i.h.bf16 %v9095_v47 }
 0x654   : > { %3889 = vrot.lane.b32.xlu1 %v8139_v7, %s10366_s23 }
 0x656   : > { %v9149_v31 = vpop.eup %7131 }
 0x657   : > { %10525 = vst [vmem:[#allocation8_spill] sm:$0xff] %v9149_v31  ;;  %v9153_v43 = vpop.eup %7133  ;;  %v2593_v23 = vpack.c.bf16 %v9149_v31, %v9143_v44 }
 0x658   : > { %10526 = vst [vmem:[#allocation7_spill] sm:$0xff] %v9153_v43  ;;  %v2594_v20 = vpack.c.bf16 %v9153_v43, %v9147_v2  ;;  %v9159_v54 = vpop.eup %7135 }
 0x659   : > { %10527 = vst [vmem:[#allocation11_spill] sm:$0xff] %v9159_v54  ;;  %6074 = vmatprep.mubr.bf16.mxu1 %v2593_v23  ;;  %v6744_v23 = vpack.c.bf16 %v7004_v37, %v7003_v4 }
 0x65a   : > { %v9161_v7 = vpop.eup %7137  ;;  %6075 = vmatmul.mubr.bf16.vlgmr.msra.gmra.mrb[48].mxu1 %v2594_v20  ;;  %v10531_v20 = vld [vmem:[#allocation15_spill] sm:$0xff] }
 0x65b   : > { %10528 = vst [vmem:[#allocation14_spill] sm:$0xff] %v9161_v7  ;;  %6719 = vmatpush3.bf16.xpose.msk.msra.mxu1 %vm7848_vm1, %v9026_v26  ;;  %v2595_v60 = vpack.c.bf16 %v9161_v7, %v9159_v54  ;;  %v9170_v5 = vpop.eup %7139  ;;  %v6994_v26 = vunpack.i.h.bf16 %v9043_v21  ;;  %v10579_v7 = vld [vmem:[#allocation31_spill] sm:$0xff] }
 0x65c   : > { %6722 = vmatprep.subr.msk.bf16.mxu1 %vm7848_vm1, %v6720_v8  ;;  %10529 = vst [vmem:[#allocation19_spill] sm:$0xff] %v9170_v5  ;;  %v9174_v3 = vpop.eup %7141 }
 0x65d   : > { %6078 = vmatprep.mubr.bf16.mxu1 %v2595_v60  ;;  %10530 = vst [vmem:[#allocation13_spill] sm:$0xff] %v9174_v3  ;;  %v2596_v24 = vpack.c.bf16 %v9174_v3, %v9170_v5  ;;  %v6732_v9 = vpack.c.bf16 %v6994_v26, %v6993_v25 }
 0x662   : > { %6079 = vmatmul.mubr.bf16.gmra.mrb[52].mxu1 %v2596_v24 }
 0x663   : > { %6725 = vmatpush3.bf16.xpose.msk.msra.mxu1 %vm7848_vm1, %v6720_v8  ;;  %v2506_v8 = vsub.f32 %v10531_v20, %v2484_v32 }
 0x664   : > { %6728 = vmatprep.subr.msk.bf16.mxu1 %vm7848_vm1, %v6726_v13 }
 0x665   : > { %v2531_v47 = vmul.f32 1.442695, %v2506_v8 }
 0x667   : > { %7143 = vpow2.f32 %v2531_v47 }
 0x66b   : > { %6731 = vmatpush3.bf16.xpose.msk.msra.mxu1 %vm7848_vm1, %v6726_v13 }
 0x66c   : > { %6734 = vmatprep.subr.msk.bf16.mxu1 %vm7848_vm1, %v6732_v9 }
 0x670   : > { %v2488_v41 = vpop.xlane.xlu0 %2487 }
 0x671   : > { %v2508_v13 = vsub.f32 %v8989_v19, %v2488_v41 }
 0x673   : > { %6737 = vmatpush3.bf16.xpose.msk.msra.mxu1 %vm7848_vm1, %v6732_v9 }
 0x674   : > { %6740 = vmatprep.subr.msk.bf16.mxu1 %vm7848_vm1, %v6738_v55 }
 0x675   : > { %v2486_v21 = vpop.xlane.xlu0 %2485 }
 0x676   : > { %v2507_v63 = vsub.f32 %v9002_v38, %v2486_v21 }
 0x678   : > { %v2533_v26 = vmul.f32 1.442695, %v2507_v63  ;;  %v9230_v63 = vpop.eup %7143 }
 0x679   : > { %v2492_v18 = vpop.xlane.xlu0 %2491  ;;  %10532 = vst [vmem:[#allocation16_spill] sm:$0xff] %v9230_v63 }
 0x67a   : > { %v2510_v25 = vsub.f32 %v9013_v40, %v2492_v18  ;;  %7145 = vpow2.f32 %v2533_v26 }
 0x67b   : > { %6743 = vmatpush3.bf16.xpose.msk.msra.mxu1 %vm7848_vm1, %v6738_v55  ;;  %v2535_v55 = vmul.f32 1.442695, %v2508_v13 }
 0x67c   : > { %6746 = vmatprep.subr.msk.bf16.mxu1 %vm7848_vm1, %v6744_v23 }
 0x67d   : > { %v2490_v60 = vpop.xlane.xlu0 %2489 }
 0x67e   : > { %v2509_v24 = vsub.f32 %v9023_v50, %v2490_v60  ;;  %v2539_v50 = vmul.f32 1.442695, %v2510_v25  ;;  %v5282_v60 = vld [vmem:[%s10404_s6 + $0x180] sm:$0xff] }
 0x67f   : > { %v6762_v25 = vpack.c.bf16 %v5283_v33, %v5282_v60  ;;  %v5286_v33 = vld [vmem:[%s10404_s6 + $0x1a0] sm:$0xff] }
 0x680   : > { %v2482_v32 = vpop.xlane.xlu1 %2481  ;;  %v2537_v12 = vmul.f32 1.442695, %v2509_v24 }
 0x681   : > { %v2505_v9 = vsub.f32 %v9035_v61, %v2482_v32  ;;  %v2496_v38 = vpop.xlane.xlu0 %2495 }
 0x682   : > { %v2512_v49 = vsub.f32 %v9038_v27, %v2496_v38 }
 0x683   : > { %v2529_v21 = vmul.f32 1.442695, %v2505_v9  ;;  %6749 = vmatpush3.bf16.xpose.msk.msra.mxu1 %vm7848_vm1, %v6744_v23 }
 0x684   : > { %6752 = vmatprep.subr.msk.bf16.mxu1 %vm7848_vm1, %v6750_v17  ;;  %v9214_v19 = vpop.permute.xlu1 %2900  ;;  %v2543_v20 = vmul.f32 1.442695, %v2512_v49  ;;  %v9244_v6 = vpop.eup %7145 }
 0x685   : > { %7147 = vpow2.f32 %v2529_v21  ;;  %v2494_v40 = vpop.xlane.xlu0 %2493  ;;  %6134 = vmatprep.mubr.msk.f32.mxu0 %vm1034_vm0, %v9214_v19  ;;  %10533 = vst [vmem:[#allocation18_spill] sm:$0xff] %v9244_v6 }
 0x686   : > { %7149 = vpow2.f32 %v2537_v12  ;;  %v2511_v61 = vsub.f32 %v9046_v28, %v2494_v40  ;;  %6135 = vmatmul.mubr.msk.f32.gmra.mrb[88].mxu0 %vm1034_vm0, %v9186_v11 }
 0x687   : > { %7151 = vpow2.f32 %v2535_v55 }
 0x688   : > { %7153 = vpow2.f32 %v2539_v50  ;;  %v7012_v41 = vpop.permute.xlu1 %7011  ;;  %v2541_v37 = vmul.f32 1.442695, %v2511_v61 }
 0x689   : > { %v7014_v4 = vunpack.i.h.bf16 %v7012_v41  ;;  %v7013_v18 = vunpack.i.l.bf16 %v7012_v41  ;;  %v9222_v23 = vpop.permute.xlu0 %2904 }
 0x68a   : > { %6137 = vmatprep.mubr.msk.f32.mxu0 %vm1034_vm0, %v9222_v23  ;;  %7155 = vpow2.f32 %v2541_v37 }
 0x68b   : > { %v6756_v8 = vpack.c.bf16 %v7014_v4, %v7013_v18  ;;  %6755 = vmatpush3.bf16.xpose.msk.msra.mxu1 %vm7848_vm1, %v6750_v17  ;;  %7157 = vpow2.f32 %v2543_v20  ;;  %v5284_v4 = vld [vmem:[%s10404_s6 + $0x190] sm:$0xff]  ;;  %v5285_v18 = vld [vmem:[%s10404_s6 + $0x198] sm:$0xff] }
 0x68c   : > { %v9228_v28 = vpop.permute.xlu1 %2906 }
 0x68d   : > { %v9232_v27 = vpop.permute.xlu0 %2908  ;;  %6138 = vmatmul.mubr.msk.f32.gmra.mrb[90].mxu0 %vm1034_vm0, %v9228_v28  ;;  %6758 = vmatprep.subr.msk.bf16.mxu1 %vm7848_vm1, %v6756_v8 }
 0x68e   : > { %6140 = vmatprep.mubr.msk.f32.mxu0 %vm1034_vm0, %v9232_v27 }
 0x68f   : > { %v9248_v24 = vpop.eup %7147 }
 0x690   : > { %10534 = vst [vmem:[#allocation21_spill] sm:$0xff] %v9248_v24  ;;  %v9250_v47 = vpop.eup %7149  ;;  %v9252_v13 = vpop.permute.xlu1 %2910  ;;  %v2597_v26 = vpack.c.bf16 %v9230_v63, %v9248_v24 }
 0x691   : > { %10535 = vst [vmem:[#allocation23_spill] sm:$0xff] %v9250_v47  ;;  %v9256_v32 = vpop.eup %7151  ;;  %v9258_v9 = vpop.permute.xlu0 %2912  ;;  %6141 = vmatmul.mubr.msk.f32.gmra.mrb[92].mxu0 %vm1034_vm0, %v9252_v13 }
 0x692   : > { %10536 = vst [vmem:[#allocation17_spill] sm:$0xff] %v9256_v32  ;;  %v9262_v38 = vpop.eup %7153  ;;  %6082 = vmatprep.mubr.bf16.mxu1 %v2597_v26  ;;  %6143 = vmatprep.mubr.msk.f32.mxu0 %vm1034_vm0, %v9258_v9  ;;  %v2598_v17 = vpack.c.bf16 %v9256_v32, %v9244_v6  ;;  %v10580_v32 = vld [vmem:[#allocation33_spill] sm:$0xff] }
 0x693   : > { %10537 = vst [vmem:[#allocation15_spill] sm:$0xff] %v9262_v38  ;;  %6761 = vmatpush3.bf16.xpose.msk.msra.mxu1 %vm7848_vm1, %v6756_v8  ;;  %v2599_v12 = vpack.c.bf16 %v9262_v38, %v9250_v47  ;;  %v6768_v8 = vpack.c.bf16 %v5285_v18, %v5284_v4  ;;  %v5295_v4 = vld [vmem:[%s10404_s6 + $0x1e8] sm:$0xff] }
 0x694   : > { %6083 = vmatmul.mubr.bf16.gmra.mrb[56].mxu1 %v2598_v17  ;;  %v9272_v55 = vpop.permute.xlu1 %2914  ;;  %6764 = vmatprep.subr.msk.bf16.mxu1 %vm7848_vm1, %v6762_v25  ;;  %v9278_v50 = vpop.eup %7155 }
 0x695   : > { %6086 = vmatprep.mubr.bf16.mxu1 %v2599_v12  ;;  %v3599_v21 = vpop.permute.xlu0 %3598  ;;  %6144 = vmatmul.mubr.msk.f32.gmra.mrb[94].mxu0 %vm1034_vm0, %v9272_v55  ;;  %10538 = vst [vmem:[#allocation70_spill] sm:$0xff] %v9278_v50  ;;  %v9280_v61 = vpop.eup %7157 }
 0x696   : > { %6202 = vmatprep.subr.bf16.mxu0 %v3599_v21  ;;  %10539 = vst [vmem:[#allocation71_spill] sm:$0xff] %v9280_v61  ;;  %v2600_v49 = vpack.c.bf16 %v9280_v61, %v9278_v50 }
 0x697   : > { %6203 = vmatpush3.bf16.msra.mxu0 %v3599_v21 }
 0x698   : > { %v3601_v40 = vpop.permute.xlu1 %3600 }
 0x699   : > { %6204 = vmatprep.subr.bf16.mxu0 %v3601_v40  ;;  %v3603_v41 = vpop.permute.xlu0 %3602 }
 0x69b   : > { %6205 = vmatpush3.bf16.msra.mxu0 %v3601_v40 }
 0x69c   : > { %6087 = vmatmul.mubr.bf16.gmra.mrb[60].mxu1 %v2600_v49  ;;  %6206 = vmatprep.subr.bf16.mxu0 %v3603_v41  ;;  %v3605_v37 = vpop.permute.xlu1 %3604 }
 0x69d   : > { %6178 = vmatprep.mubr.msk.f32.mxu1 %vm1034_vm0, %v8995_v22  ;;  %v3611_v60 = vpop.permute.xlu0 %3610 }
 0x69f   : > { %6207 = vmatpush3.bf16.msra.mxu0 %v3603_v41 }
 0x6a0   : > { %6208 = vmatprep.subr.bf16.mxu0 %v3605_v37  ;;  %v3607_v20 = vpop.permute.xlu1 %3606 }
 0x6a1   : > { %v7017_v26 = vpop.permute.xlu0 %7016 }
 0x6a2   : > { %v7018_v17 = vunpack.i.l.bf16 %v7017_v26 }
 0x6a3   : > { %6209 = vmatpush3.bf16.msra.mxu0 %v3605_v37 }
 0x6a4   : > { %6179 = vmatmul.mubr.msk.f32.vlgmr.msra.gmra.mrb[64].mxu1 %vm1034_vm0, %v8991_v59  ;;  %6210 = vmatprep.subr.bf16.mxu0 %v3607_v20  ;;  %v3609_v22 = vpop.permute.xlu1 %3608  ;;  %v5287_v59 = vld [vmem:[%s10404_s6 + $0x1a8] sm:$0xff] }
 0x6a5   : > { %6767 = vmatpush3.bf16.xpose.msk.msra.mxu1 %vm7848_vm1, %v6762_v25  ;;  %6181 = vmatprep.mubr.msk.f32.mxu1 %vm1034_vm0, %v8997_v1  ;;  %v6774_v1 = vpack.c.bf16 %v5287_v59, %v5286_v33  ;;  %v7019_v25 = vunpack.i.h.bf16 %v7017_v26  ;;  %v9417_v26 = vpop.permute.xlu0 %3867 }
 0x6a6   : > { %6770 = vmatprep.subr.msk.bf16.mxu1 %vm7848_vm1, %v6768_v8 }
 0x6a7   : > { %6211 = vmatpush3.bf16.msra.mxu0 %v3607_v20 }
 0x6a8   : > { %6182 = vmatmul.mubr.msk.f32.gmra.mrb[66].mxu1 %vm1034_vm0, %v9017_v42  ;;  %6212 = vmatprep.subr.bf16.mxu0 %v3609_v22  ;;  %v3613_v42 = vpop.permute.xlu1 %3612 }
 0x6a9   : > { %6184 = vmatprep.mubr.msk.f32.mxu1 %vm1034_vm0, %v9051_v0  ;;  %v5288_v0 = vld [vmem:[%s10404_s6 + $0x1b0] sm:$0xff] }
 0x6ab   : > { %6213 = vmatpush3.bf16.msra.mxu0 %v3609_v22 }
 0x6ac   : > { %6185 = vmatmul.mubr.msk.f32.gmra.mrb[68].mxu1 %vm1034_vm0, %v9055_v30  ;;  %6214 = vmatprep.subr.bf16.mxu0 %v3611_v60  ;;  %v5289_v30 = vld [vmem:[%s10404_s6 + $0x1b8] sm:$0xff]  ;;  %v9353_v40 = vpop.permute.xlu1 %3865 }
 0x6ad   : > { %6773 = vmatpush3.bf16.xpose.msk.msra.mxu1 %vm7848_vm1, %v6768_v8  ;;  %6187 = vmatprep.mubr.msk.f32.mxu1 %vm1034_vm0, %v9063_v39  ;;  %v9328_v39 = vpack.c.bf16 %v7019_v25, %v7018_v17  ;;  %v6780_v12 = vpack.c.bf16 %v5289_v30, %v5288_v0  ;;  %v5296_v8 = vld [vmem:[%s10404_s6 + $0x1f0] sm:$0xff]  ;;  %v9423_v17 = vpop.permute.xlu0 %3869 }
 0x6ae   : > { %6776 = vmatprep.subr.msk.bf16.mxu1 %vm7848_vm1, %v6774_v1 }
 0x6af   : > { %6215 = vmatpush3.bf16.msra.mxu0 %v3611_v60  ;;  %v5297_v60 = vld [vmem:[%s10404_s6 + $0x1f8] sm:$0xff] }
 0x6b0   : > { %6188 = vmatmul.mubr.msk.f32.gmra.mrb[70].mxu1 %vm1034_vm0, %v9137_v57  ;;  %6216 = vmatprep.subr.bf16.mxu0 %v3613_v42  ;;  %v5290_v57 = vld [vmem:[%s10404_s6 + $0x1c0] sm:$0xff]  ;;  %v9376_v41 = vpop.permute.xlu1 %7021  ;;  %v6804_v22 = vpack.c.bf16 %v5297_v60, %v5296_v8 }
 0x6b1   : > { %6190 = vmatprep.mubr.msk.f32.mxu1 %vm1034_vm0, %v9214_v19  ;;  %v9431_v0 = vpop.permute.xlu0 %7026 }
 0x6b3   : > { %6217 = vmatpush3.bf16.msra.mxu0 %v3613_v42 }
 0x6b4   : > { %6191 = vmatmul.mubr.msk.f32.gmra.mrb[72].mxu1 %vm1034_vm0, %v9186_v11  ;;  %6812 = vmatprep.subr.msk.bf16.mxu0 %vm7848_vm1, %v9328_v39  ;;  %v5291_v11 = vld [vmem:[%s10404_s6 + $0x1c8] sm:$0xff]  ;;  %v9391_v18 = vpop.permute.xlu1 %3871 }
 0x6b5   : > { %6779 = vmatpush3.bf16.xpose.msk.msra.mxu1 %vm7848_vm1, %v6774_v1  ;;  %6193 = vmatprep.mubr.msk.f32.mxu1 %vm1034_vm0, %v9222_v23  ;;  %v6786_v23 = vpack.c.bf16 %v5291_v11, %v5290_v57 }
 0x6b6   : > { %6782 = vmatprep.subr.msk.bf16.mxu1 %vm7848_vm1, %v6780_v12 }
 0x6b8   : > { %6194 = vmatmul.mubr.msk.f32.gmra.mrb[74].mxu1 %vm1034_vm0, %v9228_v28  ;;  %v10542_v28 = vld [vmem:[#allocation26_spill] sm:$0xff] }
 0x6b9   : > { %6196 = vmatprep.mubr.msk.f32.mxu1 %vm1034_vm0, %v9232_v27  ;;  %v6124_v19 = vpop.f32.mrb[80].mxu0  ;;  %v5292_v27 = vld [vmem:[%s10404_s6 + $0x1d0] sm:$0xff] }
 0x6ba   : > { %v3062_v21 = vpop.f32.mrb[81].mxu0  ;;  %3147 = vrot.lane.b32.xlu1 %v6124_v19, %s10540_s13 }
 0x6bb   : > { %3143 = vrot.lane.b32.xlu0 %v3062_v21, %s10541_s9 }
 0x6bc   : > { %6197 = vmatmul.mubr.msk.f32.gmra.mrb[76].mxu1 %vm1034_vm0, %v9252_v13  ;;  %v5293_v13 = vld [vmem:[%s10404_s6 + $0x1d8] sm:$0xff] }
 0x6bd   : > { %6785 = vmatpush3.bf16.xpose.msk.msra.mxu1 %vm7848_vm1, %v6780_v12  ;;  %6199 = vmatprep.mubr.msk.f32.mxu1 %vm1034_vm0, %v9258_v9  ;;  %v6792_v37 = vpack.c.bf16 %v5293_v13, %v5292_v27  ;;  %v9443_v12 = vpop.permute.xlu0 %3879 }
 0x6be   : > { %6788 = vmatprep.subr.msk.bf16.mxu1 %vm7848_vm1, %v6786_v23  ;;  %10551 = vst [vmem:[#allocation74_spill] sm:$0xff] %v9443_v12 }
 0x6bf   : > { %7036 = vrot.lane.b32.xlu0 %v10542_v28, %s10366_s23  ;;  %s10544_s23 = smov 273  }
 0x6c0   : > { %6200 = vmatmul.mubr.msk.f32.gmra.mrb[78].mxu1 %vm1034_vm0, %v9272_v55  ;;  %v6127_v49 = vpop.f32.mrb[82].mxu0  ;;  %v5294_v55 = vld [vmem:[%s10404_s6 + $0x1e0] sm:$0xff]  ;;  %s10572_s6 = smov 377  }
 0x6c1   : > { %6266 = vmatprep.mubr.msk.f32.mxu1 %vm1034_vm0, %v9353_v40  ;;  %v3072_v9 = vpop.f32.mrb[83].mxu0  ;;  %3155 = vrot.lane.b32.xlu1 %v6127_v49, %s10543_s0  ;;  %v6798_v20 = vpack.c.bf16 %v5295_v4, %v5294_v55  ;;  %v9451_v11 = vpop.permute.xlu0 %3885 }
 0x6c2   : > { %10553 = vst [vmem:[#allocation76_spill] sm:$0xff] %v9451_v11 }
 0x6c3   : > { %3151 = vrot.lane.b32.xlu0 %v3072_v9, %s10544_s23 }
 0x6c5   : > { %6791 = vmatpush3.bf16.xpose.msk.msra.mxu1 %vm7848_vm1, %v6786_v23  ;;  %3891 = vrot.lane.b32.xlu1 %v8147_v15, %s10545_s14  ;;  %v9397_v15 = vpop.permute.xlu1 %3873 }
 0x6c6   : > { %6794 = vmatprep.subr.msk.bf16.mxu1 %vm7848_vm1, %v6792_v37 }
 0x6c9   : > { %3893 = vrot.lane.b32.xlu1 %v8153_v16, %s10545_s14  ;;  %v9407_v33 = vpop.permute.xlu1 %3875 }
 0x6cd   : > { %6797 = vmatpush3.bf16.xpose.msk.msra.mxu1 %vm7848_vm1, %v6792_v37  ;;  %v9415_v1 = vpop.permute.xlu1 %3877 }
 0x6ce   : > { %6800 = vmatprep.subr.msk.bf16.mxu1 %vm7848_vm1, %v6798_v20  ;;  %10548 = vst [vmem:[#allocation26_spill] sm:$0xff] %v9415_v1 }
 0x6d1   : > { %v9421_v25 = vpop.permute.xlu1 %3881 }
 0x6d2   : > { %10549 = vst [vmem:[#allocation72_spill] sm:$0xff] %v9421_v25 }
 0x6d4   : > { %v6130_v16 = vpop.f32.mrb[84].mxu0 }
 0x6d5   : > { %6803 = vmatpush3.bf16.xpose.msk.msra.mxu1 %vm7848_vm1, %v6798_v20  ;;  %v3082_v59 = vpop.f32.mrb[85].mxu0  ;;  %3163 = vrot.lane.b32.xlu1 %v6130_v16, %s10546_s2  ;;  %v9429_v42 = vpop.permute.xlu1 %3883  ;;  %v10589_v46 = vld [vmem:[#allocation26_spill] sm:$0xff] }
 0x6d6   : > { %3159 = vrot.lane.b32.xlu0 %v3082_v59, %s10547_s3  ;;  %6806 = vmatprep.subr.msk.bf16.mxu1 %vm7848_vm1, %v6804_v22  ;;  %10550 = vst [vmem:[#allocation73_spill] sm:$0xff] %v9429_v42 }
 0x6d9   : > { %v9437_v30 = vpop.permute.xlu1 %7031 }
 0x6dd   : > { %6809 = vmatpush3.bf16.xpose.msk.msra.mxu1 %vm7848_vm1, %v6804_v22  ;;  %v9449_v57 = vpop.permute.xlu1 %3887 }
 0x6de   : > { %10552 = vst [vmem:[#allocation75_spill] sm:$0xff] %v9449_v57 }
 0x6e1   : > { %v9457_v19 = vpop.permute.xlu1 %3889 }
 0x6e2   : > { %10554 = vst [vmem:[#allocation77_spill] sm:$0xff] %v9457_v19 }
 0x6e4   : > { %6267 = vmatmul.mubr.msk.f32.vlgmr.msra.gmra.mrb[80].mxu1 %vm1034_vm0, %v9417_v26 }
 0x6e5   : > { %6269 = vmatprep.mubr.msk.f32.mxu1 %vm1034_vm0, %v9423_v17 }
 0x6e8   : > { %6270 = vmatmul.mubr.msk.f32.gmra.mrb[82].mxu1 %vm1034_vm0, %v9391_v18 }
 0x6e9   : > { %6272 = vmatprep.mubr.msk.f32.mxu1 %vm1034_vm0, %v9397_v15 }
 0x6ec   : > { %6273 = vmatmul.mubr.msk.f32.gmra.mrb[84].mxu1 %vm1034_vm0, %v9407_v33 }
 0x6ed   : > { %6275 = vmatprep.mubr.msk.f32.mxu1 %vm1034_vm0, %v9415_v1 }
 0x6f0   : > { %6276 = vmatmul.mubr.msk.f32.gmra.mrb[86].mxu1 %vm1034_vm0, %v9443_v12  ;;  %v10587_v12 = vld [vmem:[#allocation40_spill] sm:$0xff] }
 0x6f1   : > { %6278 = vmatprep.mubr.msk.f32.mxu1 %vm1034_vm0, %v9421_v25 }
 0x6f4   : > { %6279 = vmatmul.mubr.msk.f32.gmra.mrb[88].mxu1 %vm1034_vm0, %v9429_v42 }
 0x6f5   : > { %6281 = vmatprep.mubr.msk.f32.mxu1 %vm1034_vm0, %v9451_v11 }
 0x6f8   : > { %6282 = vmatmul.mubr.msk.f32.gmra.mrb[90].mxu1 %vm1034_vm0, %v9449_v57 }
 0x6f9   : > { %6284 = vmatprep.mubr.msk.f32.mxu1 %vm1034_vm0, %v9457_v19 }
 0x723   : > { %v6133_v21 = vpop.f32.mrb[86].mxu0 }
 0x724   : > { %v3092_v23 = vpop.f32.mrb[87].mxu0  ;;  %3171 = vrot.lane.b32.xlu1 %v6133_v21, %s10555_s22 }
 0x725   : > { %3167 = vrot.lane.b32.xlu0 %v3092_v23, %s10556_s29 }
 0x72c   : > { %v3148_v13 = vpop.permute.xlu1 %3147 }
 0x72d   : > { %v9465_v28 = vpop.f32.mrb[48].mxu1 }
 0x72e   : > { %10557 = vst [vmem:[#allocation78_spill] sm:$0xff] %v9465_v28  ;;  %v9467_v27 = vpop.f32.mrb[49].mxu1 }
 0x72f   : > { %10558 = vst [vmem:[#allocation79_spill] sm:$0xff] %v9467_v27  ;;  %v9469_v49 = vpop.f32.mrb[50].mxu1 }
 0x730   : > { %10559 = vst [vmem:[#allocation80_spill] sm:$0xff] %v9469_v49  ;;  %v9471_v9 = vpop.f32.mrb[51].mxu1 }
 0x731   : > { %10560 = vst [vmem:[#allocation81_spill] sm:$0xff] %v9471_v9 }
 0x733   : > { %v3156_v37 = vpop.permute.xlu1 %3155 }
 0x735   : > { %v9473_v55 = vpop.f32.mrb[52].mxu1 }
 0x736   : > { %10561 = vst [vmem:[#allocation82_spill] sm:$0xff] %v9473_v55  ;;  %v9475_v4 = vpop.f32.mrb[53].mxu1 }
 0x737   : > { %10562 = vst [vmem:[#allocation83_spill] sm:$0xff] %v9475_v4  ;;  %v9477_v20 = vpop.permute.xlu1 %3891  ;;  %v9479_v8 = vpop.f32.mrb[54].mxu1 }
 0x738   : > { %10563 = vst [vmem:[#allocation84_spill] sm:$0xff] %v9477_v20  ;;  %10564 = vst [vmem:[#allocation85_spill] sm:$0xff] %v9479_v8  ;;  %v9481_v60 = vpop.f32.mrb[55].mxu1  ;;  %6285 = vmatmul.mubr.msk.f32.gmra.mrb[92].mxu1 %vm1034_vm0, %v9477_v20  ;;  %v10585_v20 = vld [vmem:[#allocation38_spill] sm:$0xff] }
 0x739   : > { %10565 = vst [vmem:[#allocation86_spill] sm:$0xff] %v9481_v60 }
 0x73b   : > { %v9485_v22 = vpop.permute.xlu1 %3893 }
 0x73c   : > { %10566 = vst [vmem:[#allocation87_spill] sm:$0xff] %v9485_v22  ;;  %6287 = vmatprep.mubr.msk.f32.mxu1 %vm1034_vm0, %v9485_v22 }
 0x747   : > { %v3164_v38 = vpop.permute.xlu1 %3163 }
 0x759   : > { %v6136_v16 = vpop.f32.mrb[88].mxu0 }
 0x75a   : > { %3179 = vrot.lane.b32.xlu1 %v6136_v16, %s10472_s15  ;;  %v3102_v59 = vpop.f32.mrb[89].mxu0 }
 0x75b   : > { %3175 = vrot.lane.b32.xlu0 %v3102_v59, %s10473_s16 }
 0x760   : > { %v6139_v21 = vpop.f32.mrb[90].mxu0 }
 0x761   : > { %3187 = vrot.lane.b32.xlu1 %v6139_v21, %s10478_s20  ;;  %v3112_v23 = vpop.f32.mrb[91].mxu0 }
 0x762   : > { %3183 = vrot.lane.b32.xlu0 %v3112_v23, %s10479_s8 }
 0x764   : > { %v6142_v8 = vpop.f32.mrb[92].mxu0 }
 0x765   : > { %3195 = vrot.lane.b32.xlu1 %v6142_v8, %s10567_s1  ;;  %v3122_v55 = vpop.f32.mrb[93].mxu0 }
 0x766   : > { %3191 = vrot.lane.b32.xlu0 %v3122_v55, %s10568_s18 }
 0x767   : > { %v9495_v60 = vpop.f32.mrb[56].mxu1 }
 0x768   : > { %10569 = vst [vmem:[#allocation88_spill] sm:$0xff] %v9495_v60  ;;  %v9497_v4 = vpop.f32.mrb[57].mxu1  ;;  %v6145_v16 = vpop.f32.mrb[94].mxu0 }
 0x769   : > { %10570 = vst [vmem:[#allocation89_spill] sm:$0xff] %v9497_v4  ;;  %v9499_v9 = vpop.f32.mrb[58].mxu1  ;;  %3203 = vrot.lane.b32.xlu1 %v6145_v16, %s10572_s6  ;;  %v3132_v59 = vpop.f32.mrb[95].mxu0 }
 0x76a   : > { %10571 = vst [vmem:[#allocation90_spill] sm:$0xff] %v9499_v9  ;;  %v9502_v21 = vpop.f32.mrb[59].mxu1  ;;  %3199 = vrot.lane.b32.xlu0 %v3132_v59, %s10480_s21  ;;  %v3144_v9 = vpop.permute.xlu0 %3143 }
 0x76b   : > { %10573 = vst [vmem:[#allocation91_spill] sm:$0xff] %v9502_v21 }
 0x76e   : > { %v9513_v21 = vpop.permute.xlu0 %7036 }
 0x76f   : > { %v9505_v23 = vpop.f32.mrb[60].mxu1 }
 0x770   : > { %10574 = vst [vmem:[#allocation92_spill] sm:$0xff] %v9505_v23  ;;  %v9507_v8 = vpop.f32.mrb[61].mxu1  ;;  %v10578_v23 = vld [vmem:[#allocation32_spill] sm:$0xff] }
 0x771   : > { %10575 = vst [vmem:[#allocation93_spill] sm:$0xff] %v9507_v8  ;;  %v9509_v27 = vpop.f32.mrb[62].mxu1 }
 0x772   : > { %10576 = vst [vmem:[#allocation94_spill] sm:$0xff] %v9509_v27  ;;  %v9511_v55 = vpop.f32.mrb[63].mxu1 }
 0x773   : > { %10577 = vst [vmem:[#allocation95_spill] sm:$0xff] %v9511_v55  ;;  %v3152_v55 = vpop.permute.xlu0 %3151 }
 0x777   : > { %v6180_v60 = vpop.f32.mrb[64].mxu1  ;;  %v3160_v63 = vpop.permute.xlu0 %3159 }
 0x778   : > { %v3351_v49 = vpop.f32.mrb[65].mxu1  ;;  %v3357_v61 = vadd.f32 %v6180_v60, %v3148_v13 }
 0x779   : > { %v3352_v5 = vadd.f32 %v3351_v49, %v3144_v9 }
 0x77a   : > { %v9520_v31 = vadd.f32 %v3357_v61, %v10579_v7 }
 0x77b   : > { %v6183_v28 = vpop.f32.mrb[66].mxu1  ;;  %v9516_v54 = vadd.f32 %v3352_v5, %v10578_v23  ;;  %v10581_v5 = vld [vmem:[#allocation34_spill] sm:$0xff]  ;;  %v10584_v23 = vld [vmem:[#allocation35_spill] sm:$0xff] }
 0x77c   : > { %v3361_v4 = vpop.f32.mrb[67].mxu1  ;;  %v3367_v8 = vadd.f32 %v6183_v28, %v3156_v37  ;;  %v10582_v37 = vld [vmem:[#allocation37_spill] sm:$0xff] }
 0x77d   : > { %v3362_v9 = vadd.f32 %v3361_v4, %v3152_v55 }
 0x77e   : > { %v9523_v49 = vadd.f32 %v3367_v8, %v10580_v32 }
 0x77f   : > { %v6186_v50 = vpop.f32.mrb[68].mxu1  ;;  %v9528_v28 = vadd.f32 %v3362_v9, %v10581_v5 }
 0x780   : > { %v3371_v16 = vpop.f32.mrb[69].mxu1  ;;  %v3377_v6 = vadd.f32 %v6186_v50, %v3164_v38  ;;  %v10583_v50 = vld [vmem:[#allocation27_spill] sm:$0xff] }
 0x781   : > { %v3372_v44 = vadd.f32 %v3371_v16, %v3160_v63  ;;  %v10586_v16 = vld [vmem:[#allocation39_spill] sm:$0xff] }
 0x782   : > { %v9531_v60 = vadd.f32 %v3377_v6, %v10582_v37 }
 0x783   : > { %v6189_v47 = vpop.f32.mrb[70].mxu1  ;;  %v9542_v7 = vadd.f32 %v3372_v44, %v10584_v23 }
 0x784   : > { %v3381_v59 = vpop.f32.mrb[71].mxu1 }
 0x787   : > { %v6192_v27 = vpop.f32.mrb[72].mxu1 }
 0x788   : > { %v3391_v3 = vpop.f32.mrb[73].mxu1 }
 0x789   : > { %3446 = vmax.xlane.f32.xlu0 %v9516_v54 }
 0x78b   : > { %v6195_v43 = vpop.f32.mrb[74].mxu1 }
 0x78c   : > { %v3401_v13 = vpop.f32.mrb[75].mxu1 }
 0x78d   : > { %3448 = vmax.xlane.f32.xlu1 %v9520_v31  ;;  %3452 = vmax.xlane.f32.xlu0 %v9523_v49 }
 0x78f   : > { %v6198_v2 = vpop.f32.mrb[76].mxu1 }
 0x790   : > { %v3411_v61 = vpop.f32.mrb[77].mxu1 }
 0x791   : > { %3456 = vmax.xlane.f32.xlu1 %v9531_v60  ;;  %3450 = vmax.xlane.f32.xlu0 %v9528_v28 }
 0x793   : > { %v6201_v4 = vpop.f32.mrb[78].mxu1 }
 0x794   : > { %v3421_v38 = vpop.f32.mrb[79].mxu1 }
 0x796   : > { %v3172_v5 = vpop.permute.xlu1 %3171 }
 0x797   : > { %v3387_v45 = vadd.f32 %v6189_v47, %v3172_v5 }
 0x799   : > { %v9546_v19 = vadd.f32 %v3387_v45, %v10585_v20 }
 0x7a2   : > { %7041 = vrot.lane.b32.xlu1 %v10583_v50, %s10545_s14  ;;  %v3168_v50 = vpop.permute.xlu0 %3167 }
 0x7a3   : > { %v3382_v57 = vadd.f32 %v3381_v59, %v3168_v50 }
 0x7a5   : > { %v9550_v42 = vadd.f32 %v3382_v57, %v10586_v16 }
 0x7a7   : > { %3895 = vrot.lane.b32.xlu0 %v8161_v29, %s10545_s14 }
 0x7b7   : > { %v6268_v8 = vpop.f32.mrb[80].mxu1 }
 0x7b8   : > { %v9539_v55 = vpop.f32.mrb[81].mxu1 }
 0x7bb   : > { %v6271_v9 = vpop.f32.mrb[82].mxu1 }
 0x7bc   : > { %v4053_v6 = vpop.f32.mrb[83].mxu1 }
 0x7bf   : > { %v6274_v24 = vpop.f32.mrb[84].mxu1 }
 0x7c0   : > { %v4063_v37 = vpop.f32.mrb[85].mxu1 }
 0x7c3   : > { %v6277_v32 = vpop.f32.mrb[86].mxu1 }
 0x7c4   : > { %v4073_v22 = vpop.f32.mrb[87].mxu1 }
 0x7c6   : > { %3454 = vmax.xlane.f32.xlu0 %v9542_v7 }
 0x7c7   : > { %v6280_v29 = vpop.f32.mrb[88].mxu1 }
 0x7c8   : > { %v4083_v11 = vpop.f32.mrb[89].mxu1 }
 0x7ca   : > { %3460 = vmax.xlane.f32.xlu0 %v9546_v19 }
 0x7cb   : > { %v6283_v63 = vpop.f32.mrb[90].mxu1 }
 0x7cc   : > { %v4093_v25 = vpop.f32.mrb[91].mxu1  ;;  %v3180_v44 = vpop.permute.xlu1 %3179 }
 0x7cd   : > { %v3397_v23 = vadd.f32 %v6192_v27, %v3180_v44  ;;  %v3176_v47 = vpop.permute.xlu0 %3175 }
 0x7ce   : > { %v3392_v5 = vadd.f32 %v3391_v3, %v3176_v47  ;;  %3458 = vmax.xlane.f32.xlu0 %v9550_v42 }
 0x7cf   : > { %v9554_v1 = vadd.f32 %v3397_v23, %v10587_v12 }
 0x7d0   : > { %v9557_v45 = vadd.f32 %v3392_v5, %v8513_v14 }
 0x7d2   : > { %3464 = vmax.xlane.f32.xlu0 %v9554_v1  ;;  %3462 = vmax.xlane.f32.xlu1 %v9557_v45 }
 0x7d3   : > { %v3188_v59 = vpop.permute.xlu1 %3187 }
 0x7d4   : > { %v3407_v57 = vadd.f32 %v6195_v43, %v3188_v59  ;;  %v3184_v50 = vpop.permute.xlu0 %3183 }
 0x7d5   : > { %v3402_v27 = vadd.f32 %v3401_v13, %v3184_v50 }
 0x7d6   : > { %v9562_v16 = vadd.f32 %v3407_v57, %v8524_v48 }
 0x7d7   : > { %v3196_v3 = vpop.permute.xlu1 %3195  ;;  %v9566_v47 = vadd.f32 %v3402_v27, %v8534_v58  ;;  %v7028_v27 = vunpack.i.l.bf16 %v9431_v0 }
 0x7d8   : > { %v3417_v44 = vadd.f32 %v6198_v2, %v3196_v3  ;;  %3468 = vmax.xlane.f32.xlu0 %v9562_v16  ;;  %v3192_v23 = vpop.permute.xlu0 %3191 }
 0x7d9   : > { %v3412_v14 = vadd.f32 %v3411_v61, %v3192_v23 }
 0x7da   : > { %v9569_v5 = vadd.f32 %v3417_v44, %v8545_v52  ;;  %v7033_v44 = vunpack.i.l.bf16 %v9437_v30 }
 0x7db   : > { %v3204_v12 = vpop.permute.xlu1 %3203  ;;  %v9574_v43 = vadd.f32 %v3412_v14, %v8558_v56  ;;  %v10588_v14 = vld [vmem:[#allocation28_spill] sm:$0xff] }
 0x7dc   : > { %3472 = vmax.xlane.f32.xlu1 %v9569_v5  ;;  %3466 = vmax.xlane.f32.xlu0 %v9566_v47  ;;  %v3427_v13 = vadd.f32 %v6201_v4, %v3204_v12  ;;  %v3200_v2 = vpop.permute.xlu0 %3199 }
 0x7dd   : > { %v3422_v57 = vadd.f32 %v3421_v38, %v3200_v2 }
 0x7de   : > { %v9578_v59 = vadd.f32 %v3427_v13, %v8571_v10  ;;  %v7038_v13 = vunpack.i.l.bf16 %v9513_v21 }
 0x7df   : > { %v9582_v61 = vadd.f32 %v3422_v57, %v8584_v51 }
 0x7e0   : > { %3470 = vmax.xlane.f32.xlu0 %v9574_v43 }
 0x7e4   : > { %3476 = vmax.xlane.f32.xlu0 %v9578_v59 }
 0x7e8   : > { %3474 = vmax.xlane.f32.xlu0 %v9582_v61 }
 0x7ed   : > { %7051 = vrot.lane.b32.xlu1 %v8171_v34, %s10545_s14 }
 0x7f1   : > { %4128 = vrot.lane.b32.xlu1 %v6268_v8, %s10540_s13 }
 0x7f5   : > { %4136 = vrot.lane.b32.xlu1 %v6271_v9, %s10543_s0  ;;  %s10655_s0 = smov 64  }
 0x7f9   : > { %4144 = vrot.lane.b32.xlu1 %v6274_v24, %s10546_s2 }
 0x7fd   : > { %4152 = vrot.lane.b32.xlu1 %v6277_v32, %s10555_s22 }
 0x7fe   : > { %7046 = vrot.lane.b32.xlu0 %v10588_v14, %s10545_s14 }
 0x801   : > { %4160 = vrot.lane.b32.xlu1 %v6280_v29, %s10472_s15  ;;  %v7023_v29 = vunpack.i.l.bf16 %v9376_v41 }
 0x802   : > { %4579 = vrot.lane.b32.xlu0 %v10486_v35, %s10545_s14 }
 0x805   : > { %4168 = vrot.lane.b32.xlu1 %v6283_v63, %s10478_s20 }
 0x806   : > { %4124 = vrot.lane.b32.xlu0 %v9539_v55, %s10541_s9  ;;  %s5377_s9 = sshll.u32 %s7515_s28, 11 }
 0x807   : > { %s10183_s28 = scalar_lea.hbm %s10241_s7, %s5377_s9 }
 0x80a   : > { %4132 = vrot.lane.b32.xlu0 %v4053_v6, %s10544_s23 }
 0x80b   : > { %v6286_v34 = vpop.f32.mrb[92].mxu1 }
 0x80c   : > { %v4103_v12 = vpop.f32.mrb[93].mxu1  ;;  %4176 = vrot.lane.b32.xlu1 %v6286_v34, %s10567_s1 }
 0x80e   : > { %4140 = vrot.lane.b32.xlu0 %v4063_v37, %s10547_s3 }
 0x812   : > { %4148 = vrot.lane.b32.xlu0 %v4073_v22, %s10556_s29 }
 0x816   : > { %4156 = vrot.lane.b32.xlu0 %v4083_v11, %s10473_s16  ;;  %v3447_v24 = vpop.xlane.xlu0 %3446 }
 0x817   : > { %v3478_v35 = vsub.f32 %v9516_v54, %v3447_v24 }
 0x819   : > { %v3494_v32 = vmul.f32 1.442695, %v3478_v35 }
 0x81a   : > { %v3449_v4 = vpop.xlane.xlu1 %3448  ;;  %4164 = vrot.lane.b32.xlu0 %v4093_v25, %s10479_s8  ;;  %v3453_v38 = vpop.xlane.xlu0 %3452 }
 0x81b   : > { %v3479_v8 = vsub.f32 %v9520_v31, %v3449_v4  ;;  %v3481_v55 = vsub.f32 %v9523_v49, %v3453_v38  ;;  %7159 = vpow2.f32 %v3494_v32 }
 0x81d   : > { %v3496_v9 = vmul.f32 1.442695, %v3479_v8  ;;  %v3500_v22 = vmul.f32 1.442695, %v3481_v55 }
 0x81e   : > { %4172 = vrot.lane.b32.xlu0 %v4103_v12, %s10568_s18  ;;  %v3451_v37 = vpop.xlane.xlu0 %3450 }
 0x81f   : > { %7161 = vpow2.f32 %v3496_v9  ;;  %v3480_v11 = vsub.f32 %v9528_v28, %v3451_v37  ;;  %v7024_v28 = vunpack.i.h.bf16 %v9376_v41  ;;  %v7034_v41 = vunpack.i.h.bf16 %v9437_v30 }
 0x820   : > { %7163 = vpow2.f32 %v3500_v22 }
 0x821   : > { %v3498_v6 = vmul.f32 1.442695, %v3480_v11  ;;  %v6816_v50 = vpack.c.bf16 %v7024_v28, %v7023_v29  ;;  %v6828_v23 = vpack.c.bf16 %v7034_v41, %v7033_v44 }
 0x822   : > { %4583 = vrot.lane.b32.xlu0 %v10489_v36, %s10545_s14  ;;  %v9612_v54 = vpop.permute.xlu0 %3895 }
 0x823   : > { %6288 = vmatmul.mubr.msk.f32.gmra.mrb[94].mxu1 %vm1034_vm0, %v9612_v54  ;;  %7165 = vpow2.f32 %v3498_v6 }
 0x825   : > { %v9618_v31 = vpop.eup %7159 }
 0x826   : > { %4585 = vrot.lane.b32.xlu0 %v10488_v62, %s10545_s14 }
 0x829   : > { %v9620_v25 = vpop.eup %7161 }
 0x82a   : > { %4589 = vrot.lane.b32.xlu0 %v10492_v53, %s10545_s14  ;;  %v3574_v36 = vpack.c.bf16 %v9620_v25, %v9618_v31  ;;  %v9626_v49 = vpop.eup %7163  ;;  %v7029_v53 = vunpack.i.h.bf16 %v9431_v0  ;;  %v7039_v0 = vunpack.i.h.bf16 %v9513_v21 }
 0x82c   : > { %6218 = vmatprep.mubr.bf16.mxu0 %v3574_v36  ;;  %v6822_v3 = vpack.c.bf16 %v7029_v53, %v7028_v27  ;;  %v6834_v2 = vpack.c.bf16 %v7039_v0, %v7038_v13 }
 0x82d   : > { %v9630_v63 = vpop.eup %7165 }
 0x82e   : > { %v3575_v62 = vpack.c.bf16 %v9626_v49, %v9630_v63 }
 0x830   : > { %6219 = vmatmul.mubr.bf16.vlgmr.msra.gmra.mrb[96].mxu0 %v3575_v62 }
 0x831   : > { %6815 = vmatpush3.bf16.xpose.msk.msra.mxu0 %vm7848_vm1, %v9328_v39  ;;  %v3457_v39 = vpop.xlane.xlu1 %3456 }
 0x832   : > { %6818 = vmatprep.subr.msk.bf16.mxu0 %vm7848_vm1, %v6816_v50  ;;  %v3483_v34 = vsub.f32 %v9531_v60, %v3457_v39 }
 0x834   : > { %v3504_v24 = vmul.f32 1.442695, %v3483_v34 }
 0x835   : > { %v7042_v57 = vpop.permute.xlu1 %7041 }
 0x836   : > { %v7044_v30 = vunpack.i.h.bf16 %v7042_v57  ;;  %v7043_v14 = vunpack.i.l.bf16 %v7042_v57  ;;  %7167 = vpow2.f32 %v3504_v24 }
 0x838   : > { %v6840_v12 = vpack.c.bf16 %v7044_v30, %v7043_v14 }
 0x839   : > { %6821 = vmatpush3.bf16.xpose.msk.msra.mxu0 %vm7848_vm1, %v6816_v50 }
 0x83a   : > { %6824 = vmatprep.subr.msk.bf16.mxu0 %vm7848_vm1, %v6822_v3 }
 0x840   : > { %v9669_v6 = vpop.eup %7167 }
 0x841   : > { %6827 = vmatpush3.bf16.xpose.msk.msra.mxu0 %vm7848_vm1, %v6822_v3 }
 0x842   : > { %6830 = vmatprep.subr.msk.bf16.mxu0 %vm7848_vm1, %v6828_v23 }
 0x849   : > { %6833 = vmatpush3.bf16.xpose.msk.msra.mxu0 %vm7848_vm1, %v6828_v23 }
 0x84a   : > { %6836 = vmatprep.subr.msk.bf16.mxu0 %vm7848_vm1, %v6834_v2 }
 0x851   : > { %6839 = vmatpush3.bf16.xpose.msk.msra.mxu0 %vm7848_vm1, %v6834_v2 }
 0x852   : > { %6842 = vmatprep.subr.msk.bf16.mxu0 %vm7848_vm1, %v6840_v12 }
 0x853   : > { %v3455_v21 = vpop.xlane.xlu0 %3454 }
 0x854   : > { %v3482_v35 = vsub.f32 %v9542_v7, %v3455_v21 }
 0x856   : > { %v3502_v32 = vmul.f32 1.442695, %v3482_v35 }
 0x857   : > { %v3461_v4 = vpop.xlane.xlu0 %3460 }
 0x858   : > { %7169 = vpow2.f32 %v3502_v32  ;;  %v3485_v38 = vsub.f32 %v9546_v19, %v3461_v4 }
 0x859   : > { %6845 = vmatpush3.bf16.xpose.msk.msra.mxu0 %vm7848_vm1, %v6840_v12 }
 0x85a   : > { %v3508_v60 = vmul.f32 1.442695, %v3485_v38 }
 0x85b   : > { %v3459_v8 = vpop.xlane.xlu0 %3458 }
 0x85c   : > { %v3484_v55 = vsub.f32 %v9550_v42, %v3459_v8  ;;  %7171 = vpow2.f32 %v3508_v60 }
 0x85e   : > { %v3506_v9 = vmul.f32 1.442695, %v3484_v55 }
 0x85f   : > { %v3463_v37 = vpop.xlane.xlu1 %3462  ;;  %v3465_v22 = vpop.xlane.xlu0 %3464 }
 0x860   : > { %7173 = vpow2.f32 %v3506_v9  ;;  %v3486_v7 = vsub.f32 %v9557_v45, %v3463_v37  ;;  %v3487_v11 = vsub.f32 %v9554_v1, %v3465_v22 }
 0x862   : > { %v9671_v36 = vpop.eup %7169  ;;  %v3510_v19 = vmul.f32 1.442695, %v3486_v7  ;;  %v3512_v28 = vmul.f32 1.442695, %v3487_v11 }
 0x863   : > { %v3576_v29 = vpack.c.bf16 %v9669_v6, %v9671_v36 }
 0x864   : > { %7175 = vpow2.f32 %v3510_v19 }
 0x865   : > { %7177 = vpow2.f32 %v3512_v28  ;;  %6222 = vmatprep.mubr.bf16.mxu0 %v3576_v29  ;;  %v3469_v42 = vpop.xlane.xlu0 %3468  ;;  %v10590_v29 = vld [vmem:[#allocation74_spill] sm:$0xff] }
 0x866   : > { %v3489_v62 = vsub.f32 %v9562_v16, %v3469_v42  ;;  %v9676_v50 = vpop.eup %7171  ;;  %v10597_v42 = vld [vmem:[#allocation87_spill] sm:$0xff] }
 0x868   : > { %v3516_v27 = vmul.f32 1.442695, %v3489_v62 }
 0x869   : > { %v3473_v45 = vpop.xlane.xlu1 %3472  ;;  %v3467_v53 = vpop.xlane.xlu0 %3466 }
 0x86a   : > { %v9678_v1 = vpop.eup %7173  ;;  %v3491_v3 = vsub.f32 %v9569_v5, %v3473_v45  ;;  %v3488_v41 = vsub.f32 %v9566_v47, %v3467_v53  ;;  %7179 = vpow2.f32 %v3516_v27  ;;  %v10598_v53 = vld [vmem:[#allocation12_spill] sm:$0xff] }
 0x86b   : > { %v3577_v44 = vpack.c.bf16 %v9676_v50, %v9678_v1  ;;  %v10599_v27 = vld [vmem:[#allocation20_spill] sm:$0xff] }
 0x86c   : > { %v3514_v23 = vmul.f32 1.442695, %v3488_v41  ;;  %v3520_v39 = vmul.f32 1.442695, %v3491_v3  ;;  %v10600_v3 = vld [vmem:[#allocation24_spill] sm:$0xff] }
 0x86d   : > { %6223 = vmatmul.mubr.bf16.gmra.mrb[100].mxu0 %v3577_v44  ;;  %v3471_v0 = vpop.xlane.xlu0 %3470  ;;  %v7052_v12 = vpop.permute.xlu1 %7051 }
 0x86e   : > { %v9684_v13 = vpop.eup %7175  ;;  %v3490_v16 = vsub.f32 %v9574_v43, %v3471_v0  ;;  %7181 = vpow2.f32 %v3514_v23  ;;  %v7054_v32 = vunpack.i.h.bf16 %v7052_v12  ;;  %v7053_v4 = vunpack.i.l.bf16 %v7052_v12 }
 0x86f   : > { %v9687_v2 = vpop.eup %7177  ;;  %7183 = vpow2.f32 %v3520_v39 }
 0x870   : > { %v3518_v57 = vmul.f32 1.442695, %v3490_v16  ;;  %v3578_v5 = vpack.c.bf16 %v9687_v2, %v9684_v13  ;;  %v6852_v7 = vpack.c.bf16 %v7054_v32, %v7053_v4 }
 0x871   : > { %v3477_v47 = vpop.xlane.xlu0 %3476  ;;  %v4129_v0 = vpop.permute.xlu1 %4128 }
 0x872   : > { %7185 = vpow2.f32 %v3518_v57  ;;  %6226 = vmatprep.mubr.bf16.mxu0 %v3578_v5  ;;  %v3493_v30 = vsub.f32 %v9578_v59, %v3477_v47 }
 0x874   : > { %v3524_v14 = vmul.f32 1.442695, %v3493_v30  ;;  %v9693_v21 = vpop.eup %7179 }
 0x875   : > { %v3475_v34 = vpop.xlane.xlu0 %3474  ;;  %v4137_v30 = vpop.permute.xlu1 %4136 }
 0x876   : > { %v3492_v24 = vsub.f32 %v9582_v61, %v3475_v34  ;;  %7187 = vpow2.f32 %v3524_v14 }
 0x878   : > { %v3522_v43 = vmul.f32 1.442695, %v3492_v24  ;;  %v9695_v35 = vpop.eup %7181 }
 0x879   : > { %v7047_v38 = vpop.permute.xlu0 %7046  ;;  %v3579_v59 = vpack.c.bf16 %v9693_v21, %v9695_v35  ;;  %v9699_v55 = vpop.eup %7183 }
 0x87a   : > { %7189 = vpow2.f32 %v3522_v43  ;;  %v7049_v60 = vunpack.i.h.bf16 %v7047_v38  ;;  %v7048_v8 = vunpack.i.l.bf16 %v7047_v38  ;;  %v4145_v34 = vpop.permute.xlu1 %4144 }
 0x87b   : > { %6227 = vmatmul.mubr.bf16.gmra.mrb[104].mxu0 %v3579_v59 }
 0x87c   : > { %v9701_v9 = vpop.eup %7185  ;;  %v6846_v61 = vpack.c.bf16 %v7049_v60, %v7048_v8 }
 0x87d   : > { %v4580_v37 = vpop.permute.xlu0 %4579  ;;  %v3580_v22 = vpack.c.bf16 %v9699_v55, %v9701_v9 }
 0x87e   : > { %6848 = vmatprep.subr.msk.bf16.mxu0 %vm7848_vm1, %v6846_v61  ;;  %6346 = vmatprep.subr.bf16.mxu1 %v4580_v37  ;;  %v4153_v38 = vpop.permute.xlu1 %4152 }
 0x87f   : > { %6230 = vmatprep.mubr.bf16.mxu0 %v3580_v22  ;;  %6851 = vmatpush3.bf16.xpose.msk.msra.mxu0 %vm7848_vm1, %v6846_v61 }
 0x880   : > { %6347 = vmatpush3.bf16.msra.mxu1 %v4580_v37  ;;  %6854 = vmatprep.subr.msk.bf16.mxu0 %vm7848_vm1, %v6852_v7  ;;  %v9711_v11 = vpop.eup %7187 }
 0x881   : > { %v4125_v5 = vpop.permute.xlu0 %4124 }
 0x882   : > { %v4161_v8 = vpop.permute.xlu1 %4160 }
 0x884   : > { %v9713_v19 = vpop.eup %7189 }
 0x885   : > { %v3581_v28 = vpack.c.bf16 %v9711_v11, %v9713_v19  ;;  %v4133_v14 = vpop.permute.xlu0 %4132 }
 0x887   : > { %6231 = vmatmul.mubr.bf16.gmra.mrb[108].mxu0 %v3581_v28  ;;  %v4169_v28 = vpop.permute.xlu1 %4168 }
 0x888   : > { %6857 = vmatpush3.bf16.xpose.msk.msra.mxu0 %vm7848_vm1, %v6852_v7  ;;  %6322 = vmatprep.mubr.msk.f32.mxu0 %vm1034_vm0, %v9353_v40  ;;  %v10591_v40 = vld [vmem:[#allocation72_spill] sm:$0xff]  ;;  %vm2794_vm1 = vcmask 523520  }
 0x889   : > { %v4141_v12 = vpop.permute.xlu0 %4140 }
 0x88d   : > { %v4149_v60 = vpop.permute.xlu0 %4148 }
 0x88f   : > { %6323 = vmatmul.mubr.msk.f32.vlgmr.msra.gmra.mrb[112].mxu0 %vm1034_vm0, %v9417_v26  ;;  %v10592_v26 = vld [vmem:[#allocation73_spill] sm:$0xff] }
 0x890   : > { %6325 = vmatprep.mubr.msk.f32.mxu0 %vm1034_vm0, %v9423_v17  ;;  %v10593_v17 = vld [vmem:[#allocation76_spill] sm:$0xff] }
 0x891   : > { %v4157_v61 = vpop.permute.xlu0 %4156 }
 0x893   : > { %6326 = vmatmul.mubr.msk.f32.gmra.mrb[114].mxu0 %vm1034_vm0, %v9391_v18  ;;  %v10594_v18 = vld [vmem:[#allocation75_spill] sm:$0xff] }
 0x894   : > { %6328 = vmatprep.mubr.msk.f32.mxu0 %vm1034_vm0, %v9397_v15  ;;  %v10595_v15 = vld [vmem:[#allocation77_spill] sm:$0xff] }
 0x897   : > { %6329 = vmatmul.mubr.msk.f32.gmra.mrb[116].mxu0 %vm1034_vm0, %v9407_v33  ;;  %v10596_v33 = vld [vmem:[#allocation84_spill] sm:$0xff] }
 0x898   : > { %6331 = vmatprep.mubr.msk.f32.mxu0 %vm1034_vm0, %v10589_v46  ;;  %v9791_v46 = vpop.permute.xlu0 %4164 }
 0x89b   : > { %6332 = vmatmul.mubr.msk.f32.gmra.mrb[118].mxu0 %vm1034_vm0, %v10590_v29 }
 0x89c   : > { %6334 = vmatprep.mubr.msk.f32.mxu0 %vm1034_vm0, %v10591_v40 }
 0x89f   : > { %6335 = vmatmul.mubr.msk.f32.gmra.mrb[120].mxu0 %vm1034_vm0, %v10592_v26 }
 0x8a0   : > { %6337 = vmatprep.mubr.msk.f32.mxu0 %vm1034_vm0, %v10593_v17 }
 0x8a3   : > { %6338 = vmatmul.mubr.msk.f32.gmra.mrb[122].mxu0 %vm1034_vm0, %v10594_v18  ;;  %v4177_v18 = vpop.permute.xlu1 %4176 }
 0x8a4   : > { %6340 = vmatprep.mubr.msk.f32.mxu0 %vm1034_vm0, %v10595_v15  ;;  %v10607_v15 = vld [vmem:[#allocation31_spill] sm:$0xff] }
 0x8a7   : > { %6341 = vmatmul.mubr.msk.f32.gmra.mrb[124].mxu0 %vm1034_vm0, %v10596_v33 }
 0x8a8   : > { %6343 = vmatprep.mubr.msk.f32.mxu0 %vm1034_vm0, %v10597_v42  ;;  %v10608_v42 = vld [vmem:[#allocation32_spill] sm:$0xff] }
 0x8ab   : > { %6344 = vmatmul.mubr.msk.f32.gmra.mrb[126].mxu0 %vm1034_vm0, %v9612_v54 }
 0x8f6   : > { %v6289_v62 = vpop.f32.mrb[94].mxu1 }
 0x8f7   : > { %4184 = vrot.lane.b32.xlu1 %v6289_v62, %s10572_s6  ;;  %v4113_v45 = vpop.f32.mrb[95].mxu1 }
 0x8f8   : > { %4180 = vrot.lane.b32.xlu0 %v4113_v45, %s10480_s21  ;;  %s7451_s21 = smov [#allocation4]  }
 0x8f9   : > { %s7371_s23 = sshll.u32 %s7451_s21, 4  ;;  %s7372_s23 = int_to_ptr.vmem [resolvable:$false] %s7371_s23 }
 0x8fb   : > { %4581 = vrot.lane.b32.xlu1 %v10598_v53, %s10545_s14  ;;  %v9799_v53 = vpop.permute.xlu0 %4172 }
 0x8ff   : > { %4587 = vrot.lane.b32.xlu1 %v10599_v27, %s10545_s14 }
 0x903   : > { %4591 = vrot.lane.b32.xlu1 %v10600_v3, %s10545_s14  ;;  %v9759_v41 = vpop.f32.mrb[96].mxu0 }
 0x904   : > { %v9761_v44 = vpop.f32.mrb[97].mxu0 }
 0x905   : > { %v9763_v54 = vpop.f32.mrb[98].mxu0 }
 0x906   : > { %v9765_v23 = vpop.f32.mrb[99].mxu0 }
 0x940   : > { %v9767_v39 = vpop.f32.mrb[100].mxu0 }
 0x941   : > { %10601 = vst [vmem:[#allocation27_spill] sm:$0xff] %v9767_v39  ;;  %v9769_v16 = vpop.f32.mrb[101].mxu0 }
 0x942   : > { %v9771_v57 = vpop.f32.mrb[102].mxu0 }
 0x943   : > { %v9773_v47 = vpop.f32.mrb[103].mxu0 }
 0x944   : > { %10602 = vst [vmem:[#allocation38_spill] sm:$0xff] %v9773_v47 }
 0x94e   : > { %v9775_v24 = vpop.f32.mrb[104].mxu0 }
 0x94f   : > { %v9777_v43 = vpop.f32.mrb[105].mxu0 }
 0x950   : > { %v9779_v32 = vpop.f32.mrb[106].mxu0 }
 0x951   : > { %v9781_v4 = vpop.f32.mrb[107].mxu0 }
 0x95a   : > { %v9783_v59 = vpop.f32.mrb[108].mxu0 }
 0x95b   : > { %10603 = vst [vmem:[#allocation28_spill] sm:$0xff] %v9783_v59  ;;  %v9785_v37 = vpop.f32.mrb[109].mxu0  ;;  %v10609_v59 = vld [vmem:[#allocation33_spill] sm:$0xff] }
 0x95c   : > { %10604 = vst [vmem:[#allocation26_spill] sm:$0xff] %v9785_v37  ;;  %v9787_v22 = vpop.f32.mrb[110].mxu0 }
 0x95d   : > { %10605 = vst [vmem:[#allocation74_spill] sm:$0xff] %v9787_v22  ;;  %v9789_v7 = vpop.f32.mrb[111].mxu0 }
 0x95e   : > { %10606 = vst [vmem:[#allocation72_spill] sm:$0xff] %v9789_v7  ;;  %v10611_v7 = vld [vmem:[#allocation35_spill] sm:$0xff] }
 0x962   : > { %v6324_v29 = vpop.f32.mrb[112].mxu0 }
 0x963   : > { %v4338_v40 = vadd.f32 %v6324_v29, %v4129_v0  ;;  %v4332_v26 = vpop.f32.mrb[113].mxu0 }
 0x964   : > { %v4333_v17 = vadd.f32 %v4332_v26, %v4125_v5 }
 0x965   : > { %v9794_v33 = vadd.f32 %v4338_v40, %v10607_v15  ;;  %v4584_v15 = vpop.permute.xlu0 %4583 }
 0x966   : > { %v9797_v62 = vadd.f32 %v4333_v17, %v10608_v42  ;;  %v6327_v45 = vpop.f32.mrb[114].mxu0  ;;  %v10610_v42 = vld [vmem:[#allocation34_spill] sm:$0xff] }
 0x967   : > { %v4348_v27 = vadd.f32 %v6327_v45, %v4137_v30  ;;  %4429 = vmax.xlane.f32.xlu1 %v9794_v33  ;;  %v4342_v3 = vpop.f32.mrb[115].mxu0 }
 0x968   : > { %4427 = vmax.xlane.f32.xlu0 %v9797_v62  ;;  %v4343_v5 = vadd.f32 %v4342_v3, %v4133_v14  ;;  %v10612_v14 = vld [vmem:[#allocation37_spill] sm:$0xff] }
 0x969   : > { %v9804_v0 = vadd.f32 %v4348_v27, %v10609_v59  ;;  %v4185_v29 = vpop.permute.xlu1 %4184 }
 0x96a   : > { %v6330_v26 = vpop.f32.mrb[116].mxu0  ;;  %v9808_v39 = vadd.f32 %v4343_v5, %v10610_v42  ;;  %v4586_v5 = vpop.permute.xlu0 %4585 }
 0x96b   : > { %4433 = vmax.xlane.f32.xlu1 %v9804_v0  ;;  %v4352_v40 = vpop.f32.mrb[117].mxu0  ;;  %v4358_v30 = vadd.f32 %v6330_v26, %v4145_v34 }
 0x96c   : > { %v4353_v17 = vadd.f32 %v4352_v40, %v4141_v12 }
 0x96d   : > { %v4582_v45 = vpop.permute.xlu1 %4581  ;;  %v9816_v12 = vadd.f32 %v4358_v30, %v10612_v14 }
 0x96e   : > { %v9811_v37 = vadd.f32 %v4353_v17, %v10611_v7  ;;  %v6333_v22 = vpop.f32.mrb[118].mxu0  ;;  %6348 = vmatprep.subr.bf16.mxu1 %v4582_v45  ;;  %v10613_v17 = vld [vmem:[#allocation40_spill] sm:$0xff] }
 0x96f   : > { %v4362_v59 = vpop.f32.mrb[119].mxu0  ;;  %6349 = vmatpush3.bf16.msra.mxu1 %v4582_v45  ;;  %4431 = vmax.xlane.f32.xlu1 %v9808_v39  ;;  %v4368_v27 = vadd.f32 %v6333_v22, %v4153_v38  ;;  %v10614_v38 = vld [vmem:[#allocation39_spill] sm:$0xff] }
 0x970   : > { %6350 = vmatprep.subr.bf16.mxu1 %v4584_v15  ;;  %4435 = vmax.xlane.f32.xlu0 %v9811_v37  ;;  %v4363_v40 = vadd.f32 %v4362_v59, %v4149_v60 }
 0x971   : > { %v9820_v7 = vadd.f32 %v4368_v27, %v10585_v20  ;;  %v4588_v47 = vpop.permute.xlu1 %4587 }
 0x972   : > { %v6336_v3 = vpop.f32.mrb[120].mxu0 }
 0x973   : > { %v4378_v34 = vadd.f32 %v6336_v3, %v4161_v8  ;;  %v4372_v26 = vpop.f32.mrb[121].mxu0  ;;  %6351 = vmatpush3.bf16.msra.mxu1 %v4584_v15  ;;  %4437 = vmax.xlane.f32.xlu1 %v9816_v12  ;;  %v9828_v8 = vadd.f32 %v4363_v40, %v10614_v38  ;;  %v4590_v15 = vpop.permute.xlu0 %4589  ;;  %v10622_v38 = vld [vmem:[#allocation18_spill] sm:$0xff] }
 0x974   : > { %6352 = vmatprep.subr.bf16.mxu1 %v4586_v5  ;;  %v4373_v22 = vadd.f32 %v4372_v26, %v4157_v61 }
 0x975   : > { %v9823_v42 = vadd.f32 %v4378_v34, %v10613_v17  ;;  %v4592_v34 = vpop.permute.xlu1 %4591 }
 0x976   : > { %v6339_v45 = vpop.f32.mrb[122].mxu0 }
 0x977   : > { %v4388_v30 = vadd.f32 %v6339_v45, %v4169_v28  ;;  %v4382_v14 = vpop.f32.mrb[123].mxu0  ;;  %6353 = vmatpush3.bf16.msra.mxu1 %v4586_v5  ;;  %4441 = vmax.xlane.f32.xlu1 %v9820_v7  ;;  %v10615_v28 = vld [vmem:[#allocation41_spill] sm:$0xff]  ;;  %v10618_v45 = vld [vmem:[#allocation16_spill] sm:$0xff] }
 0x978   : > { %4445 = vmax.xlane.f32.xlu0 %v9823_v42  ;;  %6354 = vmatprep.subr.bf16.mxu1 %v4588_v47  ;;  %v9836_v3 = vadd.f32 %v4373_v22, %v10615_v28  ;;  %v4383_v5 = vadd.f32 %v4382_v14, %v9791_v46  ;;  %v10620_v14 = vld [vmem:[#allocation10_spill] sm:$0xff]  ;;  %v10623_v22 = vld [vmem:[#allocation17_spill] sm:$0xff] }
 0x979   : > { %v9831_v20 = vadd.f32 %v4388_v30, %v8524_v48  ;;  %v10619_v30 = vld [vmem:[#allocation25_spill] sm:$0xff] }
 0x97a   : > { %v6342_v60 = vpop.f32.mrb[124].mxu0 }
 0x97b   : > { %v4398_v59 = vadd.f32 %v6342_v60, %v4177_v18  ;;  %v4392_v27 = vpop.f32.mrb[125].mxu0  ;;  %6355 = vmatpush3.bf16.msra.mxu1 %v4588_v47  ;;  %4439 = vmax.xlane.f32.xlu1 %v9828_v8  ;;  %v9845_v47 = vadd.f32 %v4383_v5, %v8534_v58  ;;  %v10625_v60 = vld [vmem:[#allocation14_spill] sm:$0xff] }
 0x97c   : > { %4449 = vmax.xlane.f32.xlu0 %v9831_v20  ;;  %6356 = vmatprep.subr.bf16.mxu1 %v4590_v15  ;;  %v4393_v18 = vadd.f32 %v4392_v27, %v9799_v53  ;;  %v10616_v53 = vld [vmem:[#allocation22_spill] sm:$0xff] }
 0x97d   : > { %v9840_v61 = vadd.f32 %v4398_v59, %v8545_v52  ;;  %v4181_v52 = vpop.permute.xlu0 %4180  ;;  %v10637_v59 = vld [vmem:[#allocation52_spill] sm:$0xff] }
 0x97e   : > { %v6345_v48 = vpop.f32.mrb[126].mxu0 }
 0x97f   : > { %v4408_v26 = vadd.f32 %v6345_v48, %v4185_v29  ;;  %v4402_v40 = vpop.f32.mrb[127].mxu0  ;;  %6357 = vmatpush3.bf16.msra.mxu1 %v4590_v15  ;;  %4443 = vmax.xlane.f32.xlu1 %v9836_v3  ;;  %v9854_v29 = vadd.f32 %v4393_v18, %v8558_v56  ;;  %v10621_v56 = vld [vmem:[#allocation7_spill] sm:$0xff] }
 0x980   : > { %4453 = vmax.xlane.f32.xlu0 %v9840_v61  ;;  %6358 = vmatprep.subr.bf16.mxu1 %v4592_v34  ;;  %v4403_v17 = vadd.f32 %v4402_v40, %v4181_v52  ;;  %v10626_v15 = vld [vmem:[#allocation15_spill] sm:$0xff]  ;;  %v10642_v40 = vld [vmem:[#allocation46_spill] sm:$0xff] }
 0x981   : > { %v9849_v46 = vadd.f32 %v4408_v26, %v8571_v10  ;;  %v10617_v10 = vld [vmem:[#allocation21_spill] sm:$0xff] }
 0x982   : > { %v9858_v58 = vadd.f32 %v4403_v17, %v8584_v51  ;;  %v10624_v51 = vld [vmem:[#allocation8_spill] sm:$0xff] }
 0x983   : > { %6359 = vmatpush3.bf16.msra.mxu1 %v4592_v34  ;;  %4447 = vmax.xlane.f32.xlu1 %v9845_v47 }
 0x984   : > { %4457 = vmax.xlane.f32.xlu0 %v9849_v46 }
 0x987   : > { %4451 = vmax.xlane.f32.xlu1 %v9854_v29 }
 0x98b   : > { %4455 = vmax.xlane.f32.xlu1 %v9858_v58 }
 0x98f   : > { %2545 = vadd.xlane.f32.xlu1 %v10616_v53 }
 0x993   : > { %2561 = vadd.xlane.f32.xlu1 %v10617_v10 }
 0x997   : > { %2563 = vadd.xlane.f32.xlu1 %v10618_v45 }
 0x99a   : > { %4593 = vrot.lane.b32.xlu0 %v10619_v30, %s10545_s14 }
 0x99b   : > { %2549 = vadd.xlane.f32.xlu1 %v10620_v14 }
 0x99f   : > { %2551 = vadd.xlane.f32.xlu1 %v10621_v56 }
 0x9a3   : > { %2565 = vadd.xlane.f32.xlu1 %v10622_v38 }
 0x9a7   : > { %2567 = vadd.xlane.f32.xlu1 %v10623_v22 }
 0x9ab   : > { %3526 = vadd.xlane.f32.xlu1 %v9618_v31  ;;  %v10627_v31 = vld [vmem:[#allocation13_spill] sm:$0xff] }
 0x9af   : > { %3528 = vadd.xlane.f32.xlu1 %v9620_v25  ;;  %v10628_v25 = vld [vmem:[#allocation11_spill] sm:$0xff] }
 0x9b3   : > { %3544 = vadd.xlane.f32.xlu1 %v9687_v2  ;;  %v10629_v2 = vld [vmem:[#allocation71_spill] sm:$0xff] }
 0x9b7   : > { %3532 = vadd.xlane.f32.xlu1 %v9626_v49  ;;  %v10630_v49 = vld [vmem:[#allocation23_spill] sm:$0xff] }
 0x9b9   : > { %2547 = vadd.xlane.f32.xlu0 %v10624_v51 }
 0x9bb   : > { %3548 = vadd.xlane.f32.xlu1 %v9693_v21  ;;  %v10631_v21 = vld [vmem:[#allocation19_spill] sm:$0xff] }
 0x9bd   : > { %3542 = vadd.xlane.f32.xlu0 %v9684_v13  ;;  %v10632_v13 = vld [vmem:[#allocation70_spill] sm:$0xff] }
 0x9bf   : > { %2555 = vadd.xlane.f32.xlu1 %v10625_v60 }
 0x9c1   : > { %3530 = vadd.xlane.f32.xlu0 %v9630_v63  ;;  %v10633_v63 = vld [vmem:[#allocation42_spill] sm:$0xff] }
 0x9c3   : > { %2571 = vadd.xlane.f32.xlu1 %v10626_v15 }
 0x9c5   : > { %3546 = vadd.xlane.f32.xlu0 %v9695_v35  ;;  %v10634_v35 = vld [vmem:[#allocation50_spill] sm:$0xff] }
 0x9c7   : > { %2559 = vadd.xlane.f32.xlu1 %v10627_v31 }
 0x9c9   : > { %2553 = vadd.xlane.f32.xlu0 %v10628_v25 }
 0x9cb   : > { %2575 = vadd.xlane.f32.xlu1 %v10629_v2 }
 0x9cd   : > { %2569 = vadd.xlane.f32.xlu0 %v10630_v49 }
 0x9cf   : > { %3536 = vadd.xlane.f32.xlu1 %v9669_v6  ;;  %v10635_v6 = vld [vmem:[#allocation44_spill] sm:$0xff] }
 0x9d1   : > { %2557 = vadd.xlane.f32.xlu0 %v10631_v21 }
 0x9d3   : > { %3552 = vadd.xlane.f32.xlu1 %v9699_v55  ;;  %v10636_v55 = vld [vmem:[#allocation43_spill] sm:$0xff] }
 0x9d5   : > { %2573 = vadd.xlane.f32.xlu0 %v10632_v13 }
 0x9d7   : > { %3540 = vadd.xlane.f32.xlu1 %v9676_v50  ;;  %v10638_v50 = vld [vmem:[#allocation51_spill] sm:$0xff] }
 0x9d9   : > { %3534 = vadd.xlane.f32.xlu0 %v9671_v36  ;;  %v10639_v36 = vld [vmem:[#allocation47_spill] sm:$0xff] }
 0x9db   : > { %3556 = vadd.xlane.f32.xlu1 %v9711_v11  ;;  %v10640_v11 = vld [vmem:[#allocation45_spill] sm:$0xff] }
 0x9dd   : > { %3550 = vadd.xlane.f32.xlu0 %v9701_v9 }
 0x9df   : > { %1631 = vadd.xlane.f32.xlu1 %v10633_v63 }
 0x9e1   : > { %3538 = vadd.xlane.f32.xlu0 %v9678_v1  ;;  %v10641_v1 = vld [vmem:[#allocation53_spill] sm:$0xff] }
 0x9e3   : > { %1647 = vadd.xlane.f32.xlu1 %v10634_v35 }
 0x9e5   : > { %3554 = vadd.xlane.f32.xlu0 %v9713_v19 }
 0x9e7   : > { %1635 = vadd.xlane.f32.xlu1 %v10635_v6 }
 0x9e9   : > { %1629 = vadd.xlane.f32.xlu0 %v10636_v55 }
 0x9eb   : > { %1651 = vadd.xlane.f32.xlu1 %v10637_v59 }
 0x9ed   : > { %1645 = vadd.xlane.f32.xlu0 %v10638_v50 }
 0x9ef   : > { %1639 = vadd.xlane.f32.xlu1 %v10639_v36 }
 0x9f1   : > { %1633 = vadd.xlane.f32.xlu0 %v10640_v11 }
 0x9f4   : > { %v4430_v9 = vpop.xlane.xlu1 %4429 }
 0x9f5   : > { %v4460_v27 = vsub.f32 %v9794_v33, %v4430_v9  ;;  %1649 = vadd.xlane.f32.xlu0 %v10641_v1  ;;  %v4428_v28 = vpop.xlane.xlu0 %4427 }
 0x9f6   : > { %v4459_v19 = vsub.f32 %v9797_v62, %v4428_v28 }
 0x9f7   : > { %v4477_v5 = vmul.f32 1.442695, %v4460_v27 }
 0x9f8   : > { %v4475_v48 = vmul.f32 1.442695, %v4459_v19  ;;  %v4434_v34 = vpop.xlane.xlu1 %4433 }
 0x9f9   : > { %7191 = vpow2.f32 %v4477_v5  ;;  %v4462_v26 = vsub.f32 %v9804_v0, %v4434_v34  ;;  %1637 = vadd.xlane.f32.xlu0 %v10642_v40 }
 0x9fa   : > { %7193 = vpow2.f32 %v4475_v48 }
 0x9fb   : > { %v4481_v18 = vmul.f32 1.442695, %v4462_v26 }
 0x9fc   : > { %v4432_v52 = vpop.xlane.xlu1 %4431 }
 0x9fd   : > { %7195 = vpow2.f32 %v4481_v18  ;;  %v4461_v17 = vsub.f32 %v9808_v39, %v4432_v52  ;;  %v4436_v33 = vpop.xlane.xlu0 %4435 }
 0x9fe   : > { %v4463_v53 = vsub.f32 %v9811_v37, %v4436_v33 }
 0x9ff   : > { %v4479_v10 = vmul.f32 1.442695, %v4461_v17 }
 0xa00   : > { %v4483_v45 = vmul.f32 1.442695, %v4463_v53  ;;  %v4438_v62 = vpop.xlane.xlu1 %4437 }
 0xa01   : > { %7197 = vpow2.f32 %v4479_v10  ;;  %v4464_v30 = vsub.f32 %v9816_v12, %v4438_v62 }
 0xa02   : > { %7199 = vpow2.f32 %v4483_v45 }
 0xa03   : > { %v7192_v14 = vpop.eup %7191  ;;  %v4485_v56 = vmul.f32 1.442695, %v4464_v30 }
 0xa04   : > { %v7194_v0 = vpop.eup %7193  ;;  %4509 = vadd.xlane.f32.xlu1 %v7192_v14  ;;  %v4442_v38 = vpop.xlane.xlu1 %4441 }
 0xa05   : > { %7201 = vpow2.f32 %v4485_v56  ;;  %v4466_v22 = vsub.f32 %v9820_v7, %v4442_v38  ;;  %v4446_v51 = vpop.xlane.xlu0 %4445  ;;  %4507 = vadd.xlane.f32.xlu0 %v7194_v0  ;;  %v4555_v39 = vpack.c.bf16 %v7192_v14, %v7194_v0  ;;  %v10643_v38 = vld [vmem:[#allocation54_spill] sm:$0xff] }
 0xa06   : > { %v4468_v37 = vsub.f32 %v9823_v42, %v4446_v51 }
 0xa07   : > { %v7196_v60 = vpop.eup %7195  ;;  %v4489_v15 = vmul.f32 1.442695, %v4466_v22  ;;  %6362 = vmatprep.mubr.bf16.mxu1 %v4555_v39 }
 0xa08   : > { %v4493_v31 = vmul.f32 1.442695, %v4468_v37  ;;  %4513 = vadd.xlane.f32.xlu1 %v7196_v60  ;;  %v4440_v12 = vpop.xlane.xlu1 %4439  ;;  %v10644_v37 = vld [vmem:[#allocation55_spill] sm:$0xff] }
 0xa09   : > { %7203 = vpow2.f32 %v4489_v15  ;;  %v4465_v25 = vsub.f32 %v9828_v8, %v4440_v12  ;;  %v4450_v2 = vpop.xlane.xlu0 %4449 }
 0xa0a   : > { %v4470_v49 = vsub.f32 %v9831_v20, %v4450_v2  ;;  %7205 = vpow2.f32 %v4493_v31  ;;  %v10647_v2 = vld [vmem:[#allocation56_spill] sm:$0xff] }
 0xa0b   : > { %v7198_v21 = vpop.eup %7197  ;;  %v4487_v13 = vmul.f32 1.442695, %v4465_v25  ;;  %v10646_v25 = vld [vmem:[#allocation49_spill] sm:$0xff] }
 0xa0c   : > { %v4497_v7 = vmul.f32 1.442695, %v4470_v49  ;;  %v4444_v63 = vpop.xlane.xlu1 %4443  ;;  %4511 = vadd.xlane.f32.xlu0 %v7198_v21  ;;  %v7200_v6 = vpop.eup %7199 }
 0xa0d   : > { %7207 = vpow2.f32 %v4487_v13  ;;  %v4467_v42 = vsub.f32 %v9836_v3, %v4444_v63  ;;  %v4454_v35 = vpop.xlane.xlu0 %4453 }
 0xa0e   : > { %v4472_v55 = vsub.f32 %v9840_v61, %v4454_v35  ;;  %7209 = vpow2.f32 %v4497_v7  ;;  %v10649_v7 = vld [vmem:[#allocation91_spill] sm:$0xff] }
 0xa0f   : > { %v7202_v59 = vpop.eup %7201  ;;  %v4491_v50 = vmul.f32 1.442695, %v4467_v42 }
 0xa10   : > { %v4501_v8 = vmul.f32 1.442695, %v4472_v55  ;;  %4517 = vadd.xlane.f32.xlu1 %v7202_v59  ;;  %v4448_v36 = vpop.xlane.xlu1 %4447  ;;  %4515 = vadd.xlane.f32.xlu0 %v7200_v6  ;;  %v4557_v40 = vpack.c.bf16 %v7202_v59, %v7200_v6  ;;  %v10650_v6 = vld [vmem:[#allocation57_spill] sm:$0xff] }
 0xa11   : > { %7211 = vpow2.f32 %v4491_v50  ;;  %v4469_v20 = vsub.f32 %v9845_v47, %v4448_v36  ;;  %v4458_v11 = vpop.xlane.xlu0 %4457 }
 0xa12   : > { %v4474_v9 = vsub.f32 %v9849_v46, %v4458_v11  ;;  %7213 = vpow2.f32 %v4501_v8  ;;  %v4556_v46 = vpack.c.bf16 %v7196_v60, %v7198_v21  ;;  %v10645_v60 = vld [vmem:[#allocation48_spill] sm:$0xff]  ;;  %v10648_v21 = vld [vmem:[#allocation89_spill] sm:$0xff]  ;;  %v10651_v8 = vld [vmem:[#allocation78_spill] sm:$0xff] }
 0xa13   : > { %v7204_v27 = vpop.eup %7203  ;;  %v4495_v1 = vmul.f32 1.442695, %v4469_v20  ;;  %v10652_v20 = vld [vmem:[#allocation80_spill] sm:$0xff] }
 0xa14   : > { %v4505_v3 = vmul.f32 1.442695, %v4474_v9  ;;  %4521 = vadd.xlane.f32.xlu1 %v7204_v27  ;;  %v4452_v28 = vpop.xlane.xlu1 %4451  ;;  %v7206_v5 = vpop.eup %7205 }
 0xa15   : > { %7215 = vpow2.f32 %v4495_v1  ;;  %v4471_v61 = vsub.f32 %v9854_v29, %v4452_v28  ;;  %v4594_v19 = vpop.permute.xlu0 %4593 }
 0xa16   : > { %6360 = vmatprep.subr.bf16.mxu1 %v4594_v19  ;;  %7217 = vpow2.f32 %v4505_v3 }
 0xa17   : > { %v7208_v48 = vpop.eup %7207  ;;  %v4499_v34 = vmul.f32 1.442695, %v4471_v61  ;;  %6361 = vmatpush3.bf16.msra.mxu1 %v4594_v19  ;;  %v10653_v61 = vld [vmem:[#allocation88_spill] sm:$0xff] }
 0xa18   : > { %v4456_v47 = vpop.xlane.xlu1 %4455  ;;  %4519 = vadd.xlane.f32.xlu0 %v7208_v48  ;;  %4525 = vadd.xlane.f32.xlu1 %v7206_v5  ;;  %v7210_v18 = vpop.eup %7209  ;;  %v4558_v45 = vpack.c.bf16 %v7204_v27, %v7208_v48 }
 0xa19   : > { %7219 = vpow2.f32 %v4499_v34  ;;  %v4473_v26 = vsub.f32 %v9858_v58, %v4456_v47 }
 0xa1a   : > { %6363 = vmatmul.mubr.bf16.vlgmr.msra.gmra.mrb[96].mxu1 %v4556_v46 }
 0xa1b   : > { %v7212_v52 = vpop.eup %7211  ;;  %v4503_v17 = vmul.f32 1.442695, %v4473_v26  ;;  %6366 = vmatprep.mubr.bf16.mxu1 %v4557_v40 }
 0xa1c   : > { %v9921_v29 = vpop.xlane.xlu1 %2545  ;;  %4523 = vadd.xlane.f32.xlu0 %v7212_v52  ;;  %4529 = vadd.xlane.f32.xlu1 %v7210_v18  ;;  %v7214_v33 = vpop.eup %7213  ;;  %v4559_v62 = vpack.c.bf16 %v7206_v5, %v7212_v52  ;;  %v10654_v5 = vld [vmem:[#allocation90_spill] sm:$0xff] }
 0xa1d   : > { %7221 = vpow2.f32 %v4503_v17 }
 0xa1f   : > { %v7216_v53 = vpop.eup %7215 }
 0xa20   : > { %v2562_v10 = vpop.xlane.xlu1 %2561  ;;  %4527 = vadd.xlane.f32.xlu0 %v7216_v53  ;;  %4533 = vadd.xlane.f32.xlu1 %v7214_v33  ;;  %v7218_v30 = vpop.eup %7217  ;;  %v4560_v22 = vpack.c.bf16 %v7210_v18, %v7216_v53 }
 0xa21   : > { %7223 = vrcp.f32 %v2562_v10 }
 0xa22   : > { %6367 = vmatmul.mubr.bf16.gmra.mrb[100].mxu1 %v4558_v45 }
 0xa23   : > { %v7220_v58 = vpop.eup %7219  ;;  %6370 = vmatprep.mubr.bf16.mxu1 %v4559_v62 }
 0xa24   : > { %v2564_v14 = vpop.xlane.xlu1 %2563  ;;  %4531 = vadd.xlane.f32.xlu0 %v7220_v58  ;;  %4537 = vadd.xlane.f32.xlu1 %v7218_v30  ;;  %v4561_v51 = vpack.c.bf16 %v7214_v33, %v7220_v58 }
 0xa25   : > { %7225 = vrcp.f32 %v2564_v14  ;;  %v10656_v14 = vld [vmem:[#allocation79_spill] sm:$0xff] }
 0xa27   : > { %v7222_v56 = vpop.eup %7221 }
 0xa28   : > { %v2550_v0 = vpop.xlane.xlu1 %2549  ;;  %4535 = vadd.xlane.f32.xlu0 %v7222_v56  ;;  %1655 = vadd.xlane.f32.xlu1 %v10643_v38  ;;  %v4562_v49 = vpack.c.bf16 %v7218_v30, %v7222_v56 }
 0xa29   : > { %7227 = vrcp.f32 %v2550_v0 }
 0xa2a   : > { %6371 = vmatmul.mubr.bf16.gmra.mrb[104].mxu1 %v4560_v22 }
 0xa2b   : > { %6374 = vmatprep.mubr.bf16.mxu1 %v4561_v51  ;;  %v7224_v15 = vpop.eup %7223 }
 0xa2c   : > { %v2552_v39 = vpop.xlane.xlu1 %2551  ;;  %1653 = vadd.xlane.f32.xlu0 %v10644_v37  ;;  %1643 = vadd.xlane.f32.xlu1 %v10645_v60  ;;  %v2746_v13 = vmul.f32 %v7224_v15, %v10648_v21 }
 0xa2d   : > { %7229 = vrcp.f32 %v2552_v39 }
 0xa2f   : > { %v7226_v31 = vpop.eup %7225 }
 0xa30   : > { %v2566_v12 = vpop.xlane.xlu1 %2565  ;;  %1641 = vadd.xlane.f32.xlu0 %v10646_v25  ;;  %1659 = vadd.xlane.f32.xlu1 %v10647_v2  ;;  %v2747_v63 = vmul.f32 %v7226_v31, %v10649_v7 }
 0xa31   : > { %7231 = vrcp.f32 %v2566_v12 }
 0xa32   : > { %6375 = vmatmul.mubr.bf16.gmra.mrb[108].mxu1 %v4562_v49  ;;  %v2758_v42 = vpack.c.bf16 %v2747_v63, %v2746_v13 }
 0xa33   : > { %v7228_v55 = vpop.eup %7227 }
 0xa34   : > { %v2568_v35 = vpop.xlane.xlu1 %2567  ;;  %1657 = vadd.xlane.f32.xlu0 %v10650_v6  ;;  %v2740_v36 = vmul.f32 %v7228_v55, %v10651_v8 }
 0xa35   : > { %7233 = vrcp.f32 %v2568_v35 }
 0xa37   : > { %v7230_v59 = vpop.eup %7229 }
 0xa38   : > { %v3527_v50 = vpop.xlane.xlu1 %3526  ;;  %v2741_v11 = vmul.f32 %v7230_v59, %v10652_v20 }
 0xa39   : > { %7235 = vrcp.f32 %v3527_v50  ;;  %v10658_v50 = vld [vmem:[#allocation83_spill] sm:$0xff] }
 0xa3a   : > { %v2755_v9 = vpack.c.bf16 %v2741_v11, %v2740_v36  ;;  %v10659_v36 = vld [vmem:[#allocation86_spill] sm:$0xff] }
 0xa3b   : > { %v7232_v1 = vpop.eup %7231 }
 0xa3c   : > { %v3529_v27 = vpop.xlane.xlu1 %3528  ;;  %v2748_v19 = vmul.f32 %v7232_v1, %v10653_v61  ;;  %v10660_v1 = vld [vmem:[#allocation93_spill] sm:$0xff] }
 0xa3d   : > { %7237 = vrcp.f32 %v3529_v27 }
 0xa3e   : > { %7239 = vrcp.f32 %v9921_v29 }
 0xa3f   : > { %v7234_v3 = vpop.eup %7233 }
 0xa40   : > { %v3545_v28 = vpop.xlane.xlu1 %3544  ;;  %v2749_v48 = vmul.f32 %v7234_v3, %v10654_v5 }
 0xa41   : > { %2778 = vrot.lane.b32.xlu1 %v2758_v42, %s10545_s14 }
 0xa42   : > { %v2759_v34 = vpack.c.bf16 %v2749_v48, %v2748_v19 }
 0xa43   : > { %v7236_v46 = vpop.eup %7235 }
 0xa44   : > { %v3533_v47 = vpop.xlane.xlu1 %3532  ;;  %v3719_v52 = vmul.f32 %v7236_v46, %v9761_v44  ;;  %v10657_v44 = vld [vmem:[#allocation81_spill] sm:$0xff]  ;;  %v10662_v46 = vld [vmem:[#allocation82_spill] sm:$0xff] }
 0xa45   : > { %2772 = vrot.lane.b32.xlu1 %v2755_v9, %s10545_s14 }
 0xa46   : > { %v2548_v26 = vpop.xlane.xlu0 %2547 }
 0xa47   : > { %v7238_v40 = vpop.eup %7237  ;;  %7241 = vrcp.f32 %v2548_v26 }
 0xa48   : > { %v3549_v18 = vpop.xlane.xlu1 %3548  ;;  %v3720_v17 = vmul.f32 %v7238_v40, %v9765_v23  ;;  %7243 = vrcp.f32 %v3545_v28  ;;  %v7240_v29 = vpop.eup %7239  ;;  %v10661_v28 = vld [vmem:[#allocation95_spill] sm:$0xff]  ;;  %v10663_v40 = vld [vmem:[#allocation85_spill] sm:$0xff] }
 0xa49   : > { %v2738_v56 = vmul.f32 %v7240_v29, %v10656_v14  ;;  %v10664_v29 = vld [vmem:[#allocation92_spill] sm:$0xff] }
 0xa4a   : > { %v3543_v33 = vpop.xlane.xlu0 %3542  ;;  %v3735_v53 = vpack.c.bf16 %v3720_v17, %v3719_v52 }
 0xa4b   : > { %7245 = vrcp.f32 %v3543_v33 }
 0xa4c   : > { %v2556_v10 = vpop.xlane.xlu1 %2555  ;;  %3751 = vrot.lane.b32.xlu1 %v3735_v53, %s10655_s0  ;;  %7247 = vrcp.f32 %v3533_v47 }
 0xa4e   : > { %v3531_v45 = vpop.xlane.xlu0 %3530 }
 0xa4f   : > { %7249 = vrcp.f32 %v3531_v45 }
 0xa50   : > { %v2572_v62 = vpop.xlane.xlu1 %2571  ;;  %7251 = vrcp.f32 %v3549_v18 }
 0xa51   : > { %v7242_v30 = vpop.eup %7241 }
 0xa52   : > { %v3547_v58 = vpop.xlane.xlu0 %3546  ;;  %v2739_v0 = vmul.f32 %v7242_v30, %v10657_v44  ;;  %v7244_v23 = vpop.eup %7243  ;;  %v10665_v30 = vld [vmem:[#allocation94_spill] sm:$0xff] }
 0xa53   : > { %7253 = vrcp.f32 %v3547_v58  ;;  %v3728_v60 = vmul.f32 %v7244_v23, %v9781_v4 }
 0xa54   : > { %v2560_v38 = vpop.xlane.xlu1 %2559  ;;  %v2754_v22 = vpack.c.bf16 %v2739_v0, %v2738_v56  ;;  %7255 = vrcp.f32 %v2556_v10 }
 0xa55   : > { %v7246_v51 = vpop.eup %7245 }
 0xa56   : > { %2770 = vrot.lane.b32.xlu0 %v2754_v22, %s10545_s14  ;;  %v2554_v39 = vpop.xlane.xlu0 %2553  ;;  %v3727_v37 = vmul.f32 %v7246_v51, %v9777_v43  ;;  %v7248_v15 = vpop.eup %7247 }
 0xa57   : > { %7257 = vrcp.f32 %v2554_v39  ;;  %v3722_v21 = vmul.f32 %v7248_v15, %v9763_v54  ;;  %v10666_v39 = vld [vmem:[#allocation38_spill] sm:$0xff] }
 0xa58   : > { %v2576_v31 = vpop.xlane.xlu1 %2575  ;;  %v3739_v12 = vpack.c.bf16 %v3728_v60, %v3727_v37  ;;  %7259 = vrcp.f32 %v2572_v62 }
 0xa59   : > { %v7250_v25 = vpop.eup %7249 }
 0xa5a   : > { %2780 = vrot.lane.b32.xlu0 %v2759_v34, %s10545_s14  ;;  %v2570_v2 = vpop.xlane.xlu0 %2569  ;;  %v3721_v49 = vmul.f32 %v7250_v25, %v9759_v41  ;;  %v7252_v13 = vpop.eup %7251 }
 0xa5b   : > { %7261 = vrcp.f32 %v2570_v2  ;;  %v3730_v35 = vmul.f32 %v7252_v13, %v9779_v32  ;;  %v10669_v13 = vld [vmem:[#allocation72_spill] sm:$0xff] }
 0xa5c   : > { %v3537_v7 = vpop.xlane.xlu1 %3536  ;;  %v3736_v63 = vpack.c.bf16 %v3722_v21, %v3721_v49  ;;  %7263 = vrcp.f32 %v2560_v38  ;;  %v10668_v49 = vld [vmem:[#allocation26_spill] sm:$0xff] }
 0xa5d   : > { %v7254_v43 = vpop.eup %7253 }
 0xa5e   : > { %3759 = vrot.lane.b32.xlu0 %v3739_v12, %s10655_s0  ;;  %3753 = vrot.lane.b32.xlu1 %v3736_v63, %s10655_s0  ;;  %v2558_v4 = vpop.xlane.xlu0 %2557  ;;  %v3729_v42 = vmul.f32 %v7254_v43, %v9775_v24  ;;  %v7256_v6 = vpop.eup %7255 }
 0xa5f   : > { %7265 = vrcp.f32 %v2558_v4  ;;  %v2743_v20 = vmul.f32 %v7256_v6, %v10659_v36  ;;  %v10670_v4 = vld [vmem:[#allocation27_spill] sm:$0xff] }
 0xa60   : > { %v3553_v41 = vpop.xlane.xlu1 %3552  ;;  %v3740_v55 = vpack.c.bf16 %v3730_v35, %v3729_v42  ;;  %7267 = vrcp.f32 %v2576_v31  ;;  %v10667_v31 = vld [vmem:[#allocation74_spill] sm:$0xff] }
 0xa61   : > { %v7258_v54 = vpop.eup %7257 }
 0xa62   : > { %3761 = vrot.lane.b32.xlu0 %v3740_v55, %s10655_s0  ;;  %v2574_v59 = vpop.xlane.xlu0 %2573  ;;  %v2742_v8 = vmul.f32 %v7258_v54, %v10658_v50  ;;  %v7260_v11 = vpop.eup %7259  ;;  %v10671_v54 = vld [vmem:[#allocation28_spill] sm:$0xff] }
 0xa63   : > { %7269 = vrcp.f32 %v2574_v59  ;;  %v2751_v61 = vmul.f32 %v7260_v11, %v10661_v28 }
 0xa64   : > { %7271 = vrcp.f32 %v3537_v7  ;;  %v3541_v9 = vpop.xlane.xlu1 %3540  ;;  %v2756_v24 = vpack.c.bf16 %v2743_v20, %v2742_v8 }
 0xa65   : > { %v7262_v27 = vpop.eup %7261  ;;  %7273 = vrcp.f32 %v3541_v9  ;;  %v10672_v9 = vld [vmem:[#allocation30_spill] sm:$0xff] }
 0xa66   : > { %2774 = vrot.lane.b32.xlu1 %v2756_v24, %s10545_s14  ;;  %v3535_v32 = vpop.xlane.xlu0 %3534  ;;  %v2750_v3 = vmul.f32 %v7262_v27, %v10660_v1  ;;  %v7264_v19 = vpop.eup %7263  ;;  %v10673_v27 = vld [vmem:[#allocation58_spill] sm:$0xff] }
 0xa67   : > { %7275 = vrcp.f32 %v3535_v32  ;;  %v2745_v18 = vmul.f32 %v7264_v19, %v10663_v40  ;;  %v10674_v19 = vld [vmem:[#allocation66_spill] sm:$0xff]  ;;  %v10676_v40 = vld [vmem:[#allocation36_spill] sm:$0xff] }
 0xa68   : > { %7277 = vrcp.f32 %v3553_v41  ;;  %v3557_v5 = vpop.xlane.xlu1 %3556  ;;  %v2760_v48 = vpack.c.bf16 %v2751_v61, %v2750_v3 }
 0xa69   : > { %v7266_v34 = vpop.eup %7265  ;;  %7279 = vrcp.f32 %v3557_v5 }
 0xa6a   : > { %2782 = vrot.lane.b32.xlu0 %v2760_v48, %s10545_s14  ;;  %v3551_v47 = vpop.xlane.xlu0 %3550  ;;  %v2744_v26 = vmul.f32 %v7266_v34, %v10662_v46  ;;  %v7268_v52 = vpop.eup %7267  ;;  %v10675_v48 = vld [vmem:[#allocation64_spill] sm:$0xff] }
 0xa6b   : > { %7281 = vrcp.f32 %v3551_v47  ;;  %v2753_v58 = vmul.f32 %v7268_v52, %v10665_v30  ;;  %v10677_v52 = vld [vmem:[#allocation29_spill] sm:$0xff] }
 0xa6c   : > { %v1632_v17 = vpop.xlane.xlu1 %1631  ;;  %v2757_v33 = vpack.c.bf16 %v2745_v18, %v2744_v26 }
 0xa6d   : > { %v7270_v53 = vpop.eup %7269 }
 0xa6e   : > { %v7272_v10 = vpop.eup %7271  ;;  %2776 = vrot.lane.b32.xlu1 %v2757_v33, %s10545_s14  ;;  %v3539_v45 = vpop.xlane.xlu0 %3538  ;;  %v2752_v62 = vmul.f32 %v7270_v53, %v10664_v29 }
 0xa6f   : > { %v7274_v14 = vpop.eup %7273  ;;  %7283 = vrcp.f32 %v3539_v45  ;;  %v3724_v37 = vmul.f32 %v7272_v10, %v10666_v39  ;;  %v10678_v45 = vld [vmem:[#allocation63_spill] sm:$0xff] }
 0xa70   : > { %v1648_v56 = vpop.xlane.xlu1 %1647  ;;  %v2761_v44 = vpack.c.bf16 %v2753_v58, %v2752_v62  ;;  %v9966_v0 = vmul.f32 %v7274_v14, %v9771_v57  ;;  %v10679_v62 = vld [vmem:[#allocation65_spill] sm:$0xff] }
 0xa71   : > { %v7276_v23 = vpop.eup %7275 }
 0xa72   : > { %v7278_v38 = vpop.eup %7277  ;;  %2784 = vrot.lane.b32.xlu0 %v2761_v44, %s10545_s14  ;;  %v3555_v22 = vpop.xlane.xlu0 %3554  ;;  %v3723_v51 = vmul.f32 %v7276_v23, %v9769_v16  ;;  %v10680_v44 = vld [vmem:[#allocation62_spill] sm:$0xff]  ;;  %s7373_s14 = scalar_lea.vmem %s7372_s23, 4096 }
 0xa73   : > { %v7280_v60 = vpop.eup %7279  ;;  %7285 = vrcp.f32 %v3555_v22  ;;  %v3732_v7 = vmul.f32 %v7278_v38, %v10669_v13  ;;  %v10681_v38 = vld [vmem:[#allocation60_spill] sm:$0xff] }
 0xa74   : > { %v3737_v15 = vpack.c.bf16 %v3724_v37, %v3723_v51  ;;  %v9972_v12 = vmul.f32 %v7280_v60, %v10667_v31  ;;  %7287 = vrcp.f32 %v1632_v17  ;;  %v1636_v2 = vpop.xlane.xlu1 %1635  ;;  %v7055_v37 = vld [vmem:[%s10238_s4] sm:$0xff]   ;;  %v7056_v60 = vld [vmem:[%s10238_s4 + $0x8] sm:$0xff]   ;;  %v7057_v31 = vld [vmem:[%s10238_s4 + $0x10] sm:$0xff]  }
 0xa75   : > { %v7282_v25 = vpop.eup %7281  ;;  %6378 = vmatprep.subr.bf16.mxu0 %v7055_v37  ;;  %6858 = vmatprep.subr.bf16.mxu1 %v7055_v37 }
 0xa76   : > { %3755 = vrot.lane.b32.xlu1 %v3737_v15, %s10655_s0  ;;  %v1630_v57 = vpop.xlane.xlu0 %1629  ;;  %v3731_v21 = vmul.f32 %v7282_v25, %v10668_v49  ;;  %6379 = vmatpush3.bf16.msra.mxu0 %v7055_v37 }
 0xa77   : > { %7289 = vrcp.f32 %v1630_v57  ;;  %6866 = vmatpush3.bf16.msra.mxu1 %v7055_v37  ;;  %6380 = vmatprep.subr.bf16.mxu0 %v7056_v60  ;;  %v7058_v57 = vld [vmem:[%s10238_s4 + $0x18] sm:$0xff]  }
 0xa78   : > { %v3741_v16 = vpack.c.bf16 %v3732_v7, %v3731_v21  ;;  %7291 = vrcp.f32 %v1648_v56  ;;  %v1652_v35 = vpop.xlane.xlu1 %1651  ;;  %6859 = vmatprep.subr.bf16.mxu1 %v7056_v60  ;;  %v7059_v21 = vld [vmem:[%s10238_s4 + $0x20] sm:$0xff]  }
 0xa79   : > { %v7284_v63 = vpop.eup %7283 }
 0xa7a   : > { %3763 = vrot.lane.b32.xlu0 %v3741_v16, %s10655_s0  ;;  %v1646_v43 = vpop.xlane.xlu0 %1645  ;;  %v9979_v42 = vmul.f32 %v7284_v63, %v10670_v4  ;;  %6381 = vmatpush3.bf16.msra.mxu0 %v7056_v60 }
 0xa7b   : > { %7293 = vrcp.f32 %v1646_v43  ;;  %6867 = vmatpush3.bf16.msra.mxu1 %v7056_v60  ;;  %6382 = vmatprep.subr.bf16.mxu0 %v7057_v31 }
 0xa7c   : > { %v3738_v6 = vpack.c.bf16 %v9966_v0, %v9979_v42  ;;  %7295 = vrcp.f32 %v1636_v2  ;;  %v1640_v20 = vpop.xlane.xlu1 %1639  ;;  %6860 = vmatprep.subr.bf16.mxu1 %v7057_v31 }
 0xa7d   : > { %v7286_v41 = vpop.eup %7285 }
 0xa7e   : > { %v1634_v55 = vpop.xlane.xlu0 %1633  ;;  %v9984_v59 = vmul.f32 %v7286_v41, %v10671_v54  ;;  %v7288_v50 = vpop.eup %7287  ;;  %6383 = vmatpush3.bf16.msra.mxu0 %v7057_v31 }
 0xa7f   : > { %7297 = vrcp.f32 %v1634_v55  ;;  %v1791_v32 = vmul.f32 %v7288_v50, %v10673_v27  ;;  %6868 = vmatpush3.bf16.msra.mxu1 %v7057_v31  ;;  %6384 = vmatprep.subr.bf16.mxu0 %v7058_v57  ;;  %v7060_v31 = vld [vmem:[%s10238_s4 + $0x28] sm:$0xff]  }
 0xa80   : > { %v3742_v8 = vpack.c.bf16 %v9972_v12, %v9984_v59  ;;  %7299 = vrcp.f32 %v1652_v35  ;;  %6861 = vmatprep.subr.bf16.mxu1 %v7058_v57 }
 0xa81   : > { %v7290_v36 = vpop.eup %7289 }
 0xa82   : > { %v1650_v11 = vpop.xlane.xlu0 %1649  ;;  %v1790_v24 = vmul.f32 %v7290_v36, %v10672_v9  ;;  %v7292_v1 = vpop.eup %7291  ;;  %6385 = vmatpush3.bf16.msra.mxu0 %v7058_v57 }
 0xa83   : > { %7301 = vrcp.f32 %v1650_v11  ;;  %v1799_v5 = vmul.f32 %v7292_v1, %v10674_v19  ;;  %6869 = vmatpush3.bf16.msra.mxu1 %v7058_v57  ;;  %6386 = vmatprep.subr.bf16.mxu0 %v7059_v21 }
 0xa84   : > { %v1806_v3 = vpack.c.bf16 %v1791_v32, %v1790_v24  ;;  %7303 = vrcp.f32 %v1640_v20  ;;  %6862 = vmatprep.subr.bf16.mxu1 %v7059_v21 }
 0xa85   : > { %v7294_v28 = vpop.eup %7293 }
 0xa86   : > { %v1638_v61 = vpop.xlane.xlu0 %1637  ;;  %v1798_v34 = vmul.f32 %v7294_v28, %v10675_v48  ;;  %1814 = vst.msk [vmem:[#allocation3] sm:$0xff] %vm1034_vm0, %v1806_v3  ;;  %v7296_v47 = vpop.eup %7295  ;;  %6387 = vmatpush3.bf16.msra.mxu0 %v7059_v21 }
 0xa87   : > { %7305 = vrcp.f32 %v1638_v61  ;;  %v1793_v18 = vmul.f32 %v7296_v47, %v10676_v40  ;;  %6870 = vmatpush3.bf16.msra.mxu1 %v7059_v21  ;;  %v10682_v61 = vld [vmem:[#allocation68_spill] sm:$0xff]  ;;  %6388 = vmatprep.subr.bf16.mxu0 %v7060_v31 }
 0xa88   : > { %v1810_v46 = vpack.c.bf16 %v1799_v5, %v1798_v34  ;;  %v10683_v5 = vld [vmem:[#allocation9_spill] sm:$0xff]  ;;  %6863 = vmatprep.subr.bf16.mxu1 %v7060_v31 }
 0xa89   : > { %v7298_v26 = vpop.eup %7297 }
 0xa8a   : > { %1818 = vst.msk [vmem:[#allocation3 + $0x20] sm:$0xff] %vm1034_vm0, %v1810_v46  ;;  %v1792_v17 = vmul.f32 %v7298_v26, %v10677_v52  ;;  %v7300_v33 = vpop.eup %7299  ;;  %v10684_v52 = vld [vmem:[#allocation61_spill] sm:$0xff]  ;;  %6389 = vmatpush3.bf16.msra.mxu0 %v7060_v31 }
 0xa8b   : > { %v1801_v30 = vmul.f32 %v7300_v33, %v10679_v62  ;;  %v10685_v33 = vld [vmem:[#allocation59_spill] sm:$0xff]  ;;  %6871 = vmatpush3.bf16.msra.mxu1 %v7060_v31 }
 0xa8c   : > { %v1807_v53 = vpack.c.bf16 %v1793_v18, %v1792_v17  ;;  %v10686_v62 = vld [vmem:[#allocation67_spill] sm:$0xff] }
 0xa8d   : > { %v7302_v10 = vpop.eup %7301 }
 0xa8e   : > { %1815 = vst.msk [vmem:[#allocation3 + $0x8] sm:$0xff] %vm1034_vm0, %v1807_v53  ;;  %v1800_v29 = vmul.f32 %v7302_v10, %v10678_v45  ;;  %v7304_v58 = vpop.eup %7303 }
 0xa8f   : > { %v1795_v23 = vmul.f32 %v7304_v58, %v10680_v44  ;;  %v10687_v58 = vld [vmem:[#allocation69_spill] sm:$0xff] }
 0xa90   : > { %v1811_v14 = vpack.c.bf16 %v1801_v30, %v1800_v29 }
 0xa91   : > { %v7306_v56 = vpop.eup %7305  ;;  %v10002_v51 = vpop.xlane.xlu1 %4509 }
 0xa92   : > { %1819 = vst.msk [vmem:[#allocation3 + $0x28] sm:$0xff] %vm1034_vm0, %v1811_v14  ;;  %v1794_v22 = vmul.f32 %v7306_v56, %v10681_v38  ;;  %v10011_v15 = vpop.xlane.xlu0 %4507 }
 0xa94   : > { %v1808_v39 = vpack.c.bf16 %v1795_v23, %v1794_v22 }
 0xa95   : > { %v10016_v25 = vpop.xlane.xlu1 %4513 }
 0xa96   : > { %1816 = vst.msk [vmem:[#allocation3 + $0x10] sm:$0xff] %vm1034_vm0, %v1808_v39 }
 0xa99   : > { %v10018_v2 = vpop.xlane.xlu0 %4511 }
 0xa9d   : > { %v10023_v49 = vpop.xlane.xlu1 %4517  ;;  %v10028_v13 = vpop.xlane.xlu0 %4515 }
 0xaa1   : > { %v10030_v7 = vpop.xlane.xlu1 %4521 }
 0xaa5   : > { %v10032_v16 = vpop.xlane.xlu1 %4525  ;;  %v10034_v63 = vpop.xlane.xlu0 %4519 }
 0xaa9   : > { %v10036_v43 = vpop.xlane.xlu1 %4529  ;;  %v10038_v4 = vpop.xlane.xlu0 %4523 }
 0xaad   : > { %v10040_v35 = vpop.xlane.xlu1 %4533  ;;  %v10042_v41 = vpop.xlane.xlu0 %4527 }
 0xab1   : > { %v10044_v55 = vpop.xlane.xlu1 %4537  ;;  %v10046_v54 = vpop.xlane.xlu0 %4531 }
 0xab5   : > { %v1656_v50 = vpop.xlane.xlu1 %1655  ;;  %v10048_v36 = vpop.xlane.xlu0 %4535 }
 0xab6   : > { %7307 = vrcp.f32 %v1656_v50 }
 0xab9   : > { %v1644_v20 = vpop.xlane.xlu1 %1643  ;;  %v1654_v11 = vpop.xlane.xlu0 %1653 }
 0xaba   : > { %7309 = vrcp.f32 %v1654_v11 }
 0xabb   : > { %7311 = vrcp.f32 %v1644_v20 }
 0xabd   : > { %v1660_v9 = vpop.xlane.xlu1 %1659  ;;  %v1642_v24 = vpop.xlane.xlu0 %1641 }
 0xabe   : > { %7313 = vrcp.f32 %v1642_v24 }
 0xabf   : > { %7315 = vrcp.f32 %v1660_v9 }
 0xac0   : > { %v7308_v1 = vpop.eup %7307 }
 0xac1   : > { %v2779_v27 = vpop.permute.xlu1 %2778  ;;  %v1658_v32 = vpop.xlane.xlu0 %1657  ;;  %v1803_v48 = vmul.f32 %v7308_v1, %v10683_v5 }
 0xac2   : > { %2799 = vst.msk [vmem:[#allocation3 + $0x20] sm:$0xff] %vm2794_vm1, %v2779_v27  ;;  %7317 = vrcp.f32 %v1658_v32 }
 0xac3   : > { %7319 = vrcp.f32 %v10018_v2 }
 0xac4   : > { %v7310_v3 = vpop.eup %7309  ;;  %7321 = vrcp.f32 %v10011_v15  ;;  %v7061_v15 = vld [vmem:[%s10238_s4 + $0x30] sm:$0xff]  }
 0xac5   : > { %v2773_v28 = vpop.permute.xlu1 %2772  ;;  %v1802_v19 = vmul.f32 %v7310_v3, %v10682_v61  ;;  %v7312_v34 = vpop.eup %7311  ;;  %7323 = vrcp.f32 %v10016_v25  ;;  %6390 = vmatprep.subr.bf16.mxu0 %v7061_v15  ;;  %6864 = vmatprep.subr.bf16.mxu1 %v7061_v15 }
 0xac6   : > { %2796 = vst.msk [vmem:[#allocation3 + $0x8] sm:$0xff] %vm2794_vm1, %v2773_v28  ;;  %v1797_v17 = vmul.f32 %v7312_v34, %v10684_v52  ;;  %7325 = vrcp.f32 %v10002_v51  ;;  %6391 = vmatpush3.bf16.msra.mxu0 %v7061_v15  ;;  %6872 = vmatpush3.bf16.msra.mxu1 %v7061_v15 }
 0xac7   : > { %v1812_v46 = vpack.c.bf16 %v1803_v48, %v1802_v19  ;;  %7327 = vrcp.f32 %v10034_v63 }
 0xac8   : > { %v2771_v47 = vpop.permute.xlu0 %2770  ;;  %v7314_v26 = vpop.eup %7313  ;;  %7329 = vrcp.f32 %v10028_v13  ;;  %v7062_v13 = vld [vmem:[%s10238_s4 + $0x38] sm:$0xff]  }
 0xac9   : > { %2795 = vst.msk [vmem:[#allocation3] sm:$0xff] %vm2794_vm1, %v2771_v47  ;;  %v3752_v40 = vpop.permute.xlu1 %3751  ;;  %v7316_v18 = vpop.eup %7315  ;;  %v1796_v53 = vmul.f32 %v7314_v26, %v10685_v33  ;;  %7331 = vrcp.f32 %v10030_v7  ;;  %6392 = vmatprep.subr.bf16.mxu0 %v7062_v13  ;;  %6865 = vmatprep.subr.bf16.mxu1 %v7062_v13 }
 0xaca   : > { %3776 = vst.msk [vmem:[#allocation3] sm:$0xff] %vm3775_vm2, %v3752_v40  ;;  %v1805_v14 = vmul.f32 %v7316_v18, %v10687_v58  ;;  %7333 = vrcp.f32 %v10023_v49  ;;  %6393 = vmatpush3.bf16.msra.mxu0 %v7062_v13  ;;  %6873 = vmatpush3.bf16.msra.mxu1 %v7062_v13 }
 0xacb   : > { %1820 = vst.msk [vmem:[#allocation3 + $0x30] sm:$0xff] %vm1034_vm0, %v1812_v46  ;;  %v1809_v29 = vpack.c.bf16 %v1797_v17, %v1796_v53  ;;  %7335 = vrcp.f32 %v10042_v41 }
 0xacc   : > { %v7318_v10 = vpop.eup %7317  ;;  %v2781_v45 = vpop.permute.xlu0 %2780  ;;  %7337 = vrcp.f32 %v10038_v4 }
 0xacd   : > { %2800 = vst.msk [vmem:[#allocation3 + $0x28] sm:$0xff] %vm2794_vm1, %v2781_v45  ;;  %v1804_v30 = vmul.f32 %v7318_v10, %v10686_v62  ;;  %v7320_v25 = vpop.eup %7319  ;;  %7339 = vrcp.f32 %v10036_v43 }
 0xace   : > { %1817 = vst.msk [vmem:[#allocation3 + $0x18] sm:$0xff] %vm1034_vm0, %v1809_v29  ;;  %v7322_v21 = vpop.eup %7321  ;;  %7341 = vrcp.f32 %v10032_v16 }
 0xacf   : > { %v1813_v56 = vpack.c.bf16 %v1805_v14, %v1804_v30  ;;  %v7324_v20 = vpop.eup %7323  ;;  %7343 = vrcp.f32 %v10048_v36 }
 0xad0   : > { %v3754_v44 = vpop.permute.xlu1 %3753  ;;  %v3760_v23 = vpop.permute.xlu0 %3759  ;;  %7345 = vrcp.f32 %v10046_v54 }
 0xad1   : > { %3777 = vst.msk [vmem:[#allocation3 + $0x8] sm:$0xff] %vm3775_vm2, %v3754_v44  ;;  %3780 = vst.msk [vmem:[#allocation3 + $0x20] sm:$0xff] %vm3775_vm2, %v3760_v23  ;;  %v7326_v7 = vpop.eup %7325  ;;  %7347 = vrcp.f32 %v10044_v55 }
 0xad2   : > { %1821 = vst.msk [vmem:[#allocation3 + $0x38] sm:$0xff] %vm1034_vm0, %v1813_v56  ;;  %v7328_v3 = vpop.eup %7327  ;;  %7349 = vrcp.f32 %v10040_v35  ;;  %vm4756_vm0 = vcmask 1048320  }
 0xad3   : > { %v7330_v61 = vpop.eup %7329 }
 0xad4   : > { %v3762_v38 = vpop.permute.xlu0 %3761  ;;  %v7332_v48 = vpop.eup %7331 }
 0xad5   : > { %3781 = vst.msk [vmem:[#allocation3 + $0x28] sm:$0xff] %vm3775_vm2, %v3762_v38  ;;  %v7334_v46 = vpop.eup %7333 }
 0xad6   : > { %v7336_v16 = vpop.eup %7335 }
 0xad7   : > { %v7338_v52 = vpop.eup %7337 }
 0xad8   : > { %v2775_v22 = vpop.permute.xlu1 %2774  ;;  %v7340_v53 = vpop.eup %7339 }
 0xad9   : > { %2797 = vst.msk [vmem:[#allocation3 + $0x10] sm:$0xff] %vm2794_vm1, %v2775_v22  ;;  %v7342_v45 = vpop.eup %7341 }
 0xadc   : > { %v2783_v39 = vpop.permute.xlu0 %2782 }
 0xadd   : > { %2801 = vst.msk [vmem:[#allocation3 + $0x30] sm:$0xff] %vm2794_vm1, %v2783_v39 }
 0xae0   : > { %v2777_v37 = vpop.permute.xlu1 %2776 }
 0xae1   : > { %2798 = vst.msk [vmem:[#allocation3 + $0x18] sm:$0xff] %vm2794_vm1, %v2777_v37 }
 0xae4   : > { %v2785_v60 = vpop.permute.xlu0 %2784 }
 0xae5   : > { %2802 = vst.msk [vmem:[#allocation3 + $0x38] sm:$0xff] %vm2794_vm1, %v2785_v60 }
 0xae8   : > { %v3756_v57 = vpop.permute.xlu1 %3755 }
 0xae9   : > { %3778 = vst.msk [vmem:[#allocation3 + $0x10] sm:$0xff] %vm3775_vm2, %v3756_v57 }
 0xaec   : > { %v3764_v51 = vpop.permute.xlu0 %3763 }
 0xaed   : > { %3782 = vst.msk [vmem:[#allocation3 + $0x30] sm:$0xff] %vm3775_vm2, %v3764_v51  ;;  %v6364_v2 = vpop.f32.mrb[96].mxu1 }
 0xaee   : > { %v4702_v50 = vmul.f32 %v7320_v25, %v6364_v2  ;;  %v4637_v63 = vpop.f32.mrb[97].mxu1 }
 0xaef   : > { %v4700_v11 = vmul.f32 %v7322_v21, %v4637_v63  ;;  %v6365_v9 = vpop.f32.mrb[98].mxu1 }
 0xaf0   : > { %v4703_v24 = vmul.f32 %v7324_v20, %v6365_v9  ;;  %v4640_v27 = vpop.f32.mrb[99].mxu1 }
 0xaf1   : > { %v4701_v32 = vmul.f32 %v7326_v7, %v4640_v27  ;;  %v10128_v27 = vld [vmem:[%s10239_s5] ss:$0 sm:$0xff] }
 0xaf2   : > { %v4717_v1 = vpack.c.bf16 %v4703_v24, %v4702_v50 }
 0xaf3   : > { %v4716_v49 = vpack.c.bf16 %v4701_v32, %v4700_v11 }
 0xaf4   : > { %4734 = vrot.lane.b32.xlu1 %v4717_v1, %s10483_s19 }
 0xaf5   : > { %v6368_v28 = vpop.f32.mrb[100].mxu1 }
 0xaf6   : > { %v4706_v19 = vmul.f32 %v7328_v3, %v6368_v28  ;;  %v4653_v5 = vpop.f32.mrb[101].mxu1 }
 0xaf7   : > { %v4704_v34 = vmul.f32 %v7330_v61, %v4653_v5  ;;  %v6369_v47 = vpop.f32.mrb[102].mxu1  ;;  %v7351_v61 = vld [vmem:[%s7547_s17 + $0x10] sm:$0xff] }
 0xaf8   : > { %v4707_v26 = vmul.f32 %v7332_v48, %v6369_v47  ;;  %v4656_v41 = vpop.f32.mrb[103].mxu1  ;;  %4732 = vrot.lane.b32.xlu1 %v4716_v49, %s10483_s19 }
 0xaf9   : > { %v4705_v4 = vmul.f32 %v7334_v46, %v4656_v41 }
 0xafa   : > { %v4719_v40 = vpack.c.bf16 %v4707_v26, %v4706_v19  ;;  %v7353_v26 = vld [vmem:[%s7547_s17 + $0x18] sm:$0xff] }
 0xafb   : > { %v4718_v18 = vpack.c.bf16 %v4705_v4, %v4704_v34  ;;  %v7352_v34 = vld [vmem:[%s7547_s17] sm:$0xff]  ;;  %v7354_v4 = vld [vmem:[%s7547_s17 + $0x8] sm:$0xff] }
 0xafc   : > { %3757 = vrot.lane.b32.xlu1 %v3738_v6, %s10655_s0  ;;  %v7344_v6 = vpop.eup %7343 }
 0xafd   : > { %v6372_v43 = vpop.f32.mrb[104].mxu1  ;;  %v7346_v35 = vpop.eup %7345 }
 0xafe   : > { %v4710_v17 = vmul.f32 %v7336_v16, %v6372_v43  ;;  %v4669_v33 = vpop.f32.mrb[105].mxu1  ;;  %v7348_v14 = vpop.eup %7347 }
 0xaff   : > { %v4708_v10 = vmul.f32 %v7338_v52, %v4669_v33  ;;  %v6373_v36 = vpop.f32.mrb[106].mxu1  ;;  %v7350_v23 = vpop.eup %7349  ;;  %v7355_v33 = vld [vmem:[%s7547_s17 + $0x30] sm:$0xff] }
 0xb00   : > { %v4711_v29 = vmul.f32 %v7340_v53, %v6373_v36  ;;  %v4672_v54 = vpop.f32.mrb[107].mxu1  ;;  %4736 = vrot.lane.b32.xlu1 %v4718_v18, %s10483_s19 }
 0xb01   : > { %v4709_v62 = vmul.f32 %v7342_v45, %v4672_v54  ;;  %v7356_v45 = vld [vmem:[%s7547_s17 + $0x20] sm:$0xff] }
 0xb02   : > { %v4721_v0 = vpack.c.bf16 %v4711_v29, %v4710_v17 }
 0xb03   : > { %v4720_v42 = vpack.c.bf16 %v4709_v62, %v4708_v10  ;;  %v7357_v62 = vld [vmem:[%s7547_s17 + $0x38] sm:$0xff] }
 0xb04   : > { %4738 = vrot.lane.b32.xlu1 %v4719_v40, %s10483_s19  ;;  %4742 = vrot.lane.b32.xlu0 %v4721_v0, %s10483_s19 }
 0xb05   : > { %v6376_v55 = vpop.f32.mrb[108].mxu1 }
 0xb06   : > { %v4714_v30 = vmul.f32 %v7344_v6, %v6376_v55  ;;  %v4685_v58 = vpop.f32.mrb[109].mxu1  ;;  %v7358_v6 = vld [vmem:[%s7547_s17 + $0x28] sm:$0xff] }
 0xb07   : > { %v4712_v56 = vmul.f32 %v7346_v35, %v4685_v58  ;;  %v6377_v44 = vpop.f32.mrb[110].mxu1 }
 0xb08   : > { %v4715_v38 = vmul.f32 %v7348_v14, %v6377_v44  ;;  %v4688_v22 = vpop.f32.mrb[111].mxu1  ;;  %4740 = vrot.lane.b32.xlu0 %v4720_v42, %s10483_s19 }
 0xb09   : > { %v4713_v39 = vmul.f32 %v7350_v23, %v4688_v22  ;;  %v7360_v22 = vld [vmem:[%s7547_s17 + $0x40] sm:$0xff] }
 0xb0a   : > { %v4723_v37 = vpack.c.bf16 %v4715_v38, %v4714_v30 }
 0xb0b   : > { %v4722_v60 = vpack.c.bf16 %v4713_v39, %v4712_v56  ;;  %v7359_v56 = vld [vmem:[%s7547_s17 + $0x50] sm:$0xff] }
 0xb0c   : > { %3765 = vrot.lane.b32.xlu0 %v3742_v8, %s10655_s0 }
 0xb10   : > { %4744 = vrot.lane.b32.xlu0 %v4722_v60, %s10483_s19  ;;  %v7361_v60 = vld [vmem:[%s7547_s17 + $0x58] sm:$0xff] }
 0xb14   : > { %4746 = vrot.lane.b32.xlu0 %v4723_v37, %s10483_s19  ;;  %s269_s19 = sand.u32 1, %s7421_s25  }
 0xb15   : > { %s5053_s3 = sshll.u32 %s269_s19, 7  ;;  %s10193_s20 = scalar_lea.sflag [#allocation5], %s269_s19 }
 0xb16   : > { %s10138_s6 = scalar_lea.vmem [#allocation4], %s5053_s3 }
 0xb17   : > { %s4987_s13 = sshll.u32 %s10138_s6, 4  ;;  %s10185_s13 = int_to_ptr.vmem [resolvable:$true] %s4987_s13 }
 0xb18   : > { %s7367_s8 = scalar_lea.vmem %s10185_s13, 2048  ;;  %p7374_p0 = scmp.lt.s32.totalorder %s10185_s13, %s7372_s23 }
 0xb19   : > { %p7368_p11 = scmp.ne.s32.totalorder %s10185_s13, %s7367_s8  ;;  %p7375_p1 = scmp.lt.s32.totalorder %s7373_s14, %s7367_s8 }
 0xb1b   : > { %p7369_p12 = pnand %p7368_p11, %p7532_p5  ;;  %p7376_p2 = por %p7375_p1, %p7374_p0 }
 0xb1d   : > { %p7370_p13 = pneg %p7369_p12 }
 0xb1f   : > { %p7377_p3 = pnand %p7376_p2, %p7370_p13 }
 0xb66   : > { %v4735_v31 = vpop.permute.xlu1 %4734 }
 0xb67   : > { %4758 = vst.msk [vmem:[#allocation3 + $0x8] sm:$0xff] %vm4756_vm0, %v4735_v31 }
 0xb6a   : > { %v4733_v57 = vpop.permute.xlu1 %4732 }
 0xb6b   : > { %4757 = vst.msk [vmem:[#allocation3] sm:$0xff] %vm4756_vm0, %v4733_v57  ;;  %v7362_v57 = vld [vmem:[%s7547_s17 + $0x48] sm:$0xff] }
 0xb6e   : > { %v3758_v15 = vpop.permute.xlu1 %3757  ;;  %v4766_v12 = vld [vmem:[#allocation3 + $0x8] sm:$0xff] }
 0xb6f   : > { %3779 = vst.msk [vmem:[#allocation3 + $0x18] sm:$0xff] %vm3775_vm2, %v3758_v15 }
 0xb72   : > { %v4737_v51 = vpop.permute.xlu1 %4736  ;;  %v4765_v25 = vld [vmem:[#allocation3] sm:$0xff] }
 0xb73   : > { %4759 = vst.msk [vmem:[#allocation3 + $0x10] sm:$0xff] %vm4756_vm0, %v4737_v51  ;;  %6394 = vmatprep.mubr.bf16.mxu0 %v4765_v25 }
 0xb74   : > { %6395 = vmatmul.mubr.bf16.vlgmr.msra.gmra.mrb[128].mxu0 %v4766_v12 }
 0xb76   : > { %v4739_v59 = vpop.permute.xlu1 %4738  ;;  %v4743_v8 = vpop.permute.xlu0 %4742 }
 0xb77   : > { %4760 = vst.msk [vmem:[#allocation3 + $0x18] sm:$0xff] %vm4756_vm0, %v4739_v59  ;;  %4762 = vst.msk [vmem:[#allocation3 + $0x28] sm:$0xff] %vm4756_vm0, %v4743_v8 }
 0xb7a   : > { %v4741_v2 = vpop.permute.xlu0 %4740  ;;  %v4767_v21 = vld [vmem:[#allocation3 + $0x10] sm:$0xff] }
 0xb7b   : > { %4761 = vst.msk [vmem:[#allocation3 + $0x20] sm:$0xff] %vm4756_vm0, %v4741_v2  ;;  %6398 = vmatprep.mubr.bf16.mxu0 %v4767_v21  ;;  %v7363_v2 = vld [vmem:[%s7547_s17 + $0x70] sm:$0xff] }
 0xb7e   : > { %v3766_v50 = vpop.permute.xlu0 %3765  ;;  %v4768_v63 = vld [vmem:[#allocation3 + $0x18] sm:$0xff]  ;;  %v4770_v9 = vld [vmem:[#allocation3 + $0x28] sm:$0xff] }
 0xb7f   : > { %3783 = vst.msk [vmem:[#allocation3 + $0x38] sm:$0xff] %vm3775_vm2, %v3766_v50  ;;  %6399 = vmatmul.mubr.bf16.gmra.mrb[132].mxu0 %v4768_v63 }
 0xb82   : > { %v4745_v20 = vpop.permute.xlu0 %4744  ;;  %v4769_v11 = vld [vmem:[#allocation3 + $0x20] sm:$0xff] }
 0xb83   : > { %4763 = vst.msk [vmem:[#allocation3 + $0x30] sm:$0xff] %vm4756_vm0, %v4745_v20  ;;  %6402 = vmatprep.mubr.bf16.mxu1 %v4769_v11  ;;  %v7364_v20 = vld [vmem:[%s7547_s17 + $0x60] sm:$0xff] }
 0xb84   : > { %6403 = vmatmul.mubr.bf16.vlgmr.msra.gmra.mrb[112].mxu1 %v4770_v9 }
 0xb86   : > { %v4747_v13 = vpop.permute.xlu0 %4746 }
 0xb87   : > { %4764 = vst.msk [vmem:[#allocation3 + $0x38] sm:$0xff] %vm4756_vm0, %v4747_v13  ;;  %v7365_v13 = vld [vmem:[%s7547_s17 + $0x78] sm:$0xff] }
 0xb8a   : > { %v4771_v7 = vld [vmem:[#allocation3 + $0x30] sm:$0xff] }
 0xb8b   : > { %6406 = vmatprep.mubr.bf16.mxu1 %v4771_v7 }
 0xb8e   : > { %v4772_v24 = vld [vmem:[#allocation3 + $0x38] sm:$0xff] }
 0xb8f   : > { %6407 = vmatmul.mubr.bf16.gmra.mrb[116].mxu1 %v4772_v24  ;;  %v7366_v24 = vld [vmem:[%s7547_s17 + $0x68] sm:$0xff] }
 0xc47   : > { %v6396_v32 = vpop.f32.mrb[128].mxu0 }
 0xc48   : > { %v4887_v1 = vadd.f32 %v6396_v32, %v10128_v27  ;;  %v4878_v49 = vpop.f32.mrb[129].mxu0 }
 0xc49   : > { %v4879_v3 = vadd.f32 %v10128_v27, %v4878_v49  ;;  %v6397_v28 = vpop.f32.mrb[130].mxu0 }
 0xc4a   : > { %v4943_v19 = vadd.f32 %v7351_v61, %v4887_v1  ;;  %v4890_v5 = vadd.f32 %v6397_v28, %v10128_v27  ;;  %v4881_v48 = vpop.f32.mrb[131].mxu0 }
 0xc4b   : > { %v4941_v47 = vadd.f32 %v7352_v34, %v4879_v3  ;;  %v4882_v46 = vadd.f32 %v10128_v27, %v4881_v48 }
 0xc4c   : > { %4959 = vst [vmem:[%s10138_s6 + $0x10] sm:$0xff] %v4943_v19  ;;  %v4944_v41 = vadd.f32 %v7353_v26, %v4890_v5 }
 0xc4d   : > { %4957 = vst [vmem:[%s10138_s6] sm:$0xff] %v4941_v47  ;;  %v4942_v40 = vadd.f32 %v7354_v4, %v4882_v46 }
 0xc4e   : > { %4960 = vst [vmem:[%s10138_s6 + $0x18] sm:$0xff] %v4944_v41 }
 0xc4f   : > { %4958 = vst [vmem:[%s10138_s6 + $0x8] sm:$0xff] %v4942_v40 }
 0xc52   : > { %v6400_v18 = vpop.f32.mrb[132].mxu0 }
 0xc53   : > { %v4903_v16 = vadd.f32 %v6400_v18, %v10128_v27  ;;  %v4894_v43 = vpop.f32.mrb[133].mxu0 }
 0xc54   : > { %v4895_v52 = vadd.f32 %v10128_v27, %v4894_v43  ;;  %v6401_v17 = vpop.f32.mrb[134].mxu0 }
 0xc55   : > { %v4947_v53 = vadd.f32 %v7355_v33, %v4903_v16  ;;  %v4906_v10 = vadd.f32 %v6401_v17, %v10128_v27  ;;  %v4897_v36 = vpop.f32.mrb[135].mxu0 }
 0xc56   : > { %v4945_v29 = vadd.f32 %v7356_v45, %v4895_v52  ;;  %v4898_v54 = vadd.f32 %v10128_v27, %v4897_v36 }
 0xc57   : > { %4963 = vst [vmem:[%s10138_s6 + $0x30] sm:$0xff] %v4947_v53  ;;  %v4948_v0 = vadd.f32 %v7357_v62, %v4906_v10  ;;  %v6404_v42 = vpop.f32.mrb[112].mxu1 }
 0xc58   : > { %4961 = vst [vmem:[%s10138_s6 + $0x20] sm:$0xff] %v4945_v29  ;;  %v4946_v55 = vadd.f32 %v7358_v6, %v4898_v54  ;;  %v4919_v35 = vadd.f32 %v6404_v42, %v10128_v27  ;;  %v4910_v30 = vpop.f32.mrb[113].mxu1 }
 0xc59   : > { %4964 = vst [vmem:[%s10138_s6 + $0x38] sm:$0xff] %v4948_v0  ;;  %v4911_v58 = vadd.f32 %v10128_v27, %v4910_v30  ;;  %v6405_v14 = vpop.f32.mrb[114].mxu1 }
 0xc5a   : > { %4962 = vst [vmem:[%s10138_s6 + $0x28] sm:$0xff] %v4946_v55  ;;  %v4951_v44 = vadd.f32 %v7359_v56, %v4919_v35  ;;  %v4922_v23 = vadd.f32 %v6405_v14, %v10128_v27  ;;  %v4913_v38 = vpop.f32.mrb[115].mxu1 }
 0xc5b   : > { %v4949_v39 = vadd.f32 %v7360_v22, %v4911_v58  ;;  %v4914_v37 = vadd.f32 %v10128_v27, %v4913_v38 }
 0xc5c   : > { %4967 = vst [vmem:[%s10138_s6 + $0x50] sm:$0xff] %v4951_v44  ;;  %v4952_v31 = vadd.f32 %v7361_v60, %v4922_v23 }
 0xc5d   : > { %4965 = vst [vmem:[%s10138_s6 + $0x40] sm:$0xff] %v4949_v39  ;;  %v4950_v15 = vadd.f32 %v7362_v57, %v4914_v37 }
 0xc5e   : > { %4968 = vst [vmem:[%s10138_s6 + $0x58] sm:$0xff] %v4952_v31 }
 0xc5f   : > { %4966 = vst [vmem:[%s10138_s6 + $0x48] sm:$0xff] %v4950_v15 }
 0xc62   : > { %v6408_v51 = vpop.f32.mrb[116].mxu1 }
 0xc63   : > { %v4935_v25 = vadd.f32 %v6408_v51, %v10128_v27  ;;  %v4926_v12 = vpop.f32.mrb[117].mxu1 }
 0xc64   : > { %v4927_v59 = vadd.f32 %v10128_v27, %v4926_v12  ;;  %v6409_v8 = vpop.f32.mrb[118].mxu1 }
 0xc65   : > { %v4955_v21 = vadd.f32 %v7363_v2, %v4935_v25  ;;  %v4938_v50 = vadd.f32 %v6409_v8, %v10128_v27  ;;  %v4929_v63 = vpop.f32.mrb[119].mxu1 }
 0xc66   : > { %v4953_v11 = vadd.f32 %v7364_v20, %v4927_v59  ;;  %v4930_v9 = vadd.f32 %v10128_v27, %v4929_v63 }
 0xc67   : > { %4971 = vst [vmem:[%s10138_s6 + $0x70] sm:$0xff] %v4955_v21  ;;  %v4956_v7 = vadd.f32 %v7365_v13, %v4938_v50 }
 0xc68   : > { %4969 = vst [vmem:[%s10138_s6 + $0x60] sm:$0xff] %v4953_v11  ;;  %v4954_v32 = vadd.f32 %v7366_v24, %v4930_v9 }
 0xc69   : > { %4972 = vst [vmem:[%s10138_s6 + $0x78] sm:$0xff] %v4956_v7 }
 0xc6a   : > { %4970 = vst [vmem:[%s10138_s6 + $0x68] sm:$0xff] %v4954_v32 }
 0xc6b   : > { %7380 = shalt.err (!%p7377_p3)
}
 0xc6c   : > { %s7381_s17 = scalar_lea.hbm %s10183_s28, 2048  ;;  %s7385_s1 = scalar_lea.hbm %s10241_s7, 4096 }
 0xc6d   : > { %p7382_p4 = scmp.ne.s32.totalorder %s10183_s28, %s7381_s17  ;;  %p7386_p9 = scmp.lt.u32.totalorder %s10183_s28, %s10241_s7 }
 0xc6e   : > { %p7387_p10 = scmp.lt.u32.totalorder %s7385_s1, %s7381_s17  ;;  %p7389_p12 = scmp.lt.u32.totalorder %s7381_s17, %s10183_s28 }
 0xc6f   : > { %p7383_p7 = pnand %p7382_p4, %p7532_p5 }
 0xc70   : > { %p7388_p11 = por %p7387_p10, %p7386_p9 }
 0xc71   : > { %p7384_p8 = pneg %p7383_p7 }
 0xc72   : > { %p7390_p13 = por %p7389_p12, %p7388_p11 }
 0xc74   : > { %p7391_p0 = pnand %p7390_p13, %p7384_p8 }
 0xc76   : > { %7394 = shalt.err (!%p7391_p0)
}
 0xc77   : > { %s7452_s0 = smov 128   ;;  %s7453_s2 = smov 8  }
 0xc78   : > { %6874 = dma.vmem_to_hbm [thread:$0]  (%p7532_p5), %s10185_s13, 2048, %s10183_s28, %s10193_s20, %s7452_s0, %s7452_s0, %s7453_s2  }
 0xc79 PF: > { %p6880_p1 = scmp.ge.s32.totalorder %s7429_s27, 2  ;;  %s5002_s3 = sand.u32 1, %s7417_s24  }
 0xc7a   : > { %s5003_s6 = scalar_lea.sflag [#allocation5], %s5002_s3 }
 0xc7b   : > { %p6877_p2 = pnand %p6880_p1, %p7536_p6 }
 0xc7d   : > { %7412 = dma.done.wait (!%p6877_p2), %s5003_s6, 2048  }
 0xc7e   : > { %7414 = vsyncadd (!%p6877_p2), %s5003_s6, 4294965248  ;;  %p17_p3 = scmp.ge.s32.totalorder %s7519_s30, 4   ;;  %s10688_s24 = smov %s7421_s25 }
 0xc7f   : > { %s10689_s25 = smov %s7425_s26  ;;  %s10690_s26 = smov %s7530_s10 }
 0xc80   : > { %s10691_s27 = smov %s7519_s30  ;;  %19 = sbr.rel (!%p17_p3) target bundleno = 9 (0x9), region = 86 }
 0xc87   :  { %5008 = vsyncpa [#allocation5], 1 }
 0xc88   :  { %5010 = vsyncpa [#allocation5 + $0x1], 1 }

</bundles_post_ra>
